<compile_context>
chip_gen: v5e
topology: v5e:2x2
jax: 0.10.0
libtpu: 0.0.40
codegen_flags: <defaults>
</compile_context>

<pallas_src>
import math

import jax
import jax.numpy as jnp
from jax import lax
from jax.experimental import pallas as pl
from jax.experimental.pallas import tpu as pltpu  # noqa: F401

# ---------------- small-shape configuration (consistent with the module) ----
B = 2                 # batch (the fused "attention over batch" stage needs B == 2)
C_IN = 3              # image channels
IMG = 32              # image spatial size
PATCH = 16            # ViT patch size
DV = 64               # ViT embed dim (stand-in for 768), 8 heads -> dh = 8
IMG_HEADS = 8
E = 32                # text/model embed_dim, fused attention uses 4 heads
SA_HEADS = 4
T = 8                 # text sequence length
VOCAB = 100
NUM_CLASSES = 1

N_PATCH = (IMG // PATCH) ** 2        # 4
S_IMG = N_PATCH + 1                  # patches + cls token = 5
NT = S_IMG + T                       # fused token count = 13
CLS_START = max(0, NT - 200)         # fused[:, -200:, :]  (== 0 here)
OUT_LEN = NT - CLS_START
PATCH_DIM = C_IN * PATCH * PATCH     # 768
DH_IMG = DV // IMG_HEADS             # 8
DH_SA = E // SA_HEADS                # 8

assert B == 2, "fused self-attention stage is specialized to B == 2"


# ---------------- packed weight-slab layout (static, lane width = DV) --------
def _make_slab_layout():
    entries = [
        ("patch_w", PATCH_DIM), ("cls_pos0", 1), ("patch_bias_pos", N_PATCH),
        ("img_wq", DV), ("img_wk", DV), ("img_wv", DV),
        ("img_bq", 1), ("img_bk", 1), ("img_bv", 1),
        ("img_wo", DV), ("img_bo", 1),
        ("head_mask", IMG_HEADS),
        ("vit_l1_w", DV), ("vit_l1_b", 1),
        ("vit_l2_w", DV), ("vit_l2_b", 1),
        ("bert_l1_w", DV), ("bert_l1_b", 1),
        ("bert_l2_w", DV), ("bert_l2_b", 1),
        ("sa_wq", DV), ("sa_wk", DV), ("sa_wv", DV),
        ("sa_bq", 1), ("sa_bk", 1), ("sa_bv", 1),
        ("sa_wo", DV), ("sa_bo", 1),
        ("sa_M", DV), ("sa_Mt", DV),
        ("cls_row", 1), ("cls_bias", 1),
    ]
    layout, off = {}, 0
    for name, rows in entries:
        layout[name] = (off, rows)
        off += rows
        off = ((off + 7) // 8) * 8          # 8-sublane-align every entry start
    return layout, off


SLAB, SLAB_ROWS = _make_slab_layout()


# ---------------- fused forward kernel --------------------------------------
def _l2norm(x):
    # F.normalize(p=2, eps=1e-12): x / max(||x||, eps) == x * rsqrt(max(ss, eps^2))
    ss = jnp.sum(x * x, axis=-1, keepdims=True)
    return x * lax.rsqrt(jnp.maximum(ss, 1e-24))


def _fused_forward_kernel(patches_ref, text_ref, slab_ref, out_ref):
    f32 = jnp.float32

    def w(name):
        r0, nr = SLAB[name]
        return slab_ref[r0:r0 + nr, :]

    # ---------------- ViT stand-in stem (both samples in one dot) ------------
    pe = jnp.dot(patches_ref[...], w("patch_w"),
                 preferred_element_type=f32)                       # (B*N_PATCH, DV)
    cls_tok = w("cls_pos0")                                        # cls + pos[0], (1, DV)
    patch_bias = w("patch_bias_pos")                               # conv bias + pos[1:], (N_PATCH, DV)
    fm_parts = []
    for b in range(B):
        fm_parts.append(cls_tok)
        fm_parts.append(pe[b * N_PATCH:(b + 1) * N_PATCH, :] + patch_bias)
    fm_all = jnp.concatenate(fm_parts, axis=0)                     # (B*S_IMG, DV)

    # ---------------- image MHA (8 heads) ------------------------------------
    # q/k/v projections batched over both samples; 1/sqrt(dh) folded into Wq/bq.
    q_all = jnp.dot(fm_all, w("img_wq"), preferred_element_type=f32) + w("img_bq")
    k_all = jnp.dot(fm_all, w("img_wk"), preferred_element_type=f32) + w("img_bk")
    v_all = jnp.dot(fm_all, w("img_wv"), preferred_element_type=f32) + w("img_bv")
    head_masks = w("head_mask")                                    # (IMG_HEADS, DV)

    ctx_parts = []
    for b in range(B):
        lo, hi = b * S_IMG, (b + 1) * S_IMG
        q_b, k_b, v_b = q_all[lo:hi, :], k_all[lo:hi, :], v_all[lo:hi, :]
        ctx = jnp.zeros((S_IMG, DV), f32)
        for h in range(IMG_HEADS):
            m_h = head_masks[h:h + 1, :]                           # (1, DV) lane mask
            # (q .* mask_h) . k contracts only head-h lanes -> per-head scores
            s = lax.dot_general(q_b * m_h, k_b, (((1,), (1,)), ((), ())),
                                preferred_element_type=f32)        # (S, S)
            p = jnp.exp(s - jnp.max(s, axis=-1, keepdims=True))
            p = p * pl.reciprocal(jnp.sum(p, axis=-1, keepdims=True), approx=True)
            # masked v -> this head's output lands only in its own lanes;
            # summing over heads assembles the concat for free.
            ctx = ctx + jnp.dot(p, v_b * m_h, preferred_element_type=f32)
        ctx_parts.append(ctx)
    attn_all = jnp.concatenate(ctx_parts, axis=0)                  # (B*S_IMG, DV)
    attn_all = jnp.dot(attn_all, w("img_wo"),
                       preferred_element_type=f32) + w("img_bo")

    # ---------------- vit_l1 -> relu -> vit_l2 -> L2 normalize ---------------
    x = jnp.maximum(jnp.dot(attn_all, w("vit_l1_w"),
                            preferred_element_type=f32) + w("vit_l1_b"), 0.0)
    patch_emb = _l2norm(jnp.dot(x, w("vit_l2_w"),
                                preferred_element_type=f32) + w("vit_l2_b"))
    # (B*S_IMG, DV); lanes >= E are exactly zero (zero-padded weights/bias)

    # ---------------- text: bert_l1 -> relu -> bert_l2 -> L2 normalize -------
    z = jnp.maximum(jnp.dot(text_ref[...], w("bert_l1_w"),
                            preferred_element_type=f32) + w("bert_l1_b"), 0.0)
    zjs = _l2norm(jnp.dot(z, w("bert_l2_w"),
                          preferred_element_type=f32) + w("bert_l2_b"))  # (B*T, DV)

    # ---------------- patch_zjs assembly (registers only, no scratch) --------
    pz_parts = []
    for b in range(B):
        pz_parts.append(patch_emb[b * S_IMG:(b + 1) * S_IMG, :])
        pz_parts.append(zjs[b * T:(b + 1) * T, :])
    pz_all = jnp.concatenate(pz_parts, axis=0)                     # (B*NT, DV)

    # ---------------- fused self-attention over the *batch* axis -------------
    # Reference quirk: (B, NT, E) fed to a seq-first MHA, so attention runs over
    # the length-B axis while NT acts as the MHA batch.  Collapsed per-head work
    # via the block-indicator matrix M (pre-scaled by 1/sqrt(dh)).
    q_sa = jnp.dot(pz_all, w("sa_wq"), preferred_element_type=f32) + w("sa_bq")
    k_sa = jnp.dot(pz_all, w("sa_wk"), preferred_element_type=f32) + w("sa_bk")
    v_sa = jnp.dot(pz_all, w("sa_wv"), preferred_element_type=f32) + w("sa_bv")
    m_sc = w("sa_M")      # (DV, DV): (q*k) @ m_sc -> per-head scores
    m_t = w("sa_Mt")      # (DV, DV): per-head weights -> per-lane weights

    k0, k1 = k_sa[0:NT, :], k_sa[NT:2 * NT, :]
    v0, v1 = v_sa[0:NT, :], v_sa[NT:2 * NT, :]
    dv01 = v0 - v1
    cls_row = w("cls_row")                                         # (1, DV)

    logits_rows = []
    for b in range(B):                        # output "sequence" position l = b
        q_b = q_sa[b * NT:(b + 1) * NT, :]
        s0 = jnp.dot(q_b * k0, m_sc, preferred_element_type=f32)   # (NT, DV), cols>=SA_HEADS zero
        s1 = jnp.dot(q_b * k1, m_sc, preferred_element_type=f32)
        mmax = jnp.maximum(s0, s1)
        e0 = jnp.exp(s0 - mmax)
        e1 = jnp.exp(s1 - mmax)
        w0 = e0 * pl.reciprocal(e0 + e1, approx=True)              # softmax weight on key 0
        w0e = jnp.dot(w0, m_t, preferred_element_type=f32)         # expand per-head -> per-lane
        o = v1 + w0e * dv01                                        # w0*v0 + (1-w0)*v1
        fused = jnp.dot(o, w("sa_wo"),
                        preferred_element_type=f32) + w("sa_bo")   # (NT, DV)
        if CLS_START:
            fused = fused[CLS_START:, :]
        # classifier (num_classes = 1) as a lane-dense (1, OUT_LEN) row
        logits_rows.append(
            lax.dot_general(cls_row, fused, (((1,), (1,)), ((), ())),
                            preferred_element_type=f32))
    out_ref[...] = (jnp.concatenate(logits_rows, axis=0)
                    + w("cls_bias")[0:1, 0:1])                     # (B, OUT_LEN)


# ---------------- parameter init + host-side slab packing --------------------
def _pack_slab(p):
    slab = jnp.zeros((SLAB_ROWS, DV), jnp.float32)

    def put(s, name, val):
        r0, _ = SLAB[name]
        val = jnp.asarray(val, jnp.float32)
        rr, cc = val.shape
        return s.at[r0:r0 + rr, 0:cc].set(val)

    scale_img = 1.0 / math.sqrt(DH_IMG)
    slab = put(slab, "patch_w", p["vit_patch_w"])
    slab = put(slab, "cls_pos0", p["vit_cls"] + p["vit_pos"][0:1])
    slab = put(slab, "patch_bias_pos", p["vit_patch_b"] + p["vit_pos"][1:S_IMG])
    slab = put(slab, "img_wq", p["img_in_w"][:, 0:DV] * scale_img)   # fold 1/sqrt(dh)
    slab = put(slab, "img_wk", p["img_in_w"][:, DV:2 * DV])
    slab = put(slab, "img_wv", p["img_in_w"][:, 2 * DV:3 * DV])
    slab = put(slab, "img_bq", p["img_in_b"][:, 0:DV] * scale_img)
    slab = put(slab, "img_bk", p["img_in_b"][:, DV:2 * DV])
    slab = put(slab, "img_bv", p["img_in_b"][:, 2 * DV:3 * DV])
    slab = put(slab, "img_wo", p["img_out_w"])
    slab = put(slab, "img_bo", p["img_out_b"])
    head_mask = jnp.repeat(jnp.eye(IMG_HEADS, dtype=jnp.float32), DH_IMG, axis=1)
    slab = put(slab, "head_mask", head_mask)
    slab = put(slab, "vit_l1_w", p["vit_l1_w"])
    slab = put(slab, "vit_l1_b", p["vit_l1_b"])
    slab = put(slab, "vit_l2_w", p["vit_l2_w"])
    slab = put(slab, "vit_l2_b", p["vit_l2_b"])
    slab = put(slab, "bert_l1_w", p["bert_l1_w"])
    slab = put(slab, "bert_l1_b", p["bert_l1_b"])
    slab = put(slab, "bert_l2_w", p["bert_l2_w"])
    slab = put(slab, "bert_l2_b", p["bert_l2_b"])
    sa = p["sa_layers"][-1]   # earlier layers are dead in the reference loop
    slab = put(slab, "sa_wq", sa["in_w"][:, 0:E])
    slab = put(slab, "sa_wk", sa["in_w"][:, E:2 * E])
    slab = put(slab, "sa_wv", sa["in_w"][:, 2 * E:3 * E])
    slab = put(slab, "sa_bq", sa["in_b"][:, 0:E])
    slab = put(slab, "sa_bk", sa["in_b"][:, E:2 * E])
    slab = put(slab, "sa_bv", sa["in_b"][:, 2 * E:3 * E])
    slab = put(slab, "sa_wo", sa["out_w"])
    slab = put(slab, "sa_bo", sa["out_b"])
    m_ind = jnp.repeat(jnp.eye(SA_HEADS, dtype=jnp.float32), DH_SA, axis=1).T  # (E, SA_HEADS)
    slab = put(slab, "sa_M", m_ind / math.sqrt(DH_SA))
    slab = put(slab, "sa_Mt", m_ind.T)
    slab = put(slab, "cls_row", p["cls_w"].T)
    slab = put(slab, "cls_bias", p["cls_b"])
    return slab


def init_params(key):
    ks = iter(jax.random.split(key, 40))

    def xavier(k_in, n_out):
        bound = math.sqrt(6.0 / (k_in + n_out))
        return jax.random.uniform(next(ks), (k_in, n_out), jnp.float32, -bound, bound)

    def normal(shape, std=0.02):
        return std * jax.random.normal(next(ks), shape, jnp.float32)

    raw = {
        # ViT stand-in stem
        "vit_patch_w": normal((PATCH_DIM, DV)),
        "vit_patch_b": jnp.zeros((1, DV), jnp.float32),
        "vit_cls": normal((1, DV)),
        "vit_pos": normal((S_IMG, DV)),
        # image_attention (MultiheadAttention, 8 heads), (K, N) layout
        "img_in_w": xavier(DV, 3 * DV),
        "img_in_b": jnp.zeros((1, 3 * DV), jnp.float32),
        "img_out_w": xavier(DV, DV),
        "img_out_b": jnp.zeros((1, DV), jnp.float32),
        # vit_l1 / vit_l2
        "vit_l1_w": xavier(DV, DV), "vit_l1_b": jnp.full((1, DV), 0.01, jnp.float32),
        "vit_l2_w": xavier(DV, E), "vit_l2_b": jnp.full((1, E), 0.01, jnp.float32),
        # bert_l1 / bert_l2
        "bert_l1_w": xavier(E, E), "bert_l1_b": jnp.full((1, E), 0.01, jnp.float32),
        "bert_l2_w": xavier(E, E), "bert_l2_b": jnp.full((1, E), 0.01, jnp.float32),
        # classifier
        "cls_w": xavier(E, NUM_CLASSES),
        "cls_b": jnp.full((1, NUM_CLASSES), 0.01, jnp.float32),
        # text LLM stand-in
        "tok_embed": normal((VOCAB, E)),
    }
    # two self-attention layers for module parity; only the last affects output
    raw["sa_layers"] = [
        dict(in_w=xavier(E, 3 * E), in_b=jnp.zeros((1, 3 * E), jnp.float32),
             out_w=xavier(E, E), out_b=jnp.zeros((1, E), jnp.float32))
        for _ in range(2)
    ]
    return {"slab": _pack_slab(raw), "tok_embed": raw["tok_embed"]}


# ---------------- forward pass (one pallas_call, 3 input DMAs) ---------------
@jax.jit
def forward(params, image, token_ids):
    Bsz, Cc, H, W = image.shape
    assert Bsz == B and Cc == C_IN and H == IMG and W == IMG, \
        "kernel is specialized to the configured toy shapes"
    # im2col for the 16x16/s16 patch-embedding conv (layout glue; the matmul
    # itself runs inside the fused kernel).
    patches = image.reshape(B, C_IN, H // PATCH, PATCH, W // PATCH, PATCH)
    patches = patches.transpose(0, 2, 4, 1, 3, 5).reshape(B * N_PATCH, PATCH_DIM)
    # text LLM stand-in: token-embedding lookup (last_hidden_state surrogate),
    # zero-padded E -> DV lanes so the whole kernel runs at one lane width.
    # TODO(synk): this gather and the im2col above remain wrapper-side XLA ops.
    text = params["tok_embed"][token_ids].reshape(B * T, E)
    text = jnp.pad(text, ((0, 0), (0, DV - E)))

    out = pl.pallas_call(
        _fused_forward_kernel,
        out_shape=jax.ShapeDtypeStruct((B, OUT_LEN), jnp.float32),
    )(patches, text, params["slab"])
    # restore the module's (B, OUT_LEN, num_classes) classifier output shape
    return out[..., None]


if __name__ == "__main__":
    key = jax.random.PRNGKey(0)
    pkey, ikey, tkey = jax.random.split(key, 3)
    params = init_params(pkey)
    image = jax.random.normal(ikey, (B, C_IN, IMG, IMG), jnp.float32)
    token_ids = jax.random.randint(tkey, (B, T), 0, VOCAB)

    out = forward(params, image, token_ids)
    out = jax.block_until_ready(out)
    assert out.shape == (B, OUT_LEN, NUM_CLASSES), out.shape
    assert bool(jnp.all(jnp.isfinite(out)))
    print("KERNEL_OK")
</pallas_src>

<mosaic_0001>
module attributes {stable_mosaic.version = 11 : i64} {
  func.func @_fused_forward_kernel(%arg0: memref<8x768xf32, #tpu.memory_space<vmem>>, %arg1: memref<16x64xf32, #tpu.memory_space<vmem>>, %arg2: memref<1800x64xf32, #tpu.memory_space<vmem>>, %arg3: memref<2x13xf32, #tpu.memory_space<vmem>>) attributes {dimension_semantics = [], scalar_prefetch = 0 : i64, scratch_operands = 0 : i64, tpu.core_type = #tpu.core_type<tc>} {
    %c0 = arith.constant 0 : index
    %c0_0 = arith.constant 0 : index
    %0 = vector.load %arg0[%c0, %c0_0] : memref<8x768xf32, #tpu.memory_space<vmem>>, vector<8x768xf32>
    %c0_1 = arith.constant 0 : index
    %c0_2 = arith.constant 0 : index
    %1 = vector.load %arg2[%c0_1, %c0_2] : memref<1800x64xf32, #tpu.memory_space<vmem>>, vector<768x64xf32>
    %cst = arith.constant dense<0.000000e+00> : vector<8x64xf32>
    %2 = tpu.matmul %0, %1, %cst {dimension_numbers = #tpu.dot_dimension_numbers<[1], [0], [0], [1], [0, 0, 1, 1], [], []>} : vector<8x768xf32>, vector<768x64xf32>, vector<8x64xf32> -> vector<8x64xf32>
    %c768 = arith.constant 768 : index
    %c0_3 = arith.constant 0 : index
    %3 = vector.load %arg2[%c768, %c0_3] : memref<1800x64xf32, #tpu.memory_space<vmem>>, vector<1x64xf32>
    %c776 = arith.constant 776 : index
    %c0_4 = arith.constant 0 : index
    %4 = vector.load %arg2[%c776, %c0_4] : memref<1800x64xf32, #tpu.memory_space<vmem>>, vector<4x64xf32>
    %5 = vector.extract_strided_slice %2 {offsets = [0, 0], sizes = [4, 64], strides = [1, 1]} : vector<8x64xf32> to vector<4x64xf32>
    %6 = arith.addf %5, %4 : vector<4x64xf32>
    %7 = vector.extract_strided_slice %2 {offsets = [4, 0], sizes = [4, 64], strides = [1, 1]} : vector<8x64xf32> to vector<4x64xf32>
    %8 = arith.addf %7, %4 : vector<4x64xf32>
    %9 = tpu.concatenate %3, %6, %3, %8 in 0 : vector<1x64xf32>, vector<4x64xf32>, vector<1x64xf32>, vector<4x64xf32> -> vector<10x64xf32>
    %c784 = arith.constant 784 : index
    %c0_5 = arith.constant 0 : index
    %10 = vector.load %arg2[%c784, %c0_5] : memref<1800x64xf32, #tpu.memory_space<vmem>>, vector<64x64xf32>
    %cst_6 = arith.constant dense<0.000000e+00> : vector<10x64xf32>
    %11 = tpu.matmul %9, %10, %cst_6 {dimension_numbers = #tpu.dot_dimension_numbers<[1], [0], [0], [1], [0, 0, 1, 1], [], []>} : vector<10x64xf32>, vector<64x64xf32>, vector<10x64xf32> -> vector<10x64xf32>
    %c976 = arith.constant 976 : index
    %c0_7 = arith.constant 0 : index
    %12 = vector.load %arg2[%c976, %c0_7] : memref<1800x64xf32, #tpu.memory_space<vmem>>, vector<1x64xf32>
    %13 = vector.broadcast %12 : vector<1x64xf32> to vector<10x64xf32>
    %14 = arith.addf %11, %13 : vector<10x64xf32>
    %c848 = arith.constant 848 : index
    %c0_8 = arith.constant 0 : index
    %15 = vector.load %arg2[%c848, %c0_8] : memref<1800x64xf32, #tpu.memory_space<vmem>>, vector<64x64xf32>
    %cst_9 = arith.constant dense<0.000000e+00> : vector<10x64xf32>
    %16 = tpu.matmul %9, %15, %cst_9 {dimension_numbers = #tpu.dot_dimension_numbers<[1], [0], [0], [1], [0, 0, 1, 1], [], []>} : vector<10x64xf32>, vector<64x64xf32>, vector<10x64xf32> -> vector<10x64xf32>
    %c984 = arith.constant 984 : index
    %c0_10 = arith.constant 0 : index
    %17 = vector.load %arg2[%c984, %c0_10] : memref<1800x64xf32, #tpu.memory_space<vmem>>, vector<1x64xf32>
    %18 = vector.broadcast %17 : vector<1x64xf32> to vector<10x64xf32>
    %19 = arith.addf %16, %18 : vector<10x64xf32>
    %c912 = arith.constant 912 : index
    %c0_11 = arith.constant 0 : index
    %20 = vector.load %arg2[%c912, %c0_11] : memref<1800x64xf32, #tpu.memory_space<vmem>>, vector<64x64xf32>
    %cst_12 = arith.constant dense<0.000000e+00> : vector<10x64xf32>
    %21 = tpu.matmul %9, %20, %cst_12 {dimension_numbers = #tpu.dot_dimension_numbers<[1], [0], [0], [1], [0, 0, 1, 1], [], []>} : vector<10x64xf32>, vector<64x64xf32>, vector<10x64xf32> -> vector<10x64xf32>
    %c992 = arith.constant 992 : index
    %c0_13 = arith.constant 0 : index
    %22 = vector.load %arg2[%c992, %c0_13] : memref<1800x64xf32, #tpu.memory_space<vmem>>, vector<1x64xf32>
    %23 = vector.broadcast %22 : vector<1x64xf32> to vector<10x64xf32>
    %24 = arith.addf %21, %23 : vector<10x64xf32>
    %c1072 = arith.constant 1072 : index
    %c0_14 = arith.constant 0 : index
    %25 = vector.load %arg2[%c1072, %c0_14] : memref<1800x64xf32, #tpu.memory_space<vmem>>, vector<8x64xf32>
    %26 = vector.extract_strided_slice %14 {offsets = [0, 0], sizes = [5, 64], strides = [1, 1]} : vector<10x64xf32> to vector<5x64xf32>
    %27 = vector.extract_strided_slice %19 {offsets = [0, 0], sizes = [5, 64], strides = [1, 1]} : vector<10x64xf32> to vector<5x64xf32>
    %28 = vector.extract_strided_slice %24 {offsets = [0, 0], sizes = [5, 64], strides = [1, 1]} : vector<10x64xf32> to vector<5x64xf32>
    %cst_15 = arith.constant 0.000000e+00 : f32
    %29 = vector.broadcast %cst_15 : f32 to vector<5x64xf32>
    %30 = vector.extract_strided_slice %25 {offsets = [0, 0], sizes = [1, 64], strides = [1, 1]} : vector<8x64xf32> to vector<1x64xf32>
    %31 = vector.broadcast %30 : vector<1x64xf32> to vector<5x64xf32>
    %32 = arith.mulf %26, %31 : vector<5x64xf32>
    %cst_16 = arith.constant dense<0.000000e+00> : vector<5x5xf32>
    %33 = tpu.matmul %32, %27, %cst_16 {dimension_numbers = #tpu.dot_dimension_numbers<[1], [1], [0], [0], [0, 0, 1, 0], [], []>} : vector<5x64xf32>, vector<5x64xf32>, vector<5x5xf32> -> vector<5x5xf32>
    %cst_17 = arith.constant dense<0xFF800000> : vector<5xf32>
    %34 = vector.multi_reduction <maximumf>, %33, %cst_17 [1] : vector<5x5xf32> to vector<5xf32>
    %35 = vector.shape_cast %34 : vector<5xf32> to vector<5x1xf32>
    %36 = vector.broadcast %35 : vector<5x1xf32> to vector<5x5xf32>
    %37 = arith.subf %33, %36 : vector<5x5xf32>
    %38 = math.exp %37 : vector<5x5xf32>
    %cst_18 = arith.constant dense<0.000000e+00> : vector<5xf32>
    %39 = vector.multi_reduction <add>, %38, %cst_18 [1] : vector<5x5xf32> to vector<5xf32>
    %40 = vector.shape_cast %39 : vector<5xf32> to vector<5x1xf32>
    %41 = tpu.reciprocal %40 {approx = true} : vector<5x1xf32> -> vector<5x1xf32>
    %42 = vector.broadcast %41 : vector<5x1xf32> to vector<5x5xf32>
    %43 = arith.mulf %38, %42 : vector<5x5xf32>
    %44 = vector.broadcast %30 : vector<1x64xf32> to vector<5x64xf32>
    %45 = arith.mulf %28, %44 : vector<5x64xf32>
    %cst_19 = arith.constant dense<0.000000e+00> : vector<5x64xf32>
    %46 = tpu.matmul %43, %45, %cst_19 {dimension_numbers = #tpu.dot_dimension_numbers<[1], [0], [0], [1], [0, 0, 1, 1], [], []>} : vector<5x5xf32>, vector<5x64xf32>, vector<5x64xf32> -> vector<5x64xf32>
    %47 = arith.addf %29, %46 : vector<5x64xf32>
    %48 = vector.extract_strided_slice %25 {offsets = [1, 0], sizes = [1, 64], strides = [1, 1]} : vector<8x64xf32> to vector<1x64xf32>
    %49 = vector.broadcast %48 : vector<1x64xf32> to vector<5x64xf32>
    %50 = arith.mulf %26, %49 : vector<5x64xf32>
    %cst_20 = arith.constant dense<0.000000e+00> : vector<5x5xf32>
    %51 = tpu.matmul %50, %27, %cst_20 {dimension_numbers = #tpu.dot_dimension_numbers<[1], [1], [0], [0], [0, 0, 1, 0], [], []>} : vector<5x64xf32>, vector<5x64xf32>, vector<5x5xf32> -> vector<5x5xf32>
    %cst_21 = arith.constant dense<0xFF800000> : vector<5xf32>
    %52 = vector.multi_reduction <maximumf>, %51, %cst_21 [1] : vector<5x5xf32> to vector<5xf32>
    %53 = vector.shape_cast %52 : vector<5xf32> to vector<5x1xf32>
    %54 = vector.broadcast %53 : vector<5x1xf32> to vector<5x5xf32>
    %55 = arith.subf %51, %54 : vector<5x5xf32>
    %56 = math.exp %55 : vector<5x5xf32>
    %cst_22 = arith.constant dense<0.000000e+00> : vector<5xf32>
    %57 = vector.multi_reduction <add>, %56, %cst_22 [1] : vector<5x5xf32> to vector<5xf32>
    %58 = vector.shape_cast %57 : vector<5xf32> to vector<5x1xf32>
    %59 = tpu.reciprocal %58 {approx = true} : vector<5x1xf32> -> vector<5x1xf32>
    %60 = vector.broadcast %59 : vector<5x1xf32> to vector<5x5xf32>
    %61 = arith.mulf %56, %60 : vector<5x5xf32>
    %62 = vector.broadcast %48 : vector<1x64xf32> to vector<5x64xf32>
    %63 = arith.mulf %28, %62 : vector<5x64xf32>
    %cst_23 = arith.constant dense<0.000000e+00> : vector<5x64xf32>
    %64 = tpu.matmul %61, %63, %cst_23 {dimension_numbers = #tpu.dot_dimension_numbers<[1], [0], [0], [1], [0, 0, 1, 1], [], []>} : vector<5x5xf32>, vector<5x64xf32>, vector<5x64xf32> -> vector<5x64xf32>
    %65 = arith.addf %47, %64 : vector<5x64xf32>
    %66 = vector.extract_strided_slice %25 {offsets = [2, 0], sizes = [1, 64], strides = [1, 1]} : vector<8x64xf32> to vector<1x64xf32>
    %67 = vector.broadcast %66 : vector<1x64xf32> to vector<5x64xf32>
    %68 = arith.mulf %26, %67 : vector<5x64xf32>
    %cst_24 = arith.constant dense<0.000000e+00> : vector<5x5xf32>
    %69 = tpu.matmul %68, %27, %cst_24 {dimension_numbers = #tpu.dot_dimension_numbers<[1], [1], [0], [0], [0, 0, 1, 0], [], []>} : vector<5x64xf32>, vector<5x64xf32>, vector<5x5xf32> -> vector<5x5xf32>
    %cst_25 = arith.constant dense<0xFF800000> : vector<5xf32>
    %70 = vector.multi_reduction <maximumf>, %69, %cst_25 [1] : vector<5x5xf32> to vector<5xf32>
    %71 = vector.shape_cast %70 : vector<5xf32> to vector<5x1xf32>
    %72 = vector.broadcast %71 : vector<5x1xf32> to vector<5x5xf32>
    %73 = arith.subf %69, %72 : vector<5x5xf32>
    %74 = math.exp %73 : vector<5x5xf32>
    %cst_26 = arith.constant dense<0.000000e+00> : vector<5xf32>
    %75 = vector.multi_reduction <add>, %74, %cst_26 [1] : vector<5x5xf32> to vector<5xf32>
    %76 = vector.shape_cast %75 : vector<5xf32> to vector<5x1xf32>
    %77 = tpu.reciprocal %76 {approx = true} : vector<5x1xf32> -> vector<5x1xf32>
    %78 = vector.broadcast %77 : vector<5x1xf32> to vector<5x5xf32>
    %79 = arith.mulf %74, %78 : vector<5x5xf32>
    %80 = vector.broadcast %66 : vector<1x64xf32> to vector<5x64xf32>
    %81 = arith.mulf %28, %80 : vector<5x64xf32>
    %cst_27 = arith.constant dense<0.000000e+00> : vector<5x64xf32>
    %82 = tpu.matmul %79, %81, %cst_27 {dimension_numbers = #tpu.dot_dimension_numbers<[1], [0], [0], [1], [0, 0, 1, 1], [], []>} : vector<5x5xf32>, vector<5x64xf32>, vector<5x64xf32> -> vector<5x64xf32>
    %83 = arith.addf %65, %82 : vector<5x64xf32>
    %84 = vector.extract_strided_slice %25 {offsets = [3, 0], sizes = [1, 64], strides = [1, 1]} : vector<8x64xf32> to vector<1x64xf32>
    %85 = vector.broadcast %84 : vector<1x64xf32> to vector<5x64xf32>
    %86 = arith.mulf %26, %85 : vector<5x64xf32>
    %cst_28 = arith.constant dense<0.000000e+00> : vector<5x5xf32>
    %87 = tpu.matmul %86, %27, %cst_28 {dimension_numbers = #tpu.dot_dimension_numbers<[1], [1], [0], [0], [0, 0, 1, 0], [], []>} : vector<5x64xf32>, vector<5x64xf32>, vector<5x5xf32> -> vector<5x5xf32>
    %cst_29 = arith.constant dense<0xFF800000> : vector<5xf32>
    %88 = vector.multi_reduction <maximumf>, %87, %cst_29 [1] : vector<5x5xf32> to vector<5xf32>
    %89 = vector.shape_cast %88 : vector<5xf32> to vector<5x1xf32>
    %90 = vector.broadcast %89 : vector<5x1xf32> to vector<5x5xf32>
    %91 = arith.subf %87, %90 : vector<5x5xf32>
    %92 = math.exp %91 : vector<5x5xf32>
    %cst_30 = arith.constant dense<0.000000e+00> : vector<5xf32>
    %93 = vector.multi_reduction <add>, %92, %cst_30 [1] : vector<5x5xf32> to vector<5xf32>
    %94 = vector.shape_cast %93 : vector<5xf32> to vector<5x1xf32>
    %95 = tpu.reciprocal %94 {approx = true} : vector<5x1xf32> -> vector<5x1xf32>
    %96 = vector.broadcast %95 : vector<5x1xf32> to vector<5x5xf32>
    %97 = arith.mulf %92, %96 : vector<5x5xf32>
    %98 = vector.broadcast %84 : vector<1x64xf32> to vector<5x64xf32>
    %99 = arith.mulf %28, %98 : vector<5x64xf32>
    %cst_31 = arith.constant dense<0.000000e+00> : vector<5x64xf32>
    %100 = tpu.matmul %97, %99, %cst_31 {dimension_numbers = #tpu.dot_dimension_numbers<[1], [0], [0], [1], [0, 0, 1, 1], [], []>} : vector<5x5xf32>, vector<5x64xf32>, vector<5x64xf32> -> vector<5x64xf32>
    %101 = arith.addf %83, %100 : vector<5x64xf32>
    %102 = vector.extract_strided_slice %25 {offsets = [4, 0], sizes = [1, 64], strides = [1, 1]} : vector<8x64xf32> to vector<1x64xf32>
    %103 = vector.broadcast %102 : vector<1x64xf32> to vector<5x64xf32>
    %104 = arith.mulf %26, %103 : vector<5x64xf32>
    %cst_32 = arith.constant dense<0.000000e+00> : vector<5x5xf32>
    %105 = tpu.matmul %104, %27, %cst_32 {dimension_numbers = #tpu.dot_dimension_numbers<[1], [1], [0], [0], [0, 0, 1, 0], [], []>} : vector<5x64xf32>, vector<5x64xf32>, vector<5x5xf32> -> vector<5x5xf32>
    %cst_33 = arith.constant dense<0xFF800000> : vector<5xf32>
    %106 = vector.multi_reduction <maximumf>, %105, %cst_33 [1] : vector<5x5xf32> to vector<5xf32>
    %107 = vector.shape_cast %106 : vector<5xf32> to vector<5x1xf32>
    %108 = vector.broadcast %107 : vector<5x1xf32> to vector<5x5xf32>
    %109 = arith.subf %105, %108 : vector<5x5xf32>
    %110 = math.exp %109 : vector<5x5xf32>
    %cst_34 = arith.constant dense<0.000000e+00> : vector<5xf32>
    %111 = vector.multi_reduction <add>, %110, %cst_34 [1] : vector<5x5xf32> to vector<5xf32>
    %112 = vector.shape_cast %111 : vector<5xf32> to vector<5x1xf32>
    %113 = tpu.reciprocal %112 {approx = true} : vector<5x1xf32> -> vector<5x1xf32>
    %114 = vector.broadcast %113 : vector<5x1xf32> to vector<5x5xf32>
    %115 = arith.mulf %110, %114 : vector<5x5xf32>
    %116 = vector.broadcast %102 : vector<1x64xf32> to vector<5x64xf32>
    %117 = arith.mulf %28, %116 : vector<5x64xf32>
    %cst_35 = arith.constant dense<0.000000e+00> : vector<5x64xf32>
    %118 = tpu.matmul %115, %117, %cst_35 {dimension_numbers = #tpu.dot_dimension_numbers<[1], [0], [0], [1], [0, 0, 1, 1], [], []>} : vector<5x5xf32>, vector<5x64xf32>, vector<5x64xf32> -> vector<5x64xf32>
    %119 = arith.addf %101, %118 : vector<5x64xf32>
    %120 = vector.extract_strided_slice %25 {offsets = [5, 0], sizes = [1, 64], strides = [1, 1]} : vector<8x64xf32> to vector<1x64xf32>
    %121 = vector.broadcast %120 : vector<1x64xf32> to vector<5x64xf32>
    %122 = arith.mulf %26, %121 : vector<5x64xf32>
    %cst_36 = arith.constant dense<0.000000e+00> : vector<5x5xf32>
    %123 = tpu.matmul %122, %27, %cst_36 {dimension_numbers = #tpu.dot_dimension_numbers<[1], [1], [0], [0], [0, 0, 1, 0], [], []>} : vector<5x64xf32>, vector<5x64xf32>, vector<5x5xf32> -> vector<5x5xf32>
    %cst_37 = arith.constant dense<0xFF800000> : vector<5xf32>
    %124 = vector.multi_reduction <maximumf>, %123, %cst_37 [1] : vector<5x5xf32> to vector<5xf32>
    %125 = vector.shape_cast %124 : vector<5xf32> to vector<5x1xf32>
    %126 = vector.broadcast %125 : vector<5x1xf32> to vector<5x5xf32>
    %127 = arith.subf %123, %126 : vector<5x5xf32>
    %128 = math.exp %127 : vector<5x5xf32>
    %cst_38 = arith.constant dense<0.000000e+00> : vector<5xf32>
    %129 = vector.multi_reduction <add>, %128, %cst_38 [1] : vector<5x5xf32> to vector<5xf32>
    %130 = vector.shape_cast %129 : vector<5xf32> to vector<5x1xf32>
    %131 = tpu.reciprocal %130 {approx = true} : vector<5x1xf32> -> vector<5x1xf32>
    %132 = vector.broadcast %131 : vector<5x1xf32> to vector<5x5xf32>
    %133 = arith.mulf %128, %132 : vector<5x5xf32>
    %134 = vector.broadcast %120 : vector<1x64xf32> to vector<5x64xf32>
    %135 = arith.mulf %28, %134 : vector<5x64xf32>
    %cst_39 = arith.constant dense<0.000000e+00> : vector<5x64xf32>
    %136 = tpu.matmul %133, %135, %cst_39 {dimension_numbers = #tpu.dot_dimension_numbers<[1], [0], [0], [1], [0, 0, 1, 1], [], []>} : vector<5x5xf32>, vector<5x64xf32>, vector<5x64xf32> -> vector<5x64xf32>
    %137 = arith.addf %119, %136 : vector<5x64xf32>
    %138 = vector.extract_strided_slice %25 {offsets = [6, 0], sizes = [1, 64], strides = [1, 1]} : vector<8x64xf32> to vector<1x64xf32>
    %139 = vector.broadcast %138 : vector<1x64xf32> to vector<5x64xf32>
    %140 = arith.mulf %26, %139 : vector<5x64xf32>
    %cst_40 = arith.constant dense<0.000000e+00> : vector<5x5xf32>
    %141 = tpu.matmul %140, %27, %cst_40 {dimension_numbers = #tpu.dot_dimension_numbers<[1], [1], [0], [0], [0, 0, 1, 0], [], []>} : vector<5x64xf32>, vector<5x64xf32>, vector<5x5xf32> -> vector<5x5xf32>
    %cst_41 = arith.constant dense<0xFF800000> : vector<5xf32>
    %142 = vector.multi_reduction <maximumf>, %141, %cst_41 [1] : vector<5x5xf32> to vector<5xf32>
    %143 = vector.shape_cast %142 : vector<5xf32> to vector<5x1xf32>
    %144 = vector.broadcast %143 : vector<5x1xf32> to vector<5x5xf32>
    %145 = arith.subf %141, %144 : vector<5x5xf32>
    %146 = math.exp %145 : vector<5x5xf32>
    %cst_42 = arith.constant dense<0.000000e+00> : vector<5xf32>
    %147 = vector.multi_reduction <add>, %146, %cst_42 [1] : vector<5x5xf32> to vector<5xf32>
    %148 = vector.shape_cast %147 : vector<5xf32> to vector<5x1xf32>
    %149 = tpu.reciprocal %148 {approx = true} : vector<5x1xf32> -> vector<5x1xf32>
    %150 = vector.broadcast %149 : vector<5x1xf32> to vector<5x5xf32>
    %151 = arith.mulf %146, %150 : vector<5x5xf32>
    %152 = vector.broadcast %138 : vector<1x64xf32> to vector<5x64xf32>
    %153 = arith.mulf %28, %152 : vector<5x64xf32>
    %cst_43 = arith.constant dense<0.000000e+00> : vector<5x64xf32>
    %154 = tpu.matmul %151, %153, %cst_43 {dimension_numbers = #tpu.dot_dimension_numbers<[1], [0], [0], [1], [0, 0, 1, 1], [], []>} : vector<5x5xf32>, vector<5x64xf32>, vector<5x64xf32> -> vector<5x64xf32>
    %155 = arith.addf %137, %154 : vector<5x64xf32>
    %156 = vector.extract_strided_slice %25 {offsets = [7, 0], sizes = [1, 64], strides = [1, 1]} : vector<8x64xf32> to vector<1x64xf32>
    %157 = vector.broadcast %156 : vector<1x64xf32> to vector<5x64xf32>
    %158 = arith.mulf %26, %157 : vector<5x64xf32>
    %cst_44 = arith.constant dense<0.000000e+00> : vector<5x5xf32>
    %159 = tpu.matmul %158, %27, %cst_44 {dimension_numbers = #tpu.dot_dimension_numbers<[1], [1], [0], [0], [0, 0, 1, 0], [], []>} : vector<5x64xf32>, vector<5x64xf32>, vector<5x5xf32> -> vector<5x5xf32>
    %cst_45 = arith.constant dense<0xFF800000> : vector<5xf32>
    %160 = vector.multi_reduction <maximumf>, %159, %cst_45 [1] : vector<5x5xf32> to vector<5xf32>
    %161 = vector.shape_cast %160 : vector<5xf32> to vector<5x1xf32>
    %162 = vector.broadcast %161 : vector<5x1xf32> to vector<5x5xf32>
    %163 = arith.subf %159, %162 : vector<5x5xf32>
    %164 = math.exp %163 : vector<5x5xf32>
    %cst_46 = arith.constant dense<0.000000e+00> : vector<5xf32>
    %165 = vector.multi_reduction <add>, %164, %cst_46 [1] : vector<5x5xf32> to vector<5xf32>
    %166 = vector.shape_cast %165 : vector<5xf32> to vector<5x1xf32>
    %167 = tpu.reciprocal %166 {approx = true} : vector<5x1xf32> -> vector<5x1xf32>
    %168 = vector.broadcast %167 : vector<5x1xf32> to vector<5x5xf32>
    %169 = arith.mulf %164, %168 : vector<5x5xf32>
    %170 = vector.broadcast %156 : vector<1x64xf32> to vector<5x64xf32>
    %171 = arith.mulf %28, %170 : vector<5x64xf32>
    %cst_47 = arith.constant dense<0.000000e+00> : vector<5x64xf32>
    %172 = tpu.matmul %169, %171, %cst_47 {dimension_numbers = #tpu.dot_dimension_numbers<[1], [0], [0], [1], [0, 0, 1, 1], [], []>} : vector<5x5xf32>, vector<5x64xf32>, vector<5x64xf32> -> vector<5x64xf32>
    %173 = arith.addf %155, %172 : vector<5x64xf32>
    %174 = vector.extract_strided_slice %14 {offsets = [5, 0], sizes = [5, 64], strides = [1, 1]} : vector<10x64xf32> to vector<5x64xf32>
    %175 = vector.extract_strided_slice %19 {offsets = [5, 0], sizes = [5, 64], strides = [1, 1]} : vector<10x64xf32> to vector<5x64xf32>
    %176 = vector.extract_strided_slice %24 {offsets = [5, 0], sizes = [5, 64], strides = [1, 1]} : vector<10x64xf32> to vector<5x64xf32>
    %cst_48 = arith.constant 0.000000e+00 : f32
    %177 = vector.broadcast %cst_48 : f32 to vector<5x64xf32>
    %178 = vector.extract_strided_slice %25 {offsets = [0, 0], sizes = [1, 64], strides = [1, 1]} : vector<8x64xf32> to vector<1x64xf32>
    %179 = vector.broadcast %178 : vector<1x64xf32> to vector<5x64xf32>
    %180 = arith.mulf %174, %179 : vector<5x64xf32>
    %cst_49 = arith.constant dense<0.000000e+00> : vector<5x5xf32>
    %181 = tpu.matmul %180, %175, %cst_49 {dimension_numbers = #tpu.dot_dimension_numbers<[1], [1], [0], [0], [0, 0, 1, 0], [], []>} : vector<5x64xf32>, vector<5x64xf32>, vector<5x5xf32> -> vector<5x5xf32>
    %cst_50 = arith.constant dense<0xFF800000> : vector<5xf32>
    %182 = vector.multi_reduction <maximumf>, %181, %cst_50 [1] : vector<5x5xf32> to vector<5xf32>
    %183 = vector.shape_cast %182 : vector<5xf32> to vector<5x1xf32>
    %184 = vector.broadcast %183 : vector<5x1xf32> to vector<5x5xf32>
    %185 = arith.subf %181, %184 : vector<5x5xf32>
    %186 = math.exp %185 : vector<5x5xf32>
    %cst_51 = arith.constant dense<0.000000e+00> : vector<5xf32>
    %187 = vector.multi_reduction <add>, %186, %cst_51 [1] : vector<5x5xf32> to vector<5xf32>
    %188 = vector.shape_cast %187 : vector<5xf32> to vector<5x1xf32>
    %189 = tpu.reciprocal %188 {approx = true} : vector<5x1xf32> -> vector<5x1xf32>
    %190 = vector.broadcast %189 : vector<5x1xf32> to vector<5x5xf32>
    %191 = arith.mulf %186, %190 : vector<5x5xf32>
    %192 = vector.broadcast %178 : vector<1x64xf32> to vector<5x64xf32>
    %193 = arith.mulf %176, %192 : vector<5x64xf32>
    %cst_52 = arith.constant dense<0.000000e+00> : vector<5x64xf32>
    %194 = tpu.matmul %191, %193, %cst_52 {dimension_numbers = #tpu.dot_dimension_numbers<[1], [0], [0], [1], [0, 0, 1, 1], [], []>} : vector<5x5xf32>, vector<5x64xf32>, vector<5x64xf32> -> vector<5x64xf32>
    %195 = arith.addf %177, %194 : vector<5x64xf32>
    %196 = vector.extract_strided_slice %25 {offsets = [1, 0], sizes = [1, 64], strides = [1, 1]} : vector<8x64xf32> to vector<1x64xf32>
    %197 = vector.broadcast %196 : vector<1x64xf32> to vector<5x64xf32>
    %198 = arith.mulf %174, %197 : vector<5x64xf32>
    %cst_53 = arith.constant dense<0.000000e+00> : vector<5x5xf32>
    %199 = tpu.matmul %198, %175, %cst_53 {dimension_numbers = #tpu.dot_dimension_numbers<[1], [1], [0], [0], [0, 0, 1, 0], [], []>} : vector<5x64xf32>, vector<5x64xf32>, vector<5x5xf32> -> vector<5x5xf32>
    %cst_54 = arith.constant dense<0xFF800000> : vector<5xf32>
    %200 = vector.multi_reduction <maximumf>, %199, %cst_54 [1] : vector<5x5xf32> to vector<5xf32>
    %201 = vector.shape_cast %200 : vector<5xf32> to vector<5x1xf32>
    %202 = vector.broadcast %201 : vector<5x1xf32> to vector<5x5xf32>
    %203 = arith.subf %199, %202 : vector<5x5xf32>
    %204 = math.exp %203 : vector<5x5xf32>
    %cst_55 = arith.constant dense<0.000000e+00> : vector<5xf32>
    %205 = vector.multi_reduction <add>, %204, %cst_55 [1] : vector<5x5xf32> to vector<5xf32>
    %206 = vector.shape_cast %205 : vector<5xf32> to vector<5x1xf32>
    %207 = tpu.reciprocal %206 {approx = true} : vector<5x1xf32> -> vector<5x1xf32>
    %208 = vector.broadcast %207 : vector<5x1xf32> to vector<5x5xf32>
    %209 = arith.mulf %204, %208 : vector<5x5xf32>
    %210 = vector.broadcast %196 : vector<1x64xf32> to vector<5x64xf32>
    %211 = arith.mulf %176, %210 : vector<5x64xf32>
    %cst_56 = arith.constant dense<0.000000e+00> : vector<5x64xf32>
    %212 = tpu.matmul %209, %211, %cst_56 {dimension_numbers = #tpu.dot_dimension_numbers<[1], [0], [0], [1], [0, 0, 1, 1], [], []>} : vector<5x5xf32>, vector<5x64xf32>, vector<5x64xf32> -> vector<5x64xf32>
    %213 = arith.addf %195, %212 : vector<5x64xf32>
    %214 = vector.extract_strided_slice %25 {offsets = [2, 0], sizes = [1, 64], strides = [1, 1]} : vector<8x64xf32> to vector<1x64xf32>
    %215 = vector.broadcast %214 : vector<1x64xf32> to vector<5x64xf32>
    %216 = arith.mulf %174, %215 : vector<5x64xf32>
    %cst_57 = arith.constant dense<0.000000e+00> : vector<5x5xf32>
    %217 = tpu.matmul %216, %175, %cst_57 {dimension_numbers = #tpu.dot_dimension_numbers<[1], [1], [0], [0], [0, 0, 1, 0], [], []>} : vector<5x64xf32>, vector<5x64xf32>, vector<5x5xf32> -> vector<5x5xf32>
    %cst_58 = arith.constant dense<0xFF800000> : vector<5xf32>
    %218 = vector.multi_reduction <maximumf>, %217, %cst_58 [1] : vector<5x5xf32> to vector<5xf32>
    %219 = vector.shape_cast %218 : vector<5xf32> to vector<5x1xf32>
    %220 = vector.broadcast %219 : vector<5x1xf32> to vector<5x5xf32>
    %221 = arith.subf %217, %220 : vector<5x5xf32>
    %222 = math.exp %221 : vector<5x5xf32>
    %cst_59 = arith.constant dense<0.000000e+00> : vector<5xf32>
    %223 = vector.multi_reduction <add>, %222, %cst_59 [1] : vector<5x5xf32> to vector<5xf32>
    %224 = vector.shape_cast %223 : vector<5xf32> to vector<5x1xf32>
    %225 = tpu.reciprocal %224 {approx = true} : vector<5x1xf32> -> vector<5x1xf32>
    %226 = vector.broadcast %225 : vector<5x1xf32> to vector<5x5xf32>
    %227 = arith.mulf %222, %226 : vector<5x5xf32>
    %228 = vector.broadcast %214 : vector<1x64xf32> to vector<5x64xf32>
    %229 = arith.mulf %176, %228 : vector<5x64xf32>
    %cst_60 = arith.constant dense<0.000000e+00> : vector<5x64xf32>
    %230 = tpu.matmul %227, %229, %cst_60 {dimension_numbers = #tpu.dot_dimension_numbers<[1], [0], [0], [1], [0, 0, 1, 1], [], []>} : vector<5x5xf32>, vector<5x64xf32>, vector<5x64xf32> -> vector<5x64xf32>
    %231 = arith.addf %213, %230 : vector<5x64xf32>
    %232 = vector.extract_strided_slice %25 {offsets = [3, 0], sizes = [1, 64], strides = [1, 1]} : vector<8x64xf32> to vector<1x64xf32>
    %233 = vector.broadcast %232 : vector<1x64xf32> to vector<5x64xf32>
    %234 = arith.mulf %174, %233 : vector<5x64xf32>
    %cst_61 = arith.constant dense<0.000000e+00> : vector<5x5xf32>
    %235 = tpu.matmul %234, %175, %cst_61 {dimension_numbers = #tpu.dot_dimension_numbers<[1], [1], [0], [0], [0, 0, 1, 0], [], []>} : vector<5x64xf32>, vector<5x64xf32>, vector<5x5xf32> -> vector<5x5xf32>
    %cst_62 = arith.constant dense<0xFF800000> : vector<5xf32>
    %236 = vector.multi_reduction <maximumf>, %235, %cst_62 [1] : vector<5x5xf32> to vector<5xf32>
    %237 = vector.shape_cast %236 : vector<5xf32> to vector<5x1xf32>
    %238 = vector.broadcast %237 : vector<5x1xf32> to vector<5x5xf32>
    %239 = arith.subf %235, %238 : vector<5x5xf32>
    %240 = math.exp %239 : vector<5x5xf32>
    %cst_63 = arith.constant dense<0.000000e+00> : vector<5xf32>
    %241 = vector.multi_reduction <add>, %240, %cst_63 [1] : vector<5x5xf32> to vector<5xf32>
    %242 = vector.shape_cast %241 : vector<5xf32> to vector<5x1xf32>
    %243 = tpu.reciprocal %242 {approx = true} : vector<5x1xf32> -> vector<5x1xf32>
    %244 = vector.broadcast %243 : vector<5x1xf32> to vector<5x5xf32>
    %245 = arith.mulf %240, %244 : vector<5x5xf32>
    %246 = vector.broadcast %232 : vector<1x64xf32> to vector<5x64xf32>
    %247 = arith.mulf %176, %246 : vector<5x64xf32>
    %cst_64 = arith.constant dense<0.000000e+00> : vector<5x64xf32>
    %248 = tpu.matmul %245, %247, %cst_64 {dimension_numbers = #tpu.dot_dimension_numbers<[1], [0], [0], [1], [0, 0, 1, 1], [], []>} : vector<5x5xf32>, vector<5x64xf32>, vector<5x64xf32> -> vector<5x64xf32>
    %249 = arith.addf %231, %248 : vector<5x64xf32>
    %250 = vector.extract_strided_slice %25 {offsets = [4, 0], sizes = [1, 64], strides = [1, 1]} : vector<8x64xf32> to vector<1x64xf32>
    %251 = vector.broadcast %250 : vector<1x64xf32> to vector<5x64xf32>
    %252 = arith.mulf %174, %251 : vector<5x64xf32>
    %cst_65 = arith.constant dense<0.000000e+00> : vector<5x5xf32>
    %253 = tpu.matmul %252, %175, %cst_65 {dimension_numbers = #tpu.dot_dimension_numbers<[1], [1], [0], [0], [0, 0, 1, 0], [], []>} : vector<5x64xf32>, vector<5x64xf32>, vector<5x5xf32> -> vector<5x5xf32>
    %cst_66 = arith.constant dense<0xFF800000> : vector<5xf32>
    %254 = vector.multi_reduction <maximumf>, %253, %cst_66 [1] : vector<5x5xf32> to vector<5xf32>
    %255 = vector.shape_cast %254 : vector<5xf32> to vector<5x1xf32>
    %256 = vector.broadcast %255 : vector<5x1xf32> to vector<5x5xf32>
    %257 = arith.subf %253, %256 : vector<5x5xf32>
    %258 = math.exp %257 : vector<5x5xf32>
    %cst_67 = arith.constant dense<0.000000e+00> : vector<5xf32>
    %259 = vector.multi_reduction <add>, %258, %cst_67 [1] : vector<5x5xf32> to vector<5xf32>
    %260 = vector.shape_cast %259 : vector<5xf32> to vector<5x1xf32>
    %261 = tpu.reciprocal %260 {approx = true} : vector<5x1xf32> -> vector<5x1xf32>
    %262 = vector.broadcast %261 : vector<5x1xf32> to vector<5x5xf32>
    %263 = arith.mulf %258, %262 : vector<5x5xf32>
    %264 = vector.broadcast %250 : vector<1x64xf32> to vector<5x64xf32>
    %265 = arith.mulf %176, %264 : vector<5x64xf32>
    %cst_68 = arith.constant dense<0.000000e+00> : vector<5x64xf32>
    %266 = tpu.matmul %263, %265, %cst_68 {dimension_numbers = #tpu.dot_dimension_numbers<[1], [0], [0], [1], [0, 0, 1, 1], [], []>} : vector<5x5xf32>, vector<5x64xf32>, vector<5x64xf32> -> vector<5x64xf32>
    %267 = arith.addf %249, %266 : vector<5x64xf32>
    %268 = vector.extract_strided_slice %25 {offsets = [5, 0], sizes = [1, 64], strides = [1, 1]} : vector<8x64xf32> to vector<1x64xf32>
    %269 = vector.broadcast %268 : vector<1x64xf32> to vector<5x64xf32>
    %270 = arith.mulf %174, %269 : vector<5x64xf32>
    %cst_69 = arith.constant dense<0.000000e+00> : vector<5x5xf32>
    %271 = tpu.matmul %270, %175, %cst_69 {dimension_numbers = #tpu.dot_dimension_numbers<[1], [1], [0], [0], [0, 0, 1, 0], [], []>} : vector<5x64xf32>, vector<5x64xf32>, vector<5x5xf32> -> vector<5x5xf32>
    %cst_70 = arith.constant dense<0xFF800000> : vector<5xf32>
    %272 = vector.multi_reduction <maximumf>, %271, %cst_70 [1] : vector<5x5xf32> to vector<5xf32>
    %273 = vector.shape_cast %272 : vector<5xf32> to vector<5x1xf32>
    %274 = vector.broadcast %273 : vector<5x1xf32> to vector<5x5xf32>
    %275 = arith.subf %271, %274 : vector<5x5xf32>
    %276 = math.exp %275 : vector<5x5xf32>
    %cst_71 = arith.constant dense<0.000000e+00> : vector<5xf32>
    %277 = vector.multi_reduction <add>, %276, %cst_71 [1] : vector<5x5xf32> to vector<5xf32>
    %278 = vector.shape_cast %277 : vector<5xf32> to vector<5x1xf32>
    %279 = tpu.reciprocal %278 {approx = true} : vector<5x1xf32> -> vector<5x1xf32>
    %280 = vector.broadcast %279 : vector<5x1xf32> to vector<5x5xf32>
    %281 = arith.mulf %276, %280 : vector<5x5xf32>
    %282 = vector.broadcast %268 : vector<1x64xf32> to vector<5x64xf32>
    %283 = arith.mulf %176, %282 : vector<5x64xf32>
    %cst_72 = arith.constant dense<0.000000e+00> : vector<5x64xf32>
    %284 = tpu.matmul %281, %283, %cst_72 {dimension_numbers = #tpu.dot_dimension_numbers<[1], [0], [0], [1], [0, 0, 1, 1], [], []>} : vector<5x5xf32>, vector<5x64xf32>, vector<5x64xf32> -> vector<5x64xf32>
    %285 = arith.addf %267, %284 : vector<5x64xf32>
    %286 = vector.extract_strided_slice %25 {offsets = [6, 0], sizes = [1, 64], strides = [1, 1]} : vector<8x64xf32> to vector<1x64xf32>
    %287 = vector.broadcast %286 : vector<1x64xf32> to vector<5x64xf32>
    %288 = arith.mulf %174, %287 : vector<5x64xf32>
    %cst_73 = arith.constant dense<0.000000e+00> : vector<5x5xf32>
    %289 = tpu.matmul %288, %175, %cst_73 {dimension_numbers = #tpu.dot_dimension_numbers<[1], [1], [0], [0], [0, 0, 1, 0], [], []>} : vector<5x64xf32>, vector<5x64xf32>, vector<5x5xf32> -> vector<5x5xf32>
    %cst_74 = arith.constant dense<0xFF800000> : vector<5xf32>
    %290 = vector.multi_reduction <maximumf>, %289, %cst_74 [1] : vector<5x5xf32> to vector<5xf32>
    %291 = vector.shape_cast %290 : vector<5xf32> to vector<5x1xf32>
    %292 = vector.broadcast %291 : vector<5x1xf32> to vector<5x5xf32>
    %293 = arith.subf %289, %292 : vector<5x5xf32>
    %294 = math.exp %293 : vector<5x5xf32>
    %cst_75 = arith.constant dense<0.000000e+00> : vector<5xf32>
    %295 = vector.multi_reduction <add>, %294, %cst_75 [1] : vector<5x5xf32> to vector<5xf32>
    %296 = vector.shape_cast %295 : vector<5xf32> to vector<5x1xf32>
    %297 = tpu.reciprocal %296 {approx = true} : vector<5x1xf32> -> vector<5x1xf32>
    %298 = vector.broadcast %297 : vector<5x1xf32> to vector<5x5xf32>
    %299 = arith.mulf %294, %298 : vector<5x5xf32>
    %300 = vector.broadcast %286 : vector<1x64xf32> to vector<5x64xf32>
    %301 = arith.mulf %176, %300 : vector<5x64xf32>
    %cst_76 = arith.constant dense<0.000000e+00> : vector<5x64xf32>
    %302 = tpu.matmul %299, %301, %cst_76 {dimension_numbers = #tpu.dot_dimension_numbers<[1], [0], [0], [1], [0, 0, 1, 1], [], []>} : vector<5x5xf32>, vector<5x64xf32>, vector<5x64xf32> -> vector<5x64xf32>
    %303 = arith.addf %285, %302 : vector<5x64xf32>
    %304 = vector.extract_strided_slice %25 {offsets = [7, 0], sizes = [1, 64], strides = [1, 1]} : vector<8x64xf32> to vector<1x64xf32>
    %305 = vector.broadcast %304 : vector<1x64xf32> to vector<5x64xf32>
    %306 = arith.mulf %174, %305 : vector<5x64xf32>
    %cst_77 = arith.constant dense<0.000000e+00> : vector<5x5xf32>
    %307 = tpu.matmul %306, %175, %cst_77 {dimension_numbers = #tpu.dot_dimension_numbers<[1], [1], [0], [0], [0, 0, 1, 0], [], []>} : vector<5x64xf32>, vector<5x64xf32>, vector<5x5xf32> -> vector<5x5xf32>
    %cst_78 = arith.constant dense<0xFF800000> : vector<5xf32>
    %308 = vector.multi_reduction <maximumf>, %307, %cst_78 [1] : vector<5x5xf32> to vector<5xf32>
    %309 = vector.shape_cast %308 : vector<5xf32> to vector<5x1xf32>
    %310 = vector.broadcast %309 : vector<5x1xf32> to vector<5x5xf32>
    %311 = arith.subf %307, %310 : vector<5x5xf32>
    %312 = math.exp %311 : vector<5x5xf32>
    %cst_79 = arith.constant dense<0.000000e+00> : vector<5xf32>
    %313 = vector.multi_reduction <add>, %312, %cst_79 [1] : vector<5x5xf32> to vector<5xf32>
    %314 = vector.shape_cast %313 : vector<5xf32> to vector<5x1xf32>
    %315 = tpu.reciprocal %314 {approx = true} : vector<5x1xf32> -> vector<5x1xf32>
    %316 = vector.broadcast %315 : vector<5x1xf32> to vector<5x5xf32>
    %317 = arith.mulf %312, %316 : vector<5x5xf32>
    %318 = vector.broadcast %304 : vector<1x64xf32> to vector<5x64xf32>
    %319 = arith.mulf %176, %318 : vector<5x64xf32>
    %cst_80 = arith.constant dense<0.000000e+00> : vector<5x64xf32>
    %320 = tpu.matmul %317, %319, %cst_80 {dimension_numbers = #tpu.dot_dimension_numbers<[1], [0], [0], [1], [0, 0, 1, 1], [], []>} : vector<5x5xf32>, vector<5x64xf32>, vector<5x64xf32> -> vector<5x64xf32>
    %321 = arith.addf %303, %320 : vector<5x64xf32>
    %322 = tpu.concatenate %173, %321 in 0 : vector<5x64xf32>, vector<5x64xf32> -> vector<10x64xf32>
    %c1000 = arith.constant 1000 : index
    %c0_81 = arith.constant 0 : index
    %323 = vector.load %arg2[%c1000, %c0_81] : memref<1800x64xf32, #tpu.memory_space<vmem>>, vector<64x64xf32>
    %cst_82 = arith.constant dense<0.000000e+00> : vector<10x64xf32>
    %324 = tpu.matmul %322, %323, %cst_82 {dimension_numbers = #tpu.dot_dimension_numbers<[1], [0], [0], [1], [0, 0, 1, 1], [], []>} : vector<10x64xf32>, vector<64x64xf32>, vector<10x64xf32> -> vector<10x64xf32>
    %c1064 = arith.constant 1064 : index
    %c0_83 = arith.constant 0 : index
    %325 = vector.load %arg2[%c1064, %c0_83] : memref<1800x64xf32, #tpu.memory_space<vmem>>, vector<1x64xf32>
    %326 = vector.broadcast %325 : vector<1x64xf32> to vector<10x64xf32>
    %327 = arith.addf %324, %326 : vector<10x64xf32>
    %c1080 = arith.constant 1080 : index
    %c0_84 = arith.constant 0 : index
    %328 = vector.load %arg2[%c1080, %c0_84] : memref<1800x64xf32, #tpu.memory_space<vmem>>, vector<64x64xf32>
    %cst_85 = arith.constant dense<0.000000e+00> : vector<10x64xf32>
    %329 = tpu.matmul %327, %328, %cst_85 {dimension_numbers = #tpu.dot_dimension_numbers<[1], [0], [0], [1], [0, 0, 1, 1], [], []>} : vector<10x64xf32>, vector<64x64xf32>, vector<10x64xf32> -> vector<10x64xf32>
    %c1144 = arith.constant 1144 : index
    %c0_86 = arith.constant 0 : index
    %330 = vector.load %arg2[%c1144, %c0_86] : memref<1800x64xf32, #tpu.memory_space<vmem>>, vector<1x64xf32>
    %331 = vector.broadcast %330 : vector<1x64xf32> to vector<10x64xf32>
    %332 = arith.addf %329, %331 : vector<10x64xf32>
    %cst_87 = arith.constant 0.000000e+00 : f32
    %333 = vector.broadcast %cst_87 : f32 to vector<10x64xf32>
    %334 = arith.maximumf %332, %333 : vector<10x64xf32>
    %c1152 = arith.constant 1152 : index
    %c0_88 = arith.constant 0 : index
    %335 = vector.load %arg2[%c1152, %c0_88] : memref<1800x64xf32, #tpu.memory_space<vmem>>, vector<64x64xf32>
    %cst_89 = arith.constant dense<0.000000e+00> : vector<10x64xf32>
    %336 = tpu.matmul %334, %335, %cst_89 {dimension_numbers = #tpu.dot_dimension_numbers<[1], [0], [0], [1], [0, 0, 1, 1], [], []>} : vector<10x64xf32>, vector<64x64xf32>, vector<10x64xf32> -> vector<10x64xf32>
    %c1216 = arith.constant 1216 : index
    %c0_90 = arith.constant 0 : index
    %337 = vector.load %arg2[%c1216, %c0_90] : memref<1800x64xf32, #tpu.memory_space<vmem>>, vector<1x64xf32>
    %338 = vector.broadcast %337 : vector<1x64xf32> to vector<10x64xf32>
    %339 = arith.addf %336, %338 : vector<10x64xf32>
    %340 = arith.mulf %339, %339 : vector<10x64xf32>
    %cst_91 = arith.constant dense<0.000000e+00> : vector<10xf32>
    %341 = vector.multi_reduction <add>, %340, %cst_91 [1] : vector<10x64xf32> to vector<10xf32>
    %342 = vector.shape_cast %341 : vector<10xf32> to vector<10x1xf32>
    %cst_92 = arith.constant 1.000000e-24 : f32
    %343 = vector.broadcast %cst_92 : f32 to vector<10x1xf32>
    %344 = arith.maximumf %342, %343 : vector<10x1xf32>
    %345 = math.rsqrt %344 : vector<10x1xf32>
    %346 = vector.broadcast %345 : vector<10x1xf32> to vector<10x64xf32>
    %347 = arith.mulf %339, %346 : vector<10x64xf32>
    %c0_93 = arith.constant 0 : index
    %c0_94 = arith.constant 0 : index
    %348 = vector.load %arg1[%c0_93, %c0_94] : memref<16x64xf32, #tpu.memory_space<vmem>>, vector<16x64xf32>
    %c1224 = arith.constant 1224 : index
    %c0_95 = arith.constant 0 : index
    %349 = vector.load %arg2[%c1224, %c0_95] : memref<1800x64xf32, #tpu.memory_space<vmem>>, vector<64x64xf32>
    %cst_96 = arith.constant dense<0.000000e+00> : vector<16x64xf32>
    %350 = tpu.matmul %348, %349, %cst_96 {dimension_numbers = #tpu.dot_dimension_numbers<[1], [0], [0], [1], [0, 0, 1, 1], [], []>} : vector<16x64xf32>, vector<64x64xf32>, vector<16x64xf32> -> vector<16x64xf32>
    %c1288 = arith.constant 1288 : index
    %c0_97 = arith.constant 0 : index
    %351 = vector.load %arg2[%c1288, %c0_97] : memref<1800x64xf32, #tpu.memory_space<vmem>>, vector<1x64xf32>
    %352 = vector.broadcast %351 : vector<1x64xf32> to vector<16x64xf32>
    %353 = arith.addf %350, %352 : vector<16x64xf32>
    %cst_98 = arith.constant 0.000000e+00 : f32
    %354 = vector.broadcast %cst_98 : f32 to vector<16x64xf32>
    %355 = arith.maximumf %353, %354 : vector<16x64xf32>
    %c1296 = arith.constant 1296 : index
    %c0_99 = arith.constant 0 : index
    %356 = vector.load %arg2[%c1296, %c0_99] : memref<1800x64xf32, #tpu.memory_space<vmem>>, vector<64x64xf32>
    %cst_100 = arith.constant dense<0.000000e+00> : vector<16x64xf32>
    %357 = tpu.matmul %355, %356, %cst_100 {dimension_numbers = #tpu.dot_dimension_numbers<[1], [0], [0], [1], [0, 0, 1, 1], [], []>} : vector<16x64xf32>, vector<64x64xf32>, vector<16x64xf32> -> vector<16x64xf32>
    %c1360 = arith.constant 1360 : index
    %c0_101 = arith.constant 0 : index
    %358 = vector.load %arg2[%c1360, %c0_101] : memref<1800x64xf32, #tpu.memory_space<vmem>>, vector<1x64xf32>
    %359 = vector.broadcast %358 : vector<1x64xf32> to vector<16x64xf32>
    %360 = arith.addf %357, %359 : vector<16x64xf32>
    %361 = arith.mulf %360, %360 : vector<16x64xf32>
    %cst_102 = arith.constant dense<0.000000e+00> : vector<16xf32>
    %362 = vector.multi_reduction <add>, %361, %cst_102 [1] : vector<16x64xf32> to vector<16xf32>
    %363 = vector.shape_cast %362 : vector<16xf32> to vector<16x1xf32>
    %cst_103 = arith.constant 1.000000e-24 : f32
    %364 = vector.broadcast %cst_103 : f32 to vector<16x1xf32>
    %365 = arith.maximumf %363, %364 : vector<16x1xf32>
    %366 = math.rsqrt %365 : vector<16x1xf32>
    %367 = vector.broadcast %366 : vector<16x1xf32> to vector<16x64xf32>
    %368 = arith.mulf %360, %367 : vector<16x64xf32>
    %369 = vector.extract_strided_slice %347 {offsets = [0, 0], sizes = [5, 64], strides = [1, 1]} : vector<10x64xf32> to vector<5x64xf32>
    %370 = vector.extract_strided_slice %368 {offsets = [0, 0], sizes = [8, 64], strides = [1, 1]} : vector<16x64xf32> to vector<8x64xf32>
    %371 = vector.extract_strided_slice %347 {offsets = [5, 0], sizes = [5, 64], strides = [1, 1]} : vector<10x64xf32> to vector<5x64xf32>
    %372 = vector.extract_strided_slice %368 {offsets = [8, 0], sizes = [8, 64], strides = [1, 1]} : vector<16x64xf32> to vector<8x64xf32>
    %373 = tpu.concatenate %369, %370, %371, %372 in 0 : vector<5x64xf32>, vector<8x64xf32>, vector<5x64xf32>, vector<8x64xf32> -> vector<26x64xf32>
    %c1368 = arith.constant 1368 : index
    %c0_104 = arith.constant 0 : index
    %374 = vector.load %arg2[%c1368, %c0_104] : memref<1800x64xf32, #tpu.memory_space<vmem>>, vector<64x64xf32>
    %cst_105 = arith.constant dense<0.000000e+00> : vector<26x64xf32>
    %375 = tpu.matmul %373, %374, %cst_105 {dimension_numbers = #tpu.dot_dimension_numbers<[1], [0], [0], [1], [0, 0, 1, 1], [], []>} : vector<26x64xf32>, vector<64x64xf32>, vector<26x64xf32> -> vector<26x64xf32>
    %c1560 = arith.constant 1560 : index
    %c0_106 = arith.constant 0 : index
    %376 = vector.load %arg2[%c1560, %c0_106] : memref<1800x64xf32, #tpu.memory_space<vmem>>, vector<1x64xf32>
    %377 = vector.broadcast %376 : vector<1x64xf32> to vector<26x64xf32>
    %378 = arith.addf %375, %377 : vector<26x64xf32>
    %c1432 = arith.constant 1432 : index
    %c0_107 = arith.constant 0 : index
    %379 = vector.load %arg2[%c1432, %c0_107] : memref<1800x64xf32, #tpu.memory_space<vmem>>, vector<64x64xf32>
    %cst_108 = arith.constant dense<0.000000e+00> : vector<26x64xf32>
    %380 = tpu.matmul %373, %379, %cst_108 {dimension_numbers = #tpu.dot_dimension_numbers<[1], [0], [0], [1], [0, 0, 1, 1], [], []>} : vector<26x64xf32>, vector<64x64xf32>, vector<26x64xf32> -> vector<26x64xf32>
    %c1568 = arith.constant 1568 : index
    %c0_109 = arith.constant 0 : index
    %381 = vector.load %arg2[%c1568, %c0_109] : memref<1800x64xf32, #tpu.memory_space<vmem>>, vector<1x64xf32>
    %382 = vector.broadcast %381 : vector<1x64xf32> to vector<26x64xf32>
    %383 = arith.addf %380, %382 : vector<26x64xf32>
    %c1496 = arith.constant 1496 : index
    %c0_110 = arith.constant 0 : index
    %384 = vector.load %arg2[%c1496, %c0_110] : memref<1800x64xf32, #tpu.memory_space<vmem>>, vector<64x64xf32>
    %cst_111 = arith.constant dense<0.000000e+00> : vector<26x64xf32>
    %385 = tpu.matmul %373, %384, %cst_111 {dimension_numbers = #tpu.dot_dimension_numbers<[1], [0], [0], [1], [0, 0, 1, 1], [], []>} : vector<26x64xf32>, vector<64x64xf32>, vector<26x64xf32> -> vector<26x64xf32>
    %c1576 = arith.constant 1576 : index
    %c0_112 = arith.constant 0 : index
    %386 = vector.load %arg2[%c1576, %c0_112] : memref<1800x64xf32, #tpu.memory_space<vmem>>, vector<1x64xf32>
    %387 = vector.broadcast %386 : vector<1x64xf32> to vector<26x64xf32>
    %388 = arith.addf %385, %387 : vector<26x64xf32>
    %c1656 = arith.constant 1656 : index
    %c0_113 = arith.constant 0 : index
    %389 = vector.load %arg2[%c1656, %c0_113] : memref<1800x64xf32, #tpu.memory_space<vmem>>, vector<64x64xf32>
    %c1720 = arith.constant 1720 : index
    %c0_114 = arith.constant 0 : index
    %390 = vector.load %arg2[%c1720, %c0_114] : memref<1800x64xf32, #tpu.memory_space<vmem>>, vector<64x64xf32>
    %391 = vector.extract_strided_slice %383 {offsets = [0, 0], sizes = [13, 64], strides = [1, 1]} : vector<26x64xf32> to vector<13x64xf32>
    %392 = vector.extract_strided_slice %383 {offsets = [13, 0], sizes = [13, 64], strides = [1, 1]} : vector<26x64xf32> to vector<13x64xf32>
    %393 = vector.extract_strided_slice %388 {offsets = [0, 0], sizes = [13, 64], strides = [1, 1]} : vector<26x64xf32> to vector<13x64xf32>
    %394 = vector.extract_strided_slice %388 {offsets = [13, 0], sizes = [13, 64], strides = [1, 1]} : vector<26x64xf32> to vector<13x64xf32>
    %395 = arith.subf %393, %394 : vector<13x64xf32>
    %c1784 = arith.constant 1784 : index
    %c0_115 = arith.constant 0 : index
    %396 = vector.load %arg2[%c1784, %c0_115] : memref<1800x64xf32, #tpu.memory_space<vmem>>, vector<1x64xf32>
    %397 = vector.extract_strided_slice %378 {offsets = [0, 0], sizes = [13, 64], strides = [1, 1]} : vector<26x64xf32> to vector<13x64xf32>
    %398 = arith.mulf %397, %391 : vector<13x64xf32>
    %cst_116 = arith.constant dense<0.000000e+00> : vector<13x64xf32>
    %399 = tpu.matmul %398, %389, %cst_116 {dimension_numbers = #tpu.dot_dimension_numbers<[1], [0], [0], [1], [0, 0, 1, 1], [], []>} : vector<13x64xf32>, vector<64x64xf32>, vector<13x64xf32> -> vector<13x64xf32>
    %400 = arith.mulf %397, %392 : vector<13x64xf32>
    %cst_117 = arith.constant dense<0.000000e+00> : vector<13x64xf32>
    %401 = tpu.matmul %400, %389, %cst_117 {dimension_numbers = #tpu.dot_dimension_numbers<[1], [0], [0], [1], [0, 0, 1, 1], [], []>} : vector<13x64xf32>, vector<64x64xf32>, vector<13x64xf32> -> vector<13x64xf32>
    %402 = arith.maximumf %399, %401 : vector<13x64xf32>
    %403 = arith.subf %399, %402 : vector<13x64xf32>
    %404 = math.exp %403 : vector<13x64xf32>
    %405 = arith.subf %401, %402 : vector<13x64xf32>
    %406 = math.exp %405 : vector<13x64xf32>
    %407 = arith.addf %404, %406 : vector<13x64xf32>
    %408 = tpu.reciprocal %407 {approx = true} : vector<13x64xf32> -> vector<13x64xf32>
    %409 = arith.mulf %404, %408 : vector<13x64xf32>
    %cst_118 = arith.constant dense<0.000000e+00> : vector<13x64xf32>
    %410 = tpu.matmul %409, %390, %cst_118 {dimension_numbers = #tpu.dot_dimension_numbers<[1], [0], [0], [1], [0, 0, 1, 1], [], []>} : vector<13x64xf32>, vector<64x64xf32>, vector<13x64xf32> -> vector<13x64xf32>
    %411 = arith.mulf %410, %395 : vector<13x64xf32>
    %412 = arith.addf %394, %411 : vector<13x64xf32>
    %c1584 = arith.constant 1584 : index
    %c0_119 = arith.constant 0 : index
    %413 = vector.load %arg2[%c1584, %c0_119] : memref<1800x64xf32, #tpu.memory_space<vmem>>, vector<64x64xf32>
    %cst_120 = arith.constant dense<0.000000e+00> : vector<13x64xf32>
    %414 = tpu.matmul %412, %413, %cst_120 {dimension_numbers = #tpu.dot_dimension_numbers<[1], [0], [0], [1], [0, 0, 1, 1], [], []>} : vector<13x64xf32>, vector<64x64xf32>, vector<13x64xf32> -> vector<13x64xf32>
    %c1648 = arith.constant 1648 : index
    %c0_121 = arith.constant 0 : index
    %415 = vector.load %arg2[%c1648, %c0_121] : memref<1800x64xf32, #tpu.memory_space<vmem>>, vector<1x64xf32>
    %416 = vector.broadcast %415 : vector<1x64xf32> to vector<13x64xf32>
    %417 = arith.addf %414, %416 : vector<13x64xf32>
    %cst_122 = arith.constant dense<0.000000e+00> : vector<1x13xf32>
    %418 = tpu.matmul %396, %417, %cst_122 {dimension_numbers = #tpu.dot_dimension_numbers<[1], [1], [0], [0], [0, 0, 1, 0], [], []>} : vector<1x64xf32>, vector<13x64xf32>, vector<1x13xf32> -> vector<1x13xf32>
    %419 = vector.extract_strided_slice %378 {offsets = [13, 0], sizes = [13, 64], strides = [1, 1]} : vector<26x64xf32> to vector<13x64xf32>
    %420 = arith.mulf %419, %391 : vector<13x64xf32>
    %cst_123 = arith.constant dense<0.000000e+00> : vector<13x64xf32>
    %421 = tpu.matmul %420, %389, %cst_123 {dimension_numbers = #tpu.dot_dimension_numbers<[1], [0], [0], [1], [0, 0, 1, 1], [], []>} : vector<13x64xf32>, vector<64x64xf32>, vector<13x64xf32> -> vector<13x64xf32>
    %422 = arith.mulf %419, %392 : vector<13x64xf32>
    %cst_124 = arith.constant dense<0.000000e+00> : vector<13x64xf32>
    %423 = tpu.matmul %422, %389, %cst_124 {dimension_numbers = #tpu.dot_dimension_numbers<[1], [0], [0], [1], [0, 0, 1, 1], [], []>} : vector<13x64xf32>, vector<64x64xf32>, vector<13x64xf32> -> vector<13x64xf32>
    %424 = arith.maximumf %421, %423 : vector<13x64xf32>
    %425 = arith.subf %421, %424 : vector<13x64xf32>
    %426 = math.exp %425 : vector<13x64xf32>
    %427 = arith.subf %423, %424 : vector<13x64xf32>
    %428 = math.exp %427 : vector<13x64xf32>
    %429 = arith.addf %426, %428 : vector<13x64xf32>
    %430 = tpu.reciprocal %429 {approx = true} : vector<13x64xf32> -> vector<13x64xf32>
    %431 = arith.mulf %426, %430 : vector<13x64xf32>
    %cst_125 = arith.constant dense<0.000000e+00> : vector<13x64xf32>
    %432 = tpu.matmul %431, %390, %cst_125 {dimension_numbers = #tpu.dot_dimension_numbers<[1], [0], [0], [1], [0, 0, 1, 1], [], []>} : vector<13x64xf32>, vector<64x64xf32>, vector<13x64xf32> -> vector<13x64xf32>
    %433 = arith.mulf %432, %395 : vector<13x64xf32>
    %434 = arith.addf %394, %433 : vector<13x64xf32>
    %c1584_126 = arith.constant 1584 : index
    %c0_127 = arith.constant 0 : index
    %435 = vector.load %arg2[%c1584_126, %c0_127] : memref<1800x64xf32, #tpu.memory_space<vmem>>, vector<64x64xf32>
    %cst_128 = arith.constant dense<0.000000e+00> : vector<13x64xf32>
    %436 = tpu.matmul %434, %435, %cst_128 {dimension_numbers = #tpu.dot_dimension_numbers<[1], [0], [0], [1], [0, 0, 1, 1], [], []>} : vector<13x64xf32>, vector<64x64xf32>, vector<13x64xf32> -> vector<13x64xf32>
    %c1648_129 = arith.constant 1648 : index
    %c0_130 = arith.constant 0 : index
    %437 = vector.load %arg2[%c1648_129, %c0_130] : memref<1800x64xf32, #tpu.memory_space<vmem>>, vector<1x64xf32>
    %438 = vector.broadcast %437 : vector<1x64xf32> to vector<13x64xf32>
    %439 = arith.addf %436, %438 : vector<13x64xf32>
    %cst_131 = arith.constant dense<0.000000e+00> : vector<1x13xf32>
    %440 = tpu.matmul %396, %439, %cst_131 {dimension_numbers = #tpu.dot_dimension_numbers<[1], [1], [0], [0], [0, 0, 1, 0], [], []>} : vector<1x64xf32>, vector<13x64xf32>, vector<1x13xf32> -> vector<1x13xf32>
    %441 = tpu.concatenate %418, %440 in 0 : vector<1x13xf32>, vector<1x13xf32> -> vector<2x13xf32>
    %c1792 = arith.constant 1792 : index
    %c0_132 = arith.constant 0 : index
    %442 = vector.load %arg2[%c1792, %c0_132] : memref<1800x64xf32, #tpu.memory_space<vmem>>, vector<1x64xf32>
    %443 = vector.extract_strided_slice %442 {offsets = [0, 0], sizes = [1, 1], strides = [1, 1]} : vector<1x64xf32> to vector<1x1xf32>
    %444 = vector.broadcast %443 : vector<1x1xf32> to vector<2x13xf32>
    %445 = arith.addf %441, %444 : vector<2x13xf32>
    %c0_133 = arith.constant 0 : index
    %c0_134 = arith.constant 0 : index
    %446 = vector.load %arg3[%c0_133, %c0_134] : memref<2x13xf32, #tpu.memory_space<vmem>>, vector<2x13xf32>
    tpu.vector_store %arg3[%c0_133, %c0_134], %445 {strides = array<i32>} : memref<2x13xf32, #tpu.memory_space<vmem>>, vector<2x13xf32>,
    return
  }
}

</mosaic_0001>

<bundles_post_ra>
// kernel: forward.1
= control target key start
LH: loop header
LB: loop body
LE: loop exit
PB: predicated region body
PF: predicated region fallthrough
CT: control target
= control target key end

     0   :  { %s3858_s0 = inlined_call_operand.vmem [shape: f32[8,768], index: 0, kind: input, shape index: {}]   ;;  %s3859_s1 = inlined_call_operand.vmem [shape: f32[16,64], index: 1, kind: input, shape index: {}]   ;;  %s3860_s2 = inlined_call_operand.vmem [shape: f32[1800,64], index: 2, kind: input, shape index: {}]   ;;  %s3861_s3 = inlined_call_operand.hbm [shape: f32[2,13], index: 3, kind: output, shape index: {}]  }
   0x1   :  { %v36_v0 = vld [vmem:[%s3860_s2 + $0x78] sm:$0xff]  ;;  %v35_v1 = vld [vmem:[%s3860_s2 + $0x70] sm:$0xff]  ;;  %v34_v4 = vld [vmem:[%s3860_s2 + $0x68] sm:$0xff] }
   0x2   :  { %v52_v2 = vld [vmem:[%s3860_s2 + $0xf8] sm:$0xff]  ;;  %117 = vmatpush.msra.mxu0 %v36_v0  ;;  %v51_v3 = vld [vmem:[%s3860_s2 + $0xf0] sm:$0xff]  ;;  %v50_v5 = vld [vmem:[%s3860_s2 + $0xe8] sm:$0xff] }
   0x3   :  { %137 = vmatpush.msra.mxu1 %v52_v2  ;;  %v33_v6 = vld [vmem:[%s3860_s2 + $0x60] sm:$0xff]  ;;  %v32_v8 = vld [vmem:[%s3860_s2 + $0x58] sm:$0xff]  ;;  %v67_v11 = vld [vmem:[%s3860_s2 + $0x170] sm:$0xff] }
   0x4   :  { %118 = vmatpush.msra.mxu0 %v35_v1  ;;  %v49_v7 = vld [vmem:[%s3860_s2 + $0xe0] sm:$0xff]  ;;  %v48_v9 = vld [vmem:[%s3860_s2 + $0xd8] sm:$0xff]  ;;  %v31_v13 = vld [vmem:[%s3860_s2 + $0x50] sm:$0xff] }
   0x5   :  { %138 = vmatpush.msra.mxu1 %v51_v3  ;;  %v68_v10 = vld [vmem:[%s3860_s2 + $0x178] sm:$0xff]  ;;  %v47_v14 = vld [vmem:[%s3860_s2 + $0xd0] sm:$0xff]  ;;  %v66_v15 = vld [vmem:[%s3860_s2 + $0x168] sm:$0xff] }
   0x6   :  { %119 = vmatpush.msra.mxu0 %v34_v4  ;;  %v84_v12 = vld [vmem:[%s3860_s2 + $0x1f8] sm:$0xff]  ;;  %157 = vmatpush.msra.mxu2 %v68_v10  ;;  %v83_v16 = vld [vmem:[%s3860_s2 + $0x1f0] sm:$0xff]  ;;  %v30_v17 = vld [vmem:[%s3860_s2 + $0x48] sm:$0xff] }
   0x7   :  { %139 = vmatpush.msra.mxu1 %v50_v5  ;;  %177 = vmatpush.msra.mxu3 %v84_v12  ;;  %v46_v18 = vld [vmem:[%s3860_s2 + $0xc8] sm:$0xff]  ;;  %v65_v20 = vld [vmem:[%s3860_s2 + $0x160] sm:$0xff]  ;;  %v64_v24 = vld [vmem:[%s3860_s2 + $0x158] sm:$0xff] }
   0x8   :  { %120 = vmatpush.msra.mxu0 %v33_v6  ;;  %158 = vmatpush.msra.mxu2 %v67_v11  ;;  %v82_v19 = vld [vmem:[%s3860_s2 + $0x1e8] sm:$0xff]  ;;  %v81_v21 = vld [vmem:[%s3860_s2 + $0x1e0] sm:$0xff]  ;;  %v80_v25 = vld [vmem:[%s3860_s2 + $0x1d8] sm:$0xff] }
   0x9   :  { %140 = vmatpush.msra.mxu1 %v49_v7  ;;  %178 = vmatpush.msra.mxu3 %v83_v16  ;;  %v29_v22 = vld [vmem:[%s3860_s2 + $0x40] sm:$0xff]  ;;  %v28_v26 = vld [vmem:[%s3860_s2 + $0x38] sm:$0xff]  ;;  %v63_v28 = vld [vmem:[%s3860_s2 + $0x150] sm:$0xff] }
   0xa   :  { %121 = vmatpush.msra.mxu0 %v32_v8  ;;  %v45_v23 = vld [vmem:[%s3860_s2 + $0xc0] sm:$0xff]  ;;  %159 = vmatpush.msra.mxu2 %v66_v15  ;;  %v44_v27 = vld [vmem:[%s3860_s2 + $0xb8] sm:$0xff]  ;;  %v79_v29 = vld [vmem:[%s3860_s2 + $0x1d0] sm:$0xff] }
   0xb   :  { %141 = vmatpush.msra.mxu1 %v48_v9  ;;  %179 = vmatpush.msra.mxu3 %v82_v19  ;;  %v27_v30 = vld [vmem:[%s3860_s2 + $0x30] sm:$0xff]  ;;  %v62_v32 = vld [vmem:[%s3860_s2 + $0x148] sm:$0xff]  ;;  %v61_v36 = vld [vmem:[%s3860_s2 + $0x140] sm:$0xff] }
   0xc   :  { %122 = vmatpush.msra.mxu0 %v31_v13  ;;  %160 = vmatpush.msra.mxu2 %v65_v20  ;;  %v43_v31 = vld [vmem:[%s3860_s2 + $0xb0] sm:$0xff]  ;;  %v78_v33 = vld [vmem:[%s3860_s2 + $0x1c8] sm:$0xff]  ;;  %v77_v37 = vld [vmem:[%s3860_s2 + $0x1c0] sm:$0xff] }
   0xd   :  { %142 = vmatpush.msra.mxu1 %v47_v14  ;;  %180 = vmatpush.msra.mxu3 %v81_v21  ;;  %v26_v34 = vld [vmem:[%s3860_s2 + $0x28] sm:$0xff]  ;;  %v25_v38 = vld [vmem:[%s3860_s2 + $0x20] sm:$0xff]  ;;  %v60_v40 = vld [vmem:[%s3860_s2 + $0x138] sm:$0xff] }
   0xe   :  { %123 = vmatpush.msra.mxu0 %v30_v17  ;;  %161 = vmatpush.msra.mxu2 %v64_v24  ;;  %v42_v35 = vld [vmem:[%s3860_s2 + $0xa8] sm:$0xff]  ;;  %v41_v39 = vld [vmem:[%s3860_s2 + $0xa0] sm:$0xff]  ;;  %v76_v41 = vld [vmem:[%s3860_s2 + $0x1b8] sm:$0xff] }
   0xf   :  { %143 = vmatpush.msra.mxu1 %v46_v18  ;;  %181 = vmatpush.msra.mxu3 %v80_v25  ;;  %v24_v42 = vld [vmem:[%s3860_s2 + $0x18] sm:$0xff]  ;;  %v59_v44 = vld [vmem:[%s3860_s2 + $0x130] sm:$0xff]  ;;  %v58_v48 = vld [vmem:[%s3860_s2 + $0x128] sm:$0xff] }
  0x10   :  { %124 = vmatpush.msra.mxu0 %v29_v22  ;;  %162 = vmatpush.msra.mxu2 %v63_v28  ;;  %v40_v43 = vld [vmem:[%s3860_s2 + $0x98] sm:$0xff]  ;;  %v75_v45 = vld [vmem:[%s3860_s2 + $0x1b0] sm:$0xff]  ;;  %v74_v49 = vld [vmem:[%s3860_s2 + $0x1a8] sm:$0xff] }
  0x11   :  { %144 = vmatpush.msra.mxu1 %v45_v23  ;;  %182 = vmatpush.msra.mxu3 %v79_v29  ;;  %v23_v46 = vld [vmem:[%s3860_s2 + $0x10] sm:$0xff]  ;;  %v22_v50 = vld [vmem:[%s3860_s2 + $0x8] sm:$0xff]  ;;  %v57_v52 = vld [vmem:[%s3860_s2 + $0x120] sm:$0xff] }
  0x12   :  { %125 = vmatpush.msra.mxu0 %v28_v26  ;;  %163 = vmatpush.msra.mxu2 %v62_v32  ;;  %v39_v47 = vld [vmem:[%s3860_s2 + $0x90] sm:$0xff]  ;;  %v38_v51 = vld [vmem:[%s3860_s2 + $0x88] sm:$0xff]  ;;  %v73_v53 = vld [vmem:[%s3860_s2 + $0x1a0] sm:$0xff] }
  0x13   :  { %145 = vmatpush.msra.mxu1 %v44_v27  ;;  %183 = vmatpush.msra.mxu3 %v78_v33  ;;  %v21_v54 = vld [vmem:[%s3860_s2] sm:$0xff]  ;;  %v100_v56 = vld [vmem:[%s3860_s2 + $0x278] sm:$0xff]  ;;  %v99_v60 = vld [vmem:[%s3860_s2 + $0x270] sm:$0xff] }
  0x14   :  { %126 = vmatpush.msra.mxu0 %v27_v30  ;;  %164 = vmatpush.msra.mxu2 %v61_v36  ;;  %v37_v55 = vld [vmem:[%s3860_s2 + $0x80] sm:$0xff]  ;;  %v116_v57 = vld [vmem:[%s3860_s2 + $0x2f8] sm:$0xff]  ;;  %v98_v61 = vld [vmem:[%s3860_s2 + $0x268] sm:$0xff] }
  0x15   :  { %146 = vmatpush.msra.mxu1 %v43_v31  ;;  %184 = vmatpush.msra.mxu3 %v77_v37  ;;  %v56_v58 = vld [vmem:[%s3860_s2 + $0x118] sm:$0xff]  ;;  %v115_v62 = vld [vmem:[%s3860_s2 + $0x2f0] sm:$0xff]  ;;  %v114_v63 = vld [vmem:[%s3860_s2 + $0x2e8] sm:$0xff] }
  0x16   :  { %127 = vmatpush.msra.mxu0 %v26_v34  ;;  %165 = vmatpush.msra.mxu2 %v60_v40  ;;  %v72_v59 = vld [vmem:[%s3860_s2 + $0x198] sm:$0xff]  ;;  %v55_v0 = vld [vmem:[%s3860_s2 + $0x110] sm:$0xff]  ;;  %v97_v2 = vld [vmem:[%s3860_s2 + $0x260] sm:$0xff] }
  0x17   :  { %147 = vmatpush.msra.mxu1 %v42_v35  ;;  %185 = vmatpush.msra.mxu3 %v76_v41  ;;  %v71_v1 = vld [vmem:[%s3860_s2 + $0x190] sm:$0xff]  ;;  %v113_v3 = vld [vmem:[%s3860_s2 + $0x2e0] sm:$0xff]  ;;  %v54_v4 = vld [vmem:[%s3860_s2 + $0x108] sm:$0xff] }
  0x18   :  { %128 = vmatpush.msra.mxu0 %v25_v38  ;;  %166 = vmatpush.msra.mxu2 %v59_v44  ;;  %v70_v5 = vld [vmem:[%s3860_s2 + $0x188] sm:$0xff]  ;;  %v53_v6 = vld [vmem:[%s3860_s2 + $0x100] sm:$0xff]  ;;  %v96_v8 = vld [vmem:[%s3860_s2 + $0x258] sm:$0xff] }
  0x19   :  { %148 = vmatpush.msra.mxu1 %v41_v39  ;;  %186 = vmatpush.msra.mxu3 %v75_v45  ;;  %v69_v7 = vld [vmem:[%s3860_s2 + $0x180] sm:$0xff]  ;;  %v112_v9 = vld [vmem:[%s3860_s2 + $0x2d8] sm:$0xff]  ;;  %v17_v10 = vld [vmem:[%s3858_s0 + $0x10] sm:$0xff] }
  0x1a   :  { %129 = vmatpush.msra.mxu0 %v24_v42  ;;  %167 = vmatpush.msra.mxu2 %v58_v48  ;;  %v18_v11 = vld [vmem:[%s3858_s0 + $0x18] sm:$0xff] }
  0x1b   :  { %149 = vmatpush.msra.mxu1 %v40_v43  ;;  %187 = vmatpush.msra.mxu3 %v74_v49 }
  0x1c   :  { %130 = vmatpush.msra.mxu0 %v23_v46  ;;  %168 = vmatpush.msra.mxu2 %v57_v52 }
  0x1d   :  { %150 = vmatpush.msra.mxu1 %v39_v47  ;;  %188 = vmatpush.msra.mxu3 %v73_v53 }
  0x1e   :  { %131 = vmatpush.msra.mxu0 %v22_v50  ;;  %169 = vmatpush.msra.mxu2 %v56_v58 }
  0x1f   :  { %151 = vmatpush.msra.mxu1 %v38_v51  ;;  %189 = vmatpush.msra.mxu3 %v72_v59 }
  0x20   :  { %132 = vmatpush.msra.mxu0 %v21_v54  ;;  %170 = vmatpush.msra.mxu2 %v55_v0 }
  0x21   :  { %152 = vmatpush.msra.mxu1 %v37_v55  ;;  %190 = vmatpush.msra.mxu3 %v71_v1 }
  0x22   :  { %197 = vmatpush.msrb.mxu0 %v100_v56  ;;  %171 = vmatpush.msra.mxu2 %v54_v4 }
  0x23   :  { %217 = vmatpush.msrb.mxu1 %v116_v57  ;;  %191 = vmatpush.msra.mxu3 %v70_v5 }
  0x24   :  { %198 = vmatpush.msrb.mxu0 %v99_v60 }
  0x25   :  { %218 = vmatpush.msrb.mxu1 %v115_v62 }
  0x26   :  { %199 = vmatpush.msrb.mxu0 %v98_v61 }
  0x27   :  { %219 = vmatpush.msrb.mxu1 %v114_v63 }
  0x28   :  { %200 = vmatpush.msrb.mxu0 %v97_v2 }
  0x29   :  { %220 = vmatpush.msrb.mxu1 %v113_v3 }
  0x2a   :  { %8 = vsyncpa [#allocation3], 0  ;;  %v95_v12 = vld [vmem:[%s3860_s2 + $0x250] sm:$0xff]  ;;  %172 = vmatpush.msra.mxu2 %v53_v6  ;;  %192 = vmatpush.msra.mxu3 %v69_v7  ;;  %v15_v14 = vld [vmem:[%s3858_s0] sm:$0xff]  ;;  %vm253_vm0 = vcmask 1040384   ;;  %vm255_vm1 = vcmask 1044480  }
  0x2b   :  { %v111_v13 = vld [vmem:[%s3860_s2 + $0x2d0] sm:$0xff]  ;;  %201 = vmatpush.msrb.mxu0 %v96_v8  ;;  %221 = vmatpush.msrb.mxu1 %v112_v9  ;;  %v16_v15 = vld [vmem:[%s3858_s0 + $0x8] sm:$0xff]  ;;  %v93_v18 = vld [vmem:[%s3860_s2 + $0x240] sm:$0xff]  ;;  %vm257_vm2 = vcmask 1045504   ;;  %vm269_vm3 = vcmask 523264   ;;  %vm882_vm4 = vcmask 1042432  }
  0x2c   :  { %v94_v16 = vld [vmem:[%s3860_s2 + $0x248] sm:$0xff]  ;;  %173 = vmatmul.f32.vlgmr.msra.gmra.mxu2 %v17_v10  ;;  %193 = vmatmul.f32.vlgmr.msra.gmra.mxu3 %v18_v11  ;;  %v109_v19 = vld [vmem:[%s3860_s2 + $0x2c0] sm:$0xff]  ;;  %v92_v20 = vld [vmem:[%s3860_s2 + $0x238] sm:$0xff]  ;;  %vm393_vm5 = vcmask 36864   ;;  %vm443_vm6 = vcmask 39936   ;;  %vm1564_vm7 = vcmask 517120  }
  0x2d   :  { %v110_v17 = vld [vmem:[%s3860_s2 + $0x2c8] sm:$0xff]  ;;  %202 = vmatpush.msrb.mxu0 %v95_v12  ;;  %222 = vmatpush.msrb.mxu1 %v111_v13  ;;  %v108_v21 = vld [vmem:[%s3860_s2 + $0x2b8] sm:$0xff]  ;;  %v91_v22 = vld [vmem:[%s3860_s2 + $0x230] sm:$0xff]  ;;  %s2564_s5 = smov [#allocation2]   ;;  %s2304_s7 = sshll.u32 %s3861_s3, 4  ;;  %s2305_s7 = int_to_ptr.hbm [resolvable:$true] %s2304_s7 }
  0x2e   :  { %133 = vmatmul.f32.vlgmr.msra.gmra.mxu0 %v15_v14  ;;  %153 = vmatmul.f32.vlgmr.msra.gmra.mxu1 %v16_v15  ;;  %v107_v23 = vld [vmem:[%s3860_s2 + $0x2b0] sm:$0xff]  ;;  %v90_v24 = vld [vmem:[%s3860_s2 + $0x228] sm:$0xff]  ;;  %v89_v26 = vld [vmem:[%s3860_s2 + $0x220] sm:$0xff]  ;;  %s2302_s6 = sshll.u32 %s2564_s5, 4  ;;  %s2303_s6 = int_to_ptr.vmem [resolvable:$true] %s2302_s6 }
  0x2f   :  { %203 = vmatpush.msrb.mxu0 %v94_v16  ;;  %223 = vmatpush.msrb.mxu1 %v110_v17  ;;  %v106_v25 = vld [vmem:[%s3860_s2 + $0x2a8] sm:$0xff]  ;;  %v105_v27 = vld [vmem:[%s3860_s2 + $0x2a0] sm:$0xff]  ;;  %v88_v28 = vld [vmem:[%s3860_s2 + $0x218] sm:$0xff] }
  0x30   :  { %v104_v29 = vld [vmem:[%s3860_s2 + $0x298] sm:$0xff]  ;;  %v87_v30 = vld [vmem:[%s3860_s2 + $0x210] sm:$0xff]  ;;  %v86_v32 = vld [vmem:[%s3860_s2 + $0x208] sm:$0xff] }
  0x31   :  { %204 = vmatpush.msrb.mxu0 %v93_v18  ;;  %224 = vmatpush.msrb.mxu1 %v109_v19  ;;  %v103_v31 = vld [vmem:[%s3860_s2 + $0x290] sm:$0xff]  ;;  %v102_v33 = vld [vmem:[%s3860_s2 + $0x288] sm:$0xff]  ;;  %v85_v34 = vld [vmem:[%s3860_s2 + $0x200] sm:$0xff] }
  0x32   :  { %v101_v35 = vld [vmem:[%s3860_s2 + $0x280] sm:$0xff]  ;;  %v20_v37 = vld [vmem:[%s3858_s0 + $0x28] sm:$0xff]  ;;  %v264_v42 = vld [vmem:[%s3860_s2 + $0x338] sm:$0xff] }
  0x33   :  { %205 = vmatpush.msrb.mxu0 %v92_v20  ;;  %225 = vmatpush.msrb.mxu1 %v108_v21  ;;  %v19_v36 = vld [vmem:[%s3858_s0 + $0x20] sm:$0xff]  ;;  %v266_v38 = vld [vmem:[%s3860_s2 + $0x348] sm:$0xff]  ;;  %v303_v43 = vld [vmem:[%s3860_s2 + $0x378] sm:$0xff] }
  0x34   :  { %v305_v39 = vld [vmem:[%s3860_s2 + $0x388] sm:$0xff]  ;;  %v265_v40 = vld [vmem:[%s3860_s2 + $0x340] sm:$0xff]  ;;  %283 = vmatpush.msrb.mxu2 %v266_v38  ;;  %v263_v44 = vld [vmem:[%s3860_s2 + $0x330] sm:$0xff] }
  0x35   :  { %206 = vmatpush.msrb.mxu0 %v91_v22  ;;  %226 = vmatpush.msrb.mxu1 %v107_v23  ;;  %v304_v41 = vld [vmem:[%s3860_s2 + $0x380] sm:$0xff]  ;;  %v302_v45 = vld [vmem:[%s3860_s2 + $0x370] sm:$0xff]  ;;  %v262_v46 = vld [vmem:[%s3860_s2 + $0x328] sm:$0xff] }
  0x36   :  { %316 = vmatpush.msrb.mxu3 %v305_v39  ;;  %284 = vmatpush.msrb.mxu2 %v265_v40  ;;  %v301_v47 = vld [vmem:[%s3860_s2 + $0x368] sm:$0xff]  ;;  %v261_v48 = vld [vmem:[%s3860_s2 + $0x320] sm:$0xff]  ;;  %v260_v50 = vld [vmem:[%s3860_s2 + $0x318] sm:$0xff] }
  0x37   :  { %207 = vmatpush.msrb.mxu0 %v90_v24  ;;  %227 = vmatpush.msrb.mxu1 %v106_v25  ;;  %v300_v49 = vld [vmem:[%s3860_s2 + $0x360] sm:$0xff]  ;;  %v299_v51 = vld [vmem:[%s3860_s2 + $0x358] sm:$0xff]  ;;  %v259_v52 = vld [vmem:[%s3860_s2 + $0x310] sm:$0xff] }
  0x38   :  { %317 = vmatpush.msrb.mxu3 %v304_v41  ;;  %285 = vmatpush.msrb.mxu2 %v264_v42  ;;  %v298_v53 = vld [vmem:[%s3860_s2 + $0x350] sm:$0xff]  ;;  %v338_v54 = vld [vmem:[%s3860_s2 + $0x3c8] sm:$0xff]  ;;  %v337_v55 = vld [vmem:[%s3860_s2 + $0x3c0] sm:$0xff] }
  0x39   :  { %208 = vmatpush.msrb.mxu0 %v89_v26  ;;  %228 = vmatpush.msrb.mxu1 %v105_v27  ;;  %v336_v56 = vld [vmem:[%s3860_s2 + $0x3b8] sm:$0xff]  ;;  %v335_v57 = vld [vmem:[%s3860_s2 + $0x3b0] sm:$0xff]  ;;  %v334_v60 = vld [vmem:[%s3860_s2 + $0x3a8] sm:$0xff] }
  0x3a   :  { %318 = vmatpush.msrb.mxu3 %v303_v43  ;;  %286 = vmatpush.msrb.mxu2 %v263_v44  ;;  %v333_v61 = vld [vmem:[%s3860_s2 + $0x3a0] sm:$0xff]  ;;  %v332_v62 = vld [vmem:[%s3860_s2 + $0x398] sm:$0xff]  ;;  %v331_v1 = vld [vmem:[%s3860_s2 + $0x390] sm:$0xff] }
  0x3b   :  { %209 = vmatpush.msrb.mxu0 %v88_v28  ;;  %229 = vmatpush.msrb.mxu1 %v104_v29  ;;  %v238_v4 = vld [vmem:[%s3860_s2 + $0x308] sm:$0xf]  ;;  %v237_v11 = vld [vmem:[%s3860_s2 + $0x300] sm:$0x1]  ;;  %v364_v20 = vld [vmem:[%s3860_s2 + $0x430] sm:$0xff] }
  0x3c   :  { %319 = vmatpush.msrb.mxu3 %v302_v45  ;;  %287 = vmatpush.msrb.mxu2 %v262_v46  ;;  %v241_v9 = vrot.slane %v238_v4, 4  ;;  %v248_v14 = vrot.slane %v237_v11, 3  ;;  %v2430_v21 = vld [vmem:[%s3860_s2 + $0x3d0] ss:$0 sm:$0xff]  ;;  %v2431_v22 = vld [vmem:[%s3860_s2 + $0x3d8] ss:$0 sm:$0xff] }
  0x3d   :  { %210 = vmatpush.msrb.mxu0 %v87_v30  ;;  %230 = vmatpush.msrb.mxu1 %v103_v31  ;;  %v2986_v23 = vperm.slane %v364_v20, 0  ;;  %v2988_v24 = vperm.slane %v364_v20, 1  ;;  %v2990_v25 = vperm.slane %v364_v20, 3  ;;  %v3030_v38 = vperm.slane %v364_v20, 7  ;;  %v2432_v44 = vld [vmem:[%s3860_s2 + $0x3e0] ss:$0 sm:$0xff] }
  0x3e   :  { %320 = vmatpush.msrb.mxu3 %v301_v47  ;;  %288 = vmatpush.msrb.mxu2 %v261_v48 }
  0x3f   :  { %211 = vmatpush.msrb.mxu0 %v86_v32  ;;  %231 = vmatpush.msrb.mxu1 %v102_v33  ;;  %v3014_v33 = vperm.slane %v364_v20, 5 }
  0x40   :  { %321 = vmatpush.msrb.mxu3 %v300_v49  ;;  %289 = vmatpush.msrb.mxu2 %v260_v50 }
  0x41   :  { %212 = vmatpush.msrb.mxu0 %v85_v34  ;;  %232 = vmatpush.msrb.mxu1 %v101_v35  ;;  %v3024_v35 = vperm.slane %v364_v20, 2 }
  0x42   :  { %213 = vmatmul.f32.vlgmr.msrb.gmra.mxu0 %v19_v36  ;;  %233 = vmatmul.f32.vlgmr.msrb.gmra.mxu1 %v20_v37 }
  0x43   :  { %322 = vmatpush.msrb.mxu3 %v299_v51  ;;  %290 = vmatpush.msrb.mxu2 %v259_v52 }
  0x45   :  { %323 = vmatpush.msrb.mxu3 %v298_v53  ;;  %349 = vmatpush.msra.mxu2 %v338_v54 }
  0x47   :  { %350 = vmatpush.msra.mxu2 %v337_v55 }
  0x49   :  { %351 = vmatpush.msra.mxu2 %v336_v56 }
  0x4b   :  { %352 = vmatpush.msra.mxu2 %v335_v57 }
  0x4d   :  { %353 = vmatpush.msra.mxu2 %v334_v60 }
  0x4f   :  { %354 = vmatpush.msra.mxu2 %v333_v61  ;;  %v3065_v61 = vperm.slane %v364_v20, 6 }
  0x51   :  { %355 = vmatpush.msra.mxu2 %v332_v62 }
  0x53   :  { %356 = vmatpush.msra.mxu2 %v331_v1 }
  0xab   :  { %v134_v58 = vpop.f32.mrf.mxu0  ;;  %v154_v59 = vpop.f32.mrf.mxu1 }
  0xac   :  { %v155_v63 = vadd.f32 %v154_v59, %v134_v58  ;;  %v3061_v58 = vperm.slane %v364_v20, 4 }
  0xaf   :  { %v174_v0 = vpop.f32.mrf.mxu2  ;;  %v194_v3 = vpop.f32.mrf.mxu3 }
  0xb0   :  { %v175_v2 = vadd.f32 %v174_v0, %v155_v63 }
  0xb2   :  { %v195_v5 = vadd.f32 %v194_v3, %v175_v2 }
  0xbf   :  { %v214_v6 = vpop.f32.mrf.mxu0  ;;  %v234_v7 = vpop.f32.mrf.mxu1 }
  0xc0   :  { %v215_v8 = vadd.f32 %v214_v6, %v195_v5 }
  0xc2   :  { %v235_v10 = vadd.f32 %v234_v7, %v215_v8 }
  0xc4   :  { %v239_v12 = vadd.f32 %v238_v4, %v235_v10  ;;  %v243_v13 = vadd.f32 %v241_v9, %v235_v10 }
  0xc6   :  { %v245_v15 = vrot.slane %v239_v12, 7  ;;  %v251_v16 = vrot.slane %v243_v13, 6 }
  0xc8   :  { %v254_v17 = vsel %vm253_vm0, %v237_v11, %v245_v15 }
  0xc9   :  { %v256_v18 = vsel %vm255_vm1, %v254_v17, %v248_v14 }
  0xca   :  { %v258_v19 = vsel %vm257_vm2, %v256_v18, %v251_v16 }
  0xcb   :  { %2313 = vmatmul.msk.f32.vlgmr.msrb.gmra.mxu2 %vm269_vm3, %v258_v19  ;;  %2315 = vmatmul.msk.f32.vlgmr.msrb.gmra.mxu3 %vm269_vm3, %v258_v19 }
  0xd3   :  { %2314 = vmatmul.msk.f32.gmra.mxu2 %vm269_vm3, %v251_v16  ;;  %2316 = vmatmul.msk.f32.gmra.mxu3 %vm269_vm3, %v251_v16 }
  0xdb   :  { %2317 = vmatmul.msk.f32.vlgmr.msra.gmra.mxu2 %vm269_vm3, %v258_v19 }
  0xe3   :  { %2318 = vmatmul.msk.f32.gmra.mxu2 %vm269_vm3, %v251_v16 }
 0x14e   :  { %v292_v26 = vpop.f32.mrf.mxu2  ;;  %v325_v27 = vpop.f32.mrf.mxu3 }
 0x14f   :  { %v2992_v28 = vadd.f32 %v2430_v21, %v292_v26  ;;  %v2994_v29 = vadd.f32 %v2431_v22, %v325_v27 }
 0x151   :  { %2319 = vmatpush.xpose.msk.msra.mxu3 %vm269_vm3, %v2994_v29  ;;  %2321 = vmatpush.xpose.msk.msra.mxu0 %vm269_vm3, %v2994_v29  ;;  %v3002_v30 = vmul.f32 %v2986_v23, %v2992_v28  ;;  %v407_v31 = vmul.f32 %v2988_v24, %v2992_v28  ;;  %v561_v32 = vmul.f32 %v2990_v25, %v2992_v28  ;;  %v887_v7 = vrot.slane %v2994_v29, 5 }
 0x152   :  { %2331 = vmatpush.xpose.msk.msrb.mxu2 %vm269_vm3, %v2994_v29  ;;  %v689_v37 = vmul.f32 %v3014_v33, %v2992_v28  ;;  %v3034_v40 = vmul.f32 %v3024_v35, %v2992_v28  ;;  %v817_v45 = vmul.f32 %v3030_v38, %v2992_v28  ;;  %v625_v8 = vmul.f32 %v3061_v58, %v2992_v28 }
 0x153   :  { %v928_v46 = vrot.slane %v407_v31, 5  ;;  %v1094_v47 = vrot.slane %v561_v32, 5  ;;  %v753_v14 = vmul.f32 %v3065_v61, %v2992_v28 }
 0x154   :  { %2320 = vmatmul.msk.f32.vlgmr.msra.gmra.mxu3 %vm269_vm3, %v3002_v30  ;;  %2322 = vmatmul.msk.f32.vlgmr.msra.gmra.mxu0 %vm269_vm3, %v407_v31  ;;  %v1232_v48 = vrot.slane %v689_v37, 5  ;;  %v1370_v62 = vrot.slane %v817_v45, 5 }
 0x155   :  { %2327 = vmatpush.xpose.msk.msrb.mxu0 %vm269_vm3, %v2994_v29  ;;  %2332 = vmatmul.msk.f32.vlgmr.msrb.gmra.mxu2 %vm269_vm3, %v561_v32 }
 0x156   :  { %2339 = vmatpush.xpose.msk.msra.mxu2 %vm269_vm3, %v2994_v29  ;;  %v295_v34 = vpop.f32.mrf.mxu2  ;;  %v328_v39 = vpop.f32.mrf.mxu3 }
 0x157   :  { %v3026_v36 = vadd.f32 %v2430_v21, %v295_v34  ;;  %v329_v49 = vadd.f32 %v2431_v22, %v328_v39 }
 0x159   :  { %2335 = vmatpush.xpose.msk.msra.mxu0 %vm269_vm3, %v2994_v29  ;;  %v926_v41 = vmul.f32 %v2988_v24, %v3026_v36  ;;  %v1092_v42 = vmul.f32 %v2990_v25, %v3026_v36  ;;  %v1230_v43 = vmul.f32 %v3014_v33, %v3026_v36  ;;  %v1368_v59 = vmul.f32 %v3030_v38, %v3026_v36 }
 0x15a   :  { %2347 = vmatpush.xpose.msk.msrb.mxu2 %vm269_vm3, %v2994_v29  ;;  %v888_v60 = vrot.slane %v329_v49, 5  ;;  %v880_v15 = vmul.f32 %v2986_v23, %v3026_v36  ;;  %v1023_v49 = vmul.f32 %v3024_v35, %v3026_v36 }
 0x15b   :  { %v929_v50 = vrot.slane %v926_v41, 5  ;;  %v1095_v51 = vrot.slane %v1092_v42, 5  ;;  %v1233_v52 = vrot.slane %v1230_v43, 5  ;;  %v1371_v5 = vrot.slane %v1368_v59, 5 }
 0x15c   :  { %2328 = vmatmul.msk.f32.vlgmr.msrb.gmra.mxu0 %vm269_vm3, %v3034_v40  ;;  %v3094_v11 = vsel %vm882_vm4, %v887_v7, %v888_v60  ;;  %v1299_v59 = vmul.f32 %v3065_v61, %v3026_v36  ;;  %v1301_v60 = vrot.slane %v753_v14, 5 }
 0x15d   :  { %2340 = vmatmul.msk.f32.vlgmr.msra.gmra.mxu2 %vm269_vm3, %v689_v37  ;;  %2343 = vmatpush.xpose.msk.msrb.mxu0 %vm269_vm3, %v2994_v29  ;;  %v3053_v54 = vsel %vm882_vm4, %v928_v46, %v929_v50  ;;  %v3056_v55 = vsel %vm882_vm4, %v1094_v47, %v1095_v51  ;;  %v3059_v56 = vsel %vm882_vm4, %v1232_v48, %v1233_v52  ;;  %v884_v46 = vrot.slane %v880_v15, 5 }
 0x15e   :  { %v358_v53 = vpop.f32.mrf.mxu2  ;;  %v3091_v10 = vsel %vm882_vm4, %v1370_v62, %v1371_v5  ;;  %v883_v47 = vrot.slane %v3002_v30, 5  ;;  %v1026_v50 = vrot.slane %v1023_v49, 5  ;;  %v1025_v51 = vrot.slane %v3034_v40, 5 }
 0x15f   :  { %v359_v57 = vadd.f32 %v2432_v44, %v358_v53  ;;  %v1161_v53 = vmul.f32 %v3061_v58, %v3026_v36  ;;  %v1302_v40 = vrot.slane %v1299_v59, 5 }
 0x160   :  { %v885_v48 = vsel %vm882_vm4, %v883_v47, %v884_v46  ;;  %v1027_v52 = vsel %vm882_vm4, %v1025_v51, %v1026_v50 }
 0x161   :  { %v442_v63 = vmul.f32 %v2988_v24, %v359_v57  ;;  %v405_v0 = vmul.f32 %v2986_v23, %v359_v57  ;;  %v532_v1 = vmul.f32 %v3024_v35, %v359_v57  ;;  %v596_v2 = vmul.f32 %v2990_v25, %v359_v57 }
 0x162   :  { %v3072_v3 = vmul.f32 %v3061_v58, %v359_v57  ;;  %v3075_v4 = vmul.f32 %v3065_v61, %v359_v57  ;;  %v3078_v6 = vmul.f32 %v3014_v33, %v359_v57  ;;  %v3086_v9 = vmul.f32 %v3030_v38, %v359_v57 }
 0x163   :  { %2323 = vmatpush.msk.msra.mxu1 %vm255_vm1, %v442_v63  ;;  %2325 = vmatpush.msk.msrb.mxu3 %vm255_vm1, %v405_v0  ;;  %v966_v16 = vrot.slane %v442_v63, 5  ;;  %v1063_v17 = vrot.slane %v532_v1, 5  ;;  %v995_v19 = vrot.slane %v405_v0, 5  ;;  %v1132_v39 = vrot.slane %v596_v2, 5 }
 0x164   :  { %2336 = vmatmul.msk.f32.vlgmr.msra.gmra.mxu0 %vm269_vm3, %v625_v8  ;;  %v1201_v18 = vrot.slane %v3072_v3, 5  ;;  %v1270_v42 = vrot.slane %v3078_v6, 5  ;;  %v1164_v30 = vrot.slane %v1161_v53, 5  ;;  %v1303_v62 = vsel %vm882_vm4, %v1301_v60, %v1302_v40 }
 0x165   :  { %2329 = vmatpush.msk.msrb.mxu1 %vm255_vm1, %v532_v1  ;;  %2333 = vmatpush.msk.msra.mxu3 %vm255_vm1, %v596_v2 }
 0x166   :  { %2348 = vmatmul.msk.f32.vlgmr.msrb.gmra.mxu2 %vm269_vm3, %v817_v45  ;;  %2351 = vmatpush.xpose.msk.msra.mxu0 %vm269_vm3, %v3094_v11  ;;  %v361_v12 = vpop.f32.mrf.mxu2 }
 0x167   :  { %v362_v13 = vadd.f32 %v2432_v44, %v361_v12 }
 0x169   :  { %v964_v20 = vmul.f32 %v2988_v24, %v362_v13  ;;  %v1061_v21 = vmul.f32 %v3024_v35, %v362_v13  ;;  %v1199_v22 = vmul.f32 %v3061_v58, %v362_v13  ;;  %v925_v26 = vmul.f32 %v2986_v23, %v362_v13 }
 0x16a   :  { %v1130_v27 = vmul.f32 %v2990_v25, %v362_v13  ;;  %v3111_v28 = vmul.f32 %v3065_v61, %v362_v13  ;;  %v1268_v29 = vmul.f32 %v3014_v33, %v362_v13  ;;  %v3115_v31 = vmul.f32 %v3030_v38, %v362_v13 }
 0x16b   :  { %v967_v32 = vrot.slane %v964_v20, 5  ;;  %v1064_v34 = vrot.slane %v1061_v21, 5  ;;  %v1202_v37 = vrot.slane %v1199_v22, 5  ;;  %v996_v24 = vrot.slane %v925_v26, 5 }
 0x16c   :  { %v1133_v41 = vrot.slane %v1130_v27, 5  ;;  %v1271_v43 = vrot.slane %v1268_v29, 5  ;;  %2344 = vmatmul.msk.f32.vlgmr.msrb.gmra.mxu0 %vm269_vm3, %v753_v14  ;;  %v1163_v35 = vrot.slane %v625_v8, 5 }
 0x16d   :  { %v968_v23 = vsel %vm882_vm4, %v966_v16, %v967_v32  ;;  %v3121_v25 = vsel %vm882_vm4, %v1063_v17, %v1064_v34  ;;  %v3124_v33 = vsel %vm882_vm4, %v1201_v18, %v1202_v37  ;;  %v3127_v38 = vsel %vm882_vm4, %v995_v19, %v996_v24  ;;  %2359 = vmatpush.xpose.msk.msrb.mxu0 %vm269_vm3, %v3094_v11 }
 0x16e   :  { %2355 = vmatpush.msk.msra.mxu2 %vm255_vm1, %v968_v23  ;;  %v3133_v44 = vsel %vm882_vm4, %v1132_v39, %v1133_v41  ;;  %v3136_v45 = vsel %vm882_vm4, %v1270_v42, %v1271_v43  ;;  %v1165_v57 = vsel %vm882_vm4, %v1163_v35, %v1164_v30 }
 0x170   :  { %2363 = vmatpush.xpose.msk.msrb.mxu2 %vm269_vm3, %v3094_v11 }
 0x174   :  { %2352 = vmatmul.msk.f32.vlgmr.msra.gmra.mxu0 %vm269_vm3, %v885_v48 }
 0x175   :  { %2367 = vmatpush.xpose.msk.msra.mxu0 %vm269_vm3, %v3094_v11 }
 0x17c   :  { %2360 = vmatmul.msk.f32.vlgmr.msrb.gmra.mxu0 %vm269_vm3, %v1027_v52 }
 0x17d   :  { %2375 = vmatpush.xpose.msk.msrb.mxu0 %vm269_vm3, %v3094_v11 }
 0x184   :  { %2368 = vmatmul.msk.f32.vlgmr.msra.gmra.mxu0 %vm269_vm3, %v1165_v57 }
 0x18c   :  { %2376 = vmatmul.msk.f32.vlgmr.msrb.gmra.mxu0 %vm269_vm3, %v1303_v62 }
 0x1d1   :  { %v428_v58 = vpop.f32.mrf.mxu0 }
 0x1d2   :  { %v431_v63 = vsel %vm393_vm5, %v428_v58, -inf }
 0x1d3   :  { %432 = vmax.xlane.f32.xlu0 %v431_v63 }
 0x1d7   :  { %v3172_v42 = vpop.f32.mrf.mxu3 }
 0x1d8   :  { %v3167_v37 = vpop.f32.mrf.mxu2  ;;  %v394_v23 = vsel %vm393_vm5, %v3172_v42, -inf }
 0x1d9   :  { %v518_v0 = vpop.f32.mrf.mxu0 }
 0x1da   :  { %v521_v1 = vsel %vm393_vm5, %v518_v0, -inf }
 0x1db   :  { %522 = vmax.xlane.f32.xlu0 %v521_v1 }
 0x1e0   :  { %v3170_v41 = vpop.f32.mrf.mxu2 }
 0x1e1   :  { %v646_v2 = vpop.f32.mrf.mxu0 }
 0x1e2   :  { %v649_v36 = vsel %vm393_vm5, %v646_v2, -inf }
 0x1e3   :  { %650 = vmax.xlane.f32.xlu1 %v649_v36 }
 0x1e9   :  { %v774_v61 = vpop.f32.mrf.mxu0  ;;  %v3178_v46 = vpop.f32.mrf.mxu2 }
 0x1ea   :  { %v777_v5 = vsel %vm393_vm5, %v774_v61, -inf  ;;  %v841_v47 = vsel %vm393_vm5, %v3178_v46, -inf }
 0x1eb   :  { %778 = vmax.xlane.f32.xlu1 %v777_v5 }
 0x1f1   :  { %v3174_v43 = vpop.f32.mrf.mxu0 }
 0x1f9   :  { %v3182_v48 = vpop.f32.mrf.mxu0 }
 0x1fa   :  { %v1050_v49 = vsel %vm393_vm5, %v3182_v48, -inf }
 0x201   :  { %v3186_v50 = vpop.f32.mrf.mxu0 }
 0x202   :  { %v1188_v51 = vsel %vm393_vm5, %v3186_v50, -inf }
 0x209   :  { %v3190_v52 = vpop.f32.mrf.mxu0 }
 0x20a   :  { %v1326_v53 = vsel %vm393_vm5, %v3190_v52, -inf }
 0x246   :  { %v433_v7 = vpop.xlane.xlu0 %432 }
 0x247   :  { %v434_v8 = vsub.f32 %v428_v58, %v433_v7 }
 0x249   :  { %v435_v12 = vmul.f32 1.442695, %v434_v8 }
 0x24b   :  { %2442 = vpow2.f32 %v435_v12 }
 0x24e   :  { %v523_v13 = vpop.xlane.xlu0 %522 }
 0x24f   :  { %v524_v14 = vsub.f32 %v518_v0, %v523_v13 }
 0x251   :  { %v2443_v15 = vpop.eup %2442  ;;  %v525_v16 = vmul.f32 1.442695, %v524_v14 }
 0x252   :  { %v437_v17 = vsel %vm393_vm5, %v2443_v15, 0.0 }
 0x253   :  { %2444 = vpow2.f32 %v525_v16  ;;  %438 = vadd.xlane.f32.xlu2 %v437_v17 }
 0x256   :  { %v651_v18 = vpop.xlane.xlu1 %650 }
 0x257   :  { %v652_v19 = vsub.f32 %v646_v2, %v651_v18 }
 0x259   :  { %v2445_v20 = vpop.eup %2444  ;;  %v653_v21 = vmul.f32 1.442695, %v652_v19 }
 0x25a   :  { %v527_v22 = vsel %vm393_vm5, %v2445_v20, 0.0 }
 0x25b   :  { %528 = vadd.xlane.f32.xlu2 %v527_v22  ;;  %2446 = vpow2.f32 %v653_v21 }
 0x25e   :  { %v779_v26 = vpop.xlane.xlu1 %778 }
 0x25f   :  { %v780_v27 = vsub.f32 %v774_v61, %v779_v26 }
 0x261   :  { %v2447_v29 = vpop.eup %2446  ;;  %v781_v32 = vmul.f32 1.442695, %v780_v27 }
 0x262   :  { %v655_v34 = vsel %vm393_vm5, %v2447_v29, 0.0 }
 0x263   :  { %2448 = vpow2.f32 %v781_v32  ;;  %656 = vadd.xlane.f32.xlu0 %v655_v34 }
 0x269   :  { %v2449_v24 = vpop.eup %2448 }
 0x26a   :  { %v783_v39 = vsel %vm393_vm5, %v2449_v24, 0.0 }
 0x26b   :  { %784 = vadd.xlane.f32.xlu1 %v783_v39 }
 0x273   :  { %395 = vmax.xlane.f32.xlu1 %v394_v23 }
 0x27b   :  { %842 = vmax.xlane.f32.xlu1 %v841_v47 }
 0x283   :  { %1051 = vmax.xlane.f32.xlu1 %v1050_v49 }
 0x28b   :  { %1189 = vmax.xlane.f32.xlu1 %v1188_v51 }
 0x293   :  { %1327 = vmax.xlane.f32.xlu1 %v1326_v53 }
 0x2c6   :  { %v439_v30 = vpop.xlane.xlu2 %438 }
 0x2c7   :  { %2450 = vrcp.f32 %v439_v30 }
 0x2cd   :  { %v2451_v35 = vpop.eup %2450 }
 0x2ce   :  { %v441_v57 = vmul.f32 %v2451_v35, %v2443_v15  ;;  %v529_v59 = vpop.xlane.xlu2 %528 }
 0x2cf   :  { %2452 = vrcp.f32 %v529_v59 }
 0x2d0   :  { %2324 = vmatmul.msk.f32.vlgmr.msra.gmra.mxu1 %vm443_vm6, %v441_v57 }
 0x2d1   :  { %2337 = vmatpush.msk.msra.mxu1 %vm255_vm1, %v3072_v3 }
 0x2d5   :  { %v2453_v40 = vpop.eup %2452 }
 0x2d6   :  { %v531_v60 = vmul.f32 %v2453_v40, %v2445_v20  ;;  %v657_v62 = vpop.xlane.xlu0 %656  ;;  %v713_v20 = vsel %vm393_vm5, %v3170_v41, -inf }
 0x2d7   :  { %2454 = vrcp.f32 %v657_v62 }
 0x2d8   :  { %2330 = vmatmul.msk.f32.vlgmr.msrb.gmra.mxu1 %vm443_vm6, %v531_v60 }
 0x2d9   :  { %2345 = vmatpush.msk.msrb.mxu1 %vm255_vm1, %v3075_v4 }
 0x2dd   :  { %v2455_v58 = vpop.eup %2454 }
 0x2de   :  { %v659_v63 = vmul.f32 %v2455_v58, %v2447_v29  ;;  %v785_v0 = vpop.xlane.xlu1 %784 }
 0x2df   :  { %2456 = vrcp.f32 %v785_v0 }
 0x2e0   :  { %2338 = vmatmul.msk.f32.vlgmr.msra.gmra.mxu1 %vm443_vm6, %v659_v63 }
 0x2e1   :  { %2353 = vmatpush.xpose.msk.msra.mxu1 %vm269_vm3, %v3094_v11 }
 0x2e5   :  { %v2457_v1 = vpop.eup %2456 }
 0x2e6   :  { %v787_v3 = vmul.f32 %v2457_v1, %v2449_v24  ;;  %v396_v32 = vpop.xlane.xlu1 %395 }
 0x2e7   :  { %v397_v34 = vsub.f32 %v3172_v42, %v396_v32 }
 0x2e8   :  { %2346 = vmatmul.msk.f32.vlgmr.msrb.gmra.mxu1 %vm443_vm6, %v787_v3 }
 0x2e9   :  { %2361 = vmatpush.msk.msrb.mxu1 %vm255_vm1, %v3121_v25  ;;  %v585_v25 = vsel %vm393_vm5, %v3167_v37, -inf  ;;  %v398_v39 = vmul.f32 1.442695, %v397_v34 }
 0x2f0   :  { %2354 = vmatmul.msk.f32.vlgmr.msra.gmra.mxu1 %vm269_vm3, %v3053_v54  ;;  %v914_v54 = vsel %vm393_vm5, %v3174_v43, -inf }
 0x2f1   :  { %2369 = vmatpush.msk.msra.mxu1 %vm255_vm1, %v3124_v33 }
 0x34d   :  { %v3210_v2 = vpop.f32.mrf.mxu1 }
 0x355   :  { %v3212_v36 = vpop.f32.mrf.mxu1 }
 0x35d   :  { %v3214_v61 = vpop.f32.mrf.mxu1 }
 0x365   :  { %v3216_v5 = vpop.f32.mrf.mxu1 }
 0x36d   :  { %v950_v7 = vpop.f32.mrf.mxu1 }
 0x36e   :  { %v953_v8 = vsel %vm393_vm5, %v950_v7, -inf }
 0x36f   :  { %954 = vmax.xlane.f32.xlu2 %v953_v8 }
 0x377   :  { %586 = vmax.xlane.f32.xlu2 %v585_v25 }
 0x37f   :  { %915 = vmax.xlane.f32.xlu2 %v914_v54 }
 0x3e2   :  { %v955_v33 = vpop.xlane.xlu2 %954 }
 0x3e3   :  { %v956_v12 = vsub.f32 %v950_v7, %v955_v33 }
 0x3e5   :  { %v957_v13 = vmul.f32 1.442695, %v956_v12 }
 0x3e7   :  { %2458 = vpow2.f32 %v957_v13 }
 0x3ea   :  { %v587_v14 = vpop.xlane.xlu2 %586 }
 0x3ed   :  { %v2459_v15 = vpop.eup %2458 }
 0x3ee   :  { %v959_v16 = vsel %vm393_vm5, %v2459_v15, 0.0 }
 0x3ef   :  { %960 = vadd.xlane.f32.xlu0 %v959_v16 }
 0x3f2   :  { %v916_v17 = vpop.xlane.xlu2 %915 }
 0x3f3   :  { %v917_v18 = vsub.f32 %v3174_v43, %v916_v17  ;;  %v588_v43 = vsub.f32 %v3167_v37, %v587_v14 }
 0x3f5   :  { %v918_v19 = vmul.f32 1.442695, %v917_v18  ;;  %v589_v47 = vmul.f32 1.442695, %v588_v43 }
 0x3f7   :  { %2460 = vpow2.f32 %v918_v19  ;;  %714 = vmax.xlane.f32.xlu0 %v713_v20 }
 0x3fd   :  { %v3227_v21 = vpop.eup %2460 }
 0x3fe   :  { %v920_v22 = vsel %vm393_vm5, %v3227_v21, 0.0 }
 0x3ff   :  { %921 = vadd.xlane.f32.xlu1 %v920_v22 }
 0x462   :  { %v961_v26 = vpop.xlane.xlu0 %960 }
 0x463   :  { %2462 = vrcp.f32 %v961_v26 }
 0x464   :  { %2464 = vpow2.f32 %v398_v39 }
 0x465   :  { %2466 = vpow2.f32 %v589_v47 }
 0x469   :  { %v2463_v27 = vpop.eup %2462 }
 0x46a   :  { %v963_v29 = vmul.f32 %v2463_v27, %v2459_v15  ;;  %v715_v49 = vpop.xlane.xlu0 %714 }
 0x46c   :  { %2356 = vmatmul.msk.f32.vlgmr.msra.gmra.mxu2 %vm443_vm6, %v963_v29 }
 0x46d   :  { %2371 = vmatpush.xpose.msk.msra.mxu2 %vm269_vm3, %v3094_v11 }
 0x474   :  { %2364 = vmatmul.msk.f32.vlgmr.msrb.gmra.mxu2 %vm269_vm3, %v3056_v55 }
 0x475   :  { %2379 = vmatpush.xpose.msk.msrb.mxu2 %vm269_vm3, %v3094_v11  ;;  %v843_v11 = vpop.xlane.xlu1 %842 }
 0x476   :  { %v844_v51 = vsub.f32 %v3178_v46, %v843_v11 }
 0x478   :  { %v845_v37 = vmul.f32 1.442695, %v844_v51 }
 0x47a   :  { %2468 = vpow2.f32 %v845_v37 }
 0x47c   :  { %2372 = vmatmul.msk.f32.vlgmr.msra.gmra.mxu2 %vm269_vm3, %v3059_v56  ;;  %v2465_v56 = vpop.eup %2464 }
 0x47d   :  { %v400_v30 = vsel %vm393_vm5, %v2465_v56, 0.0  ;;  %v1052_v57 = vpop.xlane.xlu1 %1051  ;;  %v2467_v59 = vpop.eup %2466 }
 0x47e   :  { %v1053_v40 = vsub.f32 %v3182_v48, %v1052_v57  ;;  %v1340_v57 = vrot.slane %v3111_v28, 5 }
 0x480   :  { %v1054_v62 = vmul.f32 1.442695, %v1053_v40  ;;  %v3254_v58 = vpop.eup %2468 }
 0x481   :  { %v847_v1 = vsel %vm393_vm5, %v3254_v58, 0.0 }
 0x484   :  { %2380 = vmatmul.msk.f32.vlgmr.msrb.gmra.mxu2 %vm269_vm3, %v3091_v10  ;;  %v716_v10 = vsub.f32 %v3170_v41, %v715_v49  ;;  %v591_v41 = vsel %vm393_vm5, %v2467_v59, 0.0 }
 0x485   :  { %v1190_v7 = vpop.xlane.xlu1 %1189 }
 0x486   :  { %v717_v35 = vmul.f32 1.442695, %v716_v10  ;;  %v1191_v54 = vsub.f32 %v3186_v50, %v1190_v7 }
 0x488   :  { %2470 = vpow2.f32 %v717_v35  ;;  %v1192_v12 = vmul.f32 1.442695, %v1191_v54 }
 0x489   :  { %2472 = vpow2.f32 %v1054_v62  ;;  %v1409_v62 = vrot.slane %v3115_v31, 5 }
 0x48d   :  { %v1328_v13 = vpop.xlane.xlu1 %1327 }
 0x48e   :  { %v2471_v63 = vpop.eup %2470  ;;  %v1329_v18 = vsub.f32 %v3190_v52, %v1328_v13 }
 0x48f   :  { %v719_v0 = vsel %vm393_vm5, %v2471_v63, 0.0  ;;  %v3259_v48 = vpop.eup %2472 }
 0x490   :  { %v1056_v3 = vsel %vm393_vm5, %v3259_v48, 0.0  ;;  %v1330_v22 = vmul.f32 1.442695, %v1329_v18  ;;  %v1597_v18 = vld [vmem:[%s3860_s2 + $0x4e0] sm:$0xff] }
 0x495   :  { %v922_v37 = vpop.xlane.xlu1 %921 }
 0x4ef   :  { %v3243_v24 = vpop.f32.mrf.mxu2 }
 0x4f7   :  { %v1116_v23 = vpop.f32.mrf.mxu2 }
 0x4f8   :  { %v1119_v55 = vsel %vm393_vm5, %v1116_v23, -inf }
 0x4f9   :  { %1120 = vmax.xlane.f32.xlu0 %v1119_v55 }
 0x4ff   :  { %v1254_v42 = vpop.f32.mrf.mxu2 }
 0x500   :  { %v1257_v53 = vsel %vm393_vm5, %v1254_v42, -inf }
 0x501   :  { %1258 = vmax.xlane.f32.xlu2 %v1257_v53  ;;  %401 = vadd.xlane.f32.xlu0 %v400_v30 }
 0x507   :  { %v1392_v60 = vpop.f32.mrf.mxu2 }
 0x508   :  { %v1395_v46 = vsel %vm393_vm5, %v1392_v60, -inf }
 0x509   :  { %1396 = vmax.xlane.f32.xlu2 %v1395_v46  ;;  %592 = vadd.xlane.f32.xlu0 %v591_v41  ;;  %v1339_v46 = vrot.slane %v3075_v4, 5 }
 0x50b   :  { %v1341_v41 = vsel %vm882_vm4, %v1339_v46, %v1340_v57  ;;  %v1639_v57 = vld [vmem:[%s3860_s2 + $0x530] sm:$0xff] }
 0x511   :  { %720 = vadd.xlane.f32.xlu2 %v719_v0  ;;  %848 = vadd.xlane.f32.xlu0 %v847_v1 }
 0x519   :  { %1057 = vadd.xlane.f32.xlu0 %v1056_v3 }
 0x56c   :  { %v1121_v8 = vpop.xlane.xlu0 %1120 }
 0x56d   :  { %v1122_v25 = vsub.f32 %v1116_v23, %v1121_v8 }
 0x56f   :  { %v1123_v33 = vmul.f32 1.442695, %v1122_v25  ;;  %v1600_v25 = vld [vmem:[%s3860_s2 + $0x4f8] sm:$0xff] }
 0x571   :  { %2474 = vpow2.f32 %v1123_v33 }
 0x574   :  { %v1259_v14 = vpop.xlane.xlu2 %1258  ;;  %v402_v15 = vpop.xlane.xlu0 %401 }
 0x575   :  { %v1260_v16 = vsub.f32 %v1254_v42, %v1259_v14  ;;  %2476 = vrcp.f32 %v402_v15  ;;  %v1599_v14 = vld [vmem:[%s3860_s2 + $0x4f0] sm:$0xff] }
 0x576   :  { %2478 = vpow2.f32 %v1192_v12 }
 0x577   :  { %v3264_v17 = vpop.eup %2474  ;;  %v1261_v19 = vmul.f32 1.442695, %v1260_v16 }
 0x578   :  { %v1125_v20 = vsel %vm393_vm5, %v3264_v17, 0.0 }
 0x579   :  { %2480 = vpow2.f32 %v1261_v19  ;;  %1126 = vadd.xlane.f32.xlu2 %v1125_v20  ;;  %v1596_v19 = vld [vmem:[%s3860_s2 + $0x4d8] sm:$0xff] }
 0x57b   :  { %v2477_v50 = vpop.eup %2476 }
 0x57c   :  { %v404_v26 = vmul.f32 %v2477_v50, %v2465_v56  ;;  %v1397_v27 = vpop.xlane.xlu2 %1396  ;;  %v593_v29 = vpop.xlane.xlu0 %592  ;;  %v1448_v50 = vld [vmem:[%s3860_s2 + $0x420] sm:$0xff] }
 0x57d   :  { %v3269_v32 = vpop.eup %2478  ;;  %v1398_v34 = vsub.f32 %v1392_v60, %v1397_v27  ;;  %2482 = vrcp.f32 %v593_v29  ;;  %1464 = vmatpush.msra.mxu0 %v1448_v50  ;;  %v1447_v27 = vld [vmem:[%s3860_s2 + $0x418] sm:$0xff]  ;;  %v1592_v29 = vld [vmem:[%s3859_s1] sm:$0xff] }
 0x57e   :  { %2326 = vmatmul.msk.f32.vlgmr.msrb.gmra.mxu3 %vm443_vm6, %v404_v26  ;;  %2484 = vpow2.f32 %v1330_v22  ;;  %v1194_v23 = vsel %vm393_vm5, %v3269_v32, 0.0  ;;  %v1595_v22 = vld [vmem:[%s3860_s2 + $0x4d0] sm:$0xff]  ;;  %v1594_v26 = vld [vmem:[%s3860_s2 + $0x4c8] sm:$0xff] }
 0x57f   :  { %v3272_v39 = vpop.eup %2480  ;;  %v1399_v52 = vmul.f32 1.442695, %v1398_v34  ;;  %2341 = vmatpush.msk.msrb.mxu3 %vm255_vm1, %v3078_v6  ;;  %1465 = vmatpush.msra.mxu0 %v1447_v27  ;;  %v1445_v34 = vld [vmem:[%s3860_s2 + $0x408] sm:$0xff]  ;;  %v1524_v27 = vld [vmem:[%s3860_s2 + $0x4a0] sm:$0xff] }
 0x580   :  { %v1263_v43 = vsel %vm393_vm5, %v3272_v39, 0.0 }
 0x581   :  { %2486 = vpow2.f32 %v1399_v52  ;;  %1264 = vadd.xlane.f32.xlu1 %v1263_v43  ;;  %1195 = vadd.xlane.f32.xlu2 %v1194_v23  ;;  %v1444_v52 = vld [vmem:[%s3860_s2 + $0x400] sm:$0xff]  ;;  %v1443_v43 = vld [vmem:[%s3860_s2 + $0x3f8] sm:$0xff]  ;;  %v1442_v23 = vld [vmem:[%s3860_s2 + $0x3f0] sm:$0xff] }
 0x583   :  { %v2483_v55 = vpop.eup %2482 }
 0x584   :  { %v595_v11 = vmul.f32 %v2483_v55, %v2467_v59  ;;  %v721_v47 = vpop.xlane.xlu2 %720  ;;  %v849_v49 = vpop.xlane.xlu0 %848  ;;  %v1593_v55 = vld [vmem:[%s3859_s1 + $0x8] sm:$0xff] }
 0x585   :  { %v2485_v56 = vpop.eup %2484  ;;  %2488 = vrcp.f32 %v721_v47  ;;  %v1441_v47 = vld [vmem:[%s3860_s2 + $0x3e8] sm:$0xff] }
 0x586   :  { %2334 = vmatmul.msk.f32.vlgmr.msra.gmra.mxu3 %vm443_vm6, %v595_v11  ;;  %v1332_v10 = vsel %vm393_vm5, %v2485_v56, 0.0  ;;  %2490 = vrcp.f32 %v849_v49 }
 0x587   :  { %v2487_v51 = vpop.eup %2486  ;;  %2349 = vmatpush.msk.msra.mxu3 %vm255_vm1, %v3086_v9 }
 0x588   :  { %v1401_v6 = vsel %vm393_vm5, %v2487_v51, 0.0 }
 0x589   :  { %1402 = vadd.xlane.f32.xlu0 %v1401_v6  ;;  %1333 = vadd.xlane.f32.xlu1 %v1332_v10 }
 0x58b   :  { %v2489_v42 = vpop.eup %2488 }
 0x58c   :  { %v723_v53 = vmul.f32 %v2489_v42, %v2471_v63  ;;  %v1058_v30 = vpop.xlane.xlu0 %1057  ;;  %v2491_v35 = vpop.eup %2490  ;;  %v1486_v42 = vld [vmem:[%s3860_s2 + $0x470] sm:$0xff] }
 0x58d   :  { %2492 = vrcp.f32 %v1058_v30  ;;  %v851_v40 = vmul.f32 %v2491_v35, %v3254_v58  ;;  %v1640_v30 = vld [vmem:[%s3860_s2 + $0x538] sm:$0xff] }
 0x58e   :  { %2342 = vmatmul.msk.f32.vlgmr.msrb.gmra.mxu3 %vm443_vm6, %v723_v53  ;;  %2494 = vrcp.f32 %v922_v37  ;;  %v1485_v53 = vld [vmem:[%s3860_s2 + $0x468] sm:$0xff] }
 0x58f   :  { %2357 = vmatpush.msk.msrb.mxu3 %vm255_vm1, %v3127_v38 }
 0x593   :  { %v2493_v59 = vpop.eup %2492 }
 0x594   :  { %v1060_v60 = vmul.f32 %v2493_v59, %v3259_v48  ;;  %v2495_v28 = vpop.eup %2494 }
 0x595   :  { %v924_v38 = vmul.f32 %v2495_v28, %v3227_v21 }
 0x596   :  { %2350 = vmatmul.msk.f32.vlgmr.msra.gmra.mxu3 %vm443_vm6, %v851_v40  ;;  %2362 = vmatmul.msk.f32.vlgmr.msrb.gmra.mxu1 %vm443_vm6, %v1060_v60  ;;  %v1638_v40 = vld [vmem:[%s3860_s2 + $0x528] sm:$0xff] }
 0x597   :  { %2365 = vmatpush.msk.msra.mxu3 %vm255_vm1, %v3133_v44  ;;  %2377 = vmatpush.msk.msrb.mxu1 %vm255_vm1, %v1341_v41  ;;  %v1408_v44 = vrot.slane %v3086_v9, 5  ;;  %v1601_v9 = vld [vmem:[%s3860_s2 + $0x500] sm:$0xff] }
 0x599   :  { %v1410_v21 = vsel %vm882_vm4, %v1408_v44, %v1409_v62 }
 0x59e   :  { %2358 = vmatmul.msk.f32.vlgmr.msrb.gmra.mxu3 %vm443_vm6, %v924_v38 }
 0x59f   :  { %2373 = vmatpush.msk.msrb.mxu3 %vm255_vm1, %v3136_v45 }
 0x5ec   :  { %v1127_v4 = vpop.xlane.xlu2 %1126 }
 0x5ed   :  { %2496 = vrcp.f32 %v1127_v4 }
 0x5f3   :  { %v2497_v58 = vpop.eup %2496 }
 0x5f4   :  { %v1129_v63 = vmul.f32 %v2497_v58, %v3264_v17  ;;  %v1196_v0 = vpop.xlane.xlu2 %1195  ;;  %v1265_v1 = vpop.xlane.xlu1 %1264  ;;  %v1598_v17 = vld [vmem:[%s3860_s2 + $0x4e8] sm:$0xff] }
 0x5f5   :  { %2498 = vrcp.f32 %v1196_v0 }
 0x5f6   :  { %2500 = vrcp.f32 %v1265_v1  ;;  %2366 = vmatmul.msk.f32.vlgmr.msra.gmra.mxu3 %vm443_vm6, %v1129_v63 }
 0x5f7   :  { %2381 = vmatpush.msk.msra.mxu3 %vm255_vm1, %v1410_v21 }
 0x5fb   :  { %v2499_v45 = vpop.eup %2498 }
 0x5fc   :  { %v2501_v48 = vpop.eup %2500  ;;  %v1198_v3 = vmul.f32 %v2499_v45, %v3269_v32  ;;  %v1403_v31 = vpop.xlane.xlu0 %1402  ;;  %v1446_v32 = vld [vmem:[%s3860_s2 + $0x410] sm:$0xff] }
 0x5fd   :  { %v1334_v7 = vpop.xlane.xlu1 %1333  ;;  %v1267_v8 = vmul.f32 %v2501_v48, %v3272_v39  ;;  %2502 = vrcp.f32 %v1403_v31  ;;  %1466 = vmatpush.msra.mxu0 %v1446_v32  ;;  %v1483_v48 = vld [vmem:[%s3860_s2 + $0x458] sm:$0xff]  ;;  %v1635_v31 = vld [vmem:[%s3860_s2 + $0x510] sm:$0xff] }
 0x5fe   :  { %2504 = vrcp.f32 %v1334_v7  ;;  %2370 = vmatmul.msk.f32.vlgmr.msra.gmra.mxu1 %vm443_vm6, %v1198_v3  ;;  %v1482_v3 = vld [vmem:[%s3860_s2 + $0x450] sm:$0xff]  ;;  %v1481_v7 = vld [vmem:[%s3860_s2 + $0x448] sm:$0xff] }
 0x5ff   :  { %2374 = vmatmul.msk.f32.vlgmr.msrb.gmra.mxu3 %vm443_vm6, %v1267_v8  ;;  %1467 = vmatpush.msra.mxu0 %v1445_v34  ;;  %v2433_v8 = vld [vmem:[%s3860_s2 + $0x508] ss:$0 sm:$0xff]  ;;  %v2435_v32 = vld [vmem:[%s3860_s2 + $0x550] ss:$0 sm:$0xff] }
 0x600   :  { %1618 = vmatpush.msrb.mxu3 %v1601_v9  ;;  %1503 = vmatpush.msra.mxu1 %v1486_v42 }
 0x601   :  { %v493_v15 = vpop.f32.mrf.mxu3  ;;  %1468 = vmatpush.msra.mxu0 %v1444_v52  ;;  %v1522_v52 = vld [vmem:[%s3860_s2 + $0x490] sm:$0xff] }
 0x602   :  { %1619 = vmatpush.msrb.mxu3 %v1600_v25  ;;  %v494_v37 = vadd.f32 %v493_v15, %v3210_v2  ;;  %1504 = vmatpush.msra.mxu1 %v1485_v53  ;;  %v1527_v15 = vld [vmem:[%s3860_s2 + $0x4b8] sm:$0xff] }
 0x603   :  { %v2503_v54 = vpop.eup %2502  ;;  %1469 = vmatpush.msra.mxu0 %v1443_v43  ;;  %1544 = vmatpush.msra.mxu2 %v1527_v15 }
 0x604   :  { %v2505_v33 = vpop.eup %2504  ;;  %v1405_v12 = vmul.f32 %v2503_v54, %v2487_v51  ;;  %1620 = vmatpush.msrb.mxu3 %v1599_v14  ;;  %v1641_v51 = vld [vmem:[%s3860_s2 + $0x540] sm:$0xff]  ;;  %v559_v2 = vadd.f32 %v3212_v36, %v494_v37 }
 0x605   :  { %v1336_v13 = vmul.f32 %v2505_v33, %v2485_v56  ;;  %1470 = vmatpush.msra.mxu0 %v1442_v23  ;;  %v1642_v56 = vld [vmem:[%s3860_s2 + $0x548] sm:$0xff]  ;;  %v1480_v33 = vld [vmem:[%s3860_s2 + $0x440] sm:$0xff] }
 0x606   :  { %1621 = vmatpush.msrb.mxu3 %v1598_v17  ;;  %v1521_v23 = vld [vmem:[%s3860_s2 + $0x488] sm:$0xff] }
 0x607   :  { %2378 = vmatmul.msk.f32.vlgmr.msrb.gmra.mxu1 %vm443_vm6, %v1336_v13  ;;  %2382 = vmatmul.msk.f32.vlgmr.msra.gmra.mxu3 %vm443_vm6, %v1405_v12  ;;  %v1479_v12 = vld [vmem:[%s3860_s2 + $0x438] sm:$0xff] }
 0x608   :  { %1622 = vmatpush.msrb.mxu3 %v1597_v18  ;;  %1471 = vmatpush.msra.mxu0 %v1441_v47  ;;  %v1525_v18 = vld [vmem:[%s3860_s2 + $0x4a8] sm:$0xff] }
 0x609   :  { %v620_v16 = vpop.f32.mrf.mxu3 }
 0x60a   :  { %1623 = vmatpush.msrb.mxu3 %v1596_v19  ;;  %1659 = vmatpush.msrb.mxu0 %v1642_v56  ;;  %v623_v46 = vadd.f32 %v620_v16, %v559_v2  ;;  %v1526_v16 = vld [vmem:[%s3860_s2 + $0x4b0] sm:$0xff]  ;;  %v2434_v19 = vld [vmem:[%s3860_s2 + $0x428] ss:$0 sm:$0xff] }
 0x60b   :  { %1545 = vmatpush.msra.mxu2 %v1526_v16  ;;  %v1716_v16 = vld [vmem:[%s3860_s2 + $0x558] sm:$0xff] }
 0x60c   :  { %1624 = vmatpush.msrb.mxu3 %v1595_v22  ;;  %1660 = vmatpush.msrb.mxu0 %v1641_v51  ;;  %v687_v38 = vadd.f32 %v3214_v61, %v623_v46  ;;  %v1637_v61 = vld [vmem:[%s3860_s2 + $0x520] sm:$0xff] }
 0x60d   :  { %1546 = vmatpush.msra.mxu2 %v1525_v18  ;;  %v1805_v18 = vld [vmem:[%s3860_s2 + $0x5d8] sm:$0xff] }
 0x60e   :  { %1625 = vmatpush.msrb.mxu3 %v1594_v26  ;;  %1661 = vmatpush.msrb.mxu0 %v1640_v30 }
 0x60f   :  { %2389 = vmatmul.msk.f32.vlgmr.msrb.gmra.mxu3 %vm269_vm3, %v1592_v29  ;;  %v1523_v29 = vld [vmem:[%s3860_s2 + $0x498] sm:$0xff]  ;;  %1547 = vmatpush.msra.mxu2 %v1524_v27 }
 0x610   :  { %1662 = vmatpush.msrb.mxu0 %v1639_v57 }
 0x611   :  { %v748_v20 = vpop.f32.mrf.mxu3  ;;  %1548 = vmatpush.msra.mxu2 %v1523_v29 }
 0x612   :  { %1663 = vmatpush.msrb.mxu0 %v1638_v40  ;;  %v751_v58 = vadd.f32 %v748_v20, %v687_v38 }
 0x613   :  { %v1088_v49 = vpop.f32.mrf.mxu1  ;;  %1549 = vmatpush.msra.mxu2 %v1522_v52 }
 0x614   :  { %v815_v1 = vadd.f32 %v3216_v5, %v751_v58  ;;  %v1636_v5 = vld [vmem:[%s3860_s2 + $0x518] sm:$0xff]  ;;  %1664 = vmatpush.msrb.mxu0 %v1637_v61  ;;  %v1773_v58 = vld [vmem:[%s3860_s2 + $0x5d0] sm:$0xff] }
 0x615   :  { %1550 = vmatpush.msra.mxu2 %v1521_v23  ;;  %v1720_v61 = vld [vmem:[%s3860_s2 + $0x578] sm:$0xff] }
 0x616   :  { %1665 = vmatpush.msrb.mxu0 %v1636_v5  ;;  %v1809_v5 = vld [vmem:[%s3860_s2 + $0x5f8] sm:$0xff] }
 0x617   :  { %2390 = vmatmul.msk.f32.gmra.mxu3 %vm269_vm3, %v1593_v55 }
 0x618   :  { %1666 = vmatpush.msrb.mxu0 %v1635_v31  ;;  %v1769_v31 = vld [vmem:[%s3860_s2 + $0x5b0] sm:$0xff] }
 0x619   :  { %v876_v39 = vpop.f32.mrf.mxu3 }
 0x61a   :  { %v879_v21 = vadd.f32 %v876_v39, %v815_v1  ;;  %v1772_v1 = vld [vmem:[%s3860_s2 + $0x5c8] sm:$0xff] }
 0x621   :  { %v1020_v11 = vpop.f32.mrf.mxu3 }
 0x622   :  { %v1021_v6 = vadd.f32 %v1020_v11, %v3243_v24  ;;  %v1484_v24 = vld [vmem:[%s3860_s2 + $0x460] sm:$0xff] }
 0x623   :  { %1505 = vmatpush.msra.mxu1 %v1484_v24  ;;  %v1520_v11 = vld [vmem:[%s3860_s2 + $0x480] sm:$0xff] }
 0x624   :  { %v1091_v59 = vadd.f32 %v1088_v49, %v1021_v6  ;;  %1551 = vmatpush.msra.mxu2 %v1520_v11  ;;  %v2436_v6 = vld [vmem:[%s3860_s2 + $0x478] ss:$0 sm:$0xff] }
 0x625   :  { %1506 = vmatpush.msra.mxu1 %v1483_v48  ;;  %v1770_v48 = vld [vmem:[%s3860_s2 + $0x5b8] sm:$0xff] }
 0x626   :  { %1784 = vmatpush.msrb.mxu2 %v1773_v58 }
 0x627   :  { %1507 = vmatpush.msra.mxu1 %v1482_v3  ;;  %v1719_v3 = vld [vmem:[%s3860_s2 + $0x570] sm:$0xff] }
 0x628   :  { %1785 = vmatpush.msrb.mxu2 %v1772_v1 }
 0x629   :  { %1508 = vmatpush.msra.mxu1 %v1481_v7  ;;  %v1808_v7 = vld [vmem:[%s3860_s2 + $0x5f0] sm:$0xff] }
 0x62b   :  { %1509 = vmatpush.msra.mxu1 %v1480_v33  ;;  %v1717_v33 = vld [vmem:[%s3860_s2 + $0x560] sm:$0xff] }
 0x62d   :  { %1510 = vmatpush.msra.mxu1 %v1479_v12  ;;  %v1767_v12 = vld [vmem:[%s3860_s2 + $0x5a0] sm:$0xff] }
 0x679   :  { %v1157_v10 = vpop.f32.mrf.mxu3 }
 0x67a   :  { %v1160_v60 = vadd.f32 %v1157_v10, %v1091_v59 }
 0x67b   :  { %v1226_v35 = vpop.f32.mrf.mxu1 }
 0x67c   :  { %v1229_v28 = vadd.f32 %v1226_v35, %v1160_v60  ;;  %v2437_v35 = vld [vmem:[%s3860_s2 + $0x4c0] ss:$0 sm:$0xff] }
 0x682   :  { %v1295_v41 = vpop.f32.mrf.mxu3 }
 0x683   :  { %v1298_v4 = vadd.f32 %v1295_v41, %v1229_v28 }
 0x684   :  { %v1364_v62 = vpop.f32.mrf.mxu1 }
 0x685   :  { %v1367_v63 = vadd.f32 %v1364_v62, %v1298_v4  ;;  %v1723_v62 = vld [vmem:[%s3860_s2 + $0x590] sm:$0xff] }
 0x686   :  { %1745 = vmatpush.msrb.mxu1 %v1723_v62 }
 0x68a   :  { %v1433_v0 = vpop.f32.mrf.mxu3 }
 0x68b   :  { %v1436_v44 = vadd.f32 %v1433_v0, %v1367_v63  ;;  %v1812_v63 = vld [vmem:[%s3860_s2 + $0x610] sm:$0xff]  ;;  %v1722_v0 = vld [vmem:[%s3860_s2 + $0x588] sm:$0xff] }
 0x68c   :  { %1823 = vmatpush.msra.mxu3 %v1812_v63  ;;  %1746 = vmatpush.msrb.mxu1 %v1722_v0 }
 0x68d   :  { %v1438_v45 = vrot.slane %v1436_v44, 3  ;;  %v1811_v44 = vld [vmem:[%s3860_s2 + $0x608] sm:$0xff] }
 0x68e   :  { %1824 = vmatpush.msra.mxu3 %v1811_v44 }
 0x68f   :  { %v1440_v36 = vsel %vm255_vm1, %v879_v21, %v1438_v45  ;;  %v1721_v21 = vld [vmem:[%s3860_s2 + $0x580] sm:$0xff] }
 0x690   :  { %2383 = vmatmul.msk.f32.vlgmr.msra.gmra.mxu0 %vm269_vm3, %v1440_v36  ;;  %v1810_v36 = vld [vmem:[%s3860_s2 + $0x600] sm:$0xff]  ;;  %1747 = vmatpush.msrb.mxu1 %v1721_v21 }
 0x691   :  { %1825 = vmatpush.msra.mxu3 %v1810_v36  ;;  %v3618_v36 = vld [vmem:[%s3860_s2 + $0x688] sm:$0xff] }
 0x692   :  { %v1627_v9 = vpop.f32.mrf.mxu3  ;;  %1748 = vmatpush.msrb.mxu1 %v1720_v61  ;;  %v3624_v61 = vld [vmem:[%s3860_s2 + $0x680] sm:$0xff] }
 0x693   :  { %v1628_v25 = vadd.f32 %v2433_v8, %v1627_v9  ;;  %1826 = vmatpush.msra.mxu3 %v1809_v5  ;;  %v1718_v9 = vld [vmem:[%s3860_s2 + $0x568] sm:$0xff] }
 0x694   :  { %1749 = vmatpush.msrb.mxu1 %v1719_v3  ;;  %v2438_v3 = vld [vmem:[%s3860_s2 + $0x618] ss:$0 sm:$0xff] }
 0x695   :  { %v1633_v54 = vmax.f32 %v1628_v25, 0.0  ;;  %1827 = vmatpush.msra.mxu3 %v1808_v7  ;;  %v1768_v25 = vld [vmem:[%s3860_s2 + $0x5a8] sm:$0xff] }
 0x696   :  { %1750 = vmatpush.msrb.mxu1 %v1718_v9 }
 0x698   :  { %2384 = vmatmul.msk.f32.gmra.mxu0 %vm269_vm3, %v1438_v45  ;;  %v1771_v45 = vld [vmem:[%s3860_s2 + $0x5c0] sm:$0xff]  ;;  %1751 = vmatpush.msrb.mxu1 %v1717_v33 }
 0x699   :  { %1786 = vmatpush.msrb.mxu2 %v1771_v45  ;;  %v3611_v45 = vld [vmem:[%s3860_s2 + $0x690] sm:$0xff] }
 0x69a   :  { %v1630_v13 = vpop.f32.mrf.mxu3  ;;  %1752 = vmatpush.msrb.mxu1 %v1716_v16 }
 0x69b   :  { %v1631_v14 = vadd.f32 %v2433_v8, %v1630_v13  ;;  %1787 = vmatpush.msrb.mxu2 %v1770_v48  ;;  %v1806_v13 = vld [vmem:[%s3860_s2 + $0x5e0] sm:$0xff]  ;;  %v3630_v48 = vld [vmem:[%s3860_s2 + $0x678] sm:$0xff] }
 0x69d   :  { %v1634_v17 = vmax.f32 %v1631_v14, 0.0  ;;  %1788 = vmatpush.msrb.mxu2 %v1769_v31  ;;  %v2439_v31 = vld [vmem:[%s3860_s2 + $0x620] ss:$0 sm:$0xff] }
 0x69f   :  { %1789 = vmatpush.msrb.mxu2 %v1768_v25 }
 0x6a0   :  { %2391 = vmatmul.msk.f32.vlgmr.msrb.gmra.mxu0 %vm269_vm3, %v1633_v54  ;;  %v1807_v54 = vld [vmem:[%s3860_s2 + $0x5e8] sm:$0xff] }
 0x6a1   :  { %1828 = vmatpush.msra.mxu3 %v1807_v54  ;;  %1790 = vmatpush.msrb.mxu2 %v1767_v12 }
 0x6a3   :  { %1829 = vmatpush.msra.mxu3 %v1806_v13 }
 0x6a5   :  { %1830 = vmatpush.msra.mxu3 %v1805_v18 }
 0x6a8   :  { %2392 = vmatmul.msk.f32.gmra.mxu0 %vm269_vm3, %v1634_v17  ;;  %v1766_v17 = vld [vmem:[%s3860_s2 + $0x598] sm:$0xff] }
 0x6a9   :  { %1791 = vmatpush.msrb.mxu2 %v1766_v17 }
 0x70d   :  { %v1473_v20 = vpop.f32.mrf.mxu0 }
 0x70e   :  { %v1474_v50 = vadd.f32 %v2434_v19, %v1473_v20 }
 0x710   :  { %2385 = vmatmul.msk.f32.vlgmr.msra.gmra.mxu1 %vm269_vm3, %v1474_v50 }
 0x715   :  { %v1476_v22 = vpop.f32.mrf.mxu0 }
 0x716   :  { %v1477_v26 = vadd.f32 %v2434_v19, %v1476_v22 }
 0x718   :  { %2386 = vmatmul.msk.f32.gmra.mxu1 %vm269_vm3, %v1477_v26 }
 0x71d   :  { %v1668_v34 = vpop.f32.mrf.mxu0 }
 0x71e   :  { %v3454_v39 = vadd.f32 %v2435_v32, %v1668_v34 }
 0x720   :  { %v1674_v43 = vmul.f32 %v3454_v39, %v3454_v39 }
 0x722   :  { %v1676_v55 = vsel %vm269_vm3, %v1674_v43, 0.0 }
 0x723   :  { %1677 = vadd.xlane.f32.xlu2 %v1676_v55 }
 0x725   :  { %v1671_v47 = vpop.f32.mrf.mxu0 }
 0x726   :  { %v3468_v49 = vadd.f32 %v2435_v32, %v1671_v47 }
 0x728   :  { %v1675_v56 = vmul.f32 %v3468_v49, %v3468_v49 }
 0x72a   :  { %v1679_v51 = vsel %vm269_vm3, %v1675_v56, 0.0 }
 0x72b   :  { %1680 = vadd.xlane.f32.xlu1 %v1679_v51 }
 0x78d   :  { %v1512_v10 = vpop.f32.mrf.mxu1 }
 0x78e   :  { %v1513_v42 = vadd.f32 %v2436_v6, %v1512_v10 }
 0x790   :  { %v1518_v53 = vmax.f32 %v1513_v42, 0.0 }
 0x792   :  { %2387 = vmatmul.msk.f32.vlgmr.msra.gmra.mxu2 %vm269_vm3, %v1518_v53  ;;  %v3571_v53 = vld [vmem:[%s3860_s2 + $0x6b0] sm:$0xff] }
 0x793   :  { %1889 = vmatpush.msra.mxu0 %v3571_v53 }
 0x795   :  { %v1515_v30 = vpop.f32.mrf.mxu1 }
 0x796   :  { %v1516_v37 = vadd.f32 %v2436_v6, %v1515_v30  ;;  %v1678_v38 = vpop.xlane.xlu2 %1677  ;;  %v3576_v30 = vld [vmem:[%s3860_s2 + $0x6a8] sm:$0xff] }
 0x797   :  { %v3490_v4 = vmax.f32 %v1678_v38, 1e-24  ;;  %1890 = vmatpush.msra.mxu0 %v3576_v30 }
 0x798   :  { %v1519_v24 = vmax.f32 %v1516_v37, 0.0 }
 0x799   :  { %2506 = vrsqrt.f32 %v3490_v4  ;;  %vm1690_vm8 = vweird.f32 %v3490_v4 }
 0x79a   :  { %2388 = vmatmul.msk.f32.gmra.mxu2 %vm269_vm3, %v1519_v24 }
 0x79e   :  { %v1681_v15 = vpop.xlane.xlu1 %1680 }
 0x79f   :  { %v2507_v8 = vpop.eup %2506  ;;  %v1683_v19 = vmax.f32 %v1681_v15, 1e-24 }
 0x7a0   :  { %v1685_v14 = vmul.f32 %v2507_v8, %v3490_v4  ;;  %vm1691_vm9 = vweird.f32 %v2507_v8 }
 0x7a1   :  { %2508 = vrsqrt.f32 %v1683_v19  ;;  %vm1692_vm10 = vmor %vm1690_vm8, %vm1691_vm9  ;;  %vm1700_vm14 = vweird.f32 %v1683_v19  ;;  %vm1714_vm8 = vcmask 1041408  }
 0x7a2   :  { %v1686_v20 = vmul.f32 %v2507_v8, %v1685_v14 }
 0x7a4   :  { %v1687_v26 = vmul.f32 0.5, %v1686_v20 }
 0x7a6   :  { %v1688_v27 = vsub.f32 1.5, %v1687_v26 }
 0x7a7   :  { %v2509_v29 = vpop.eup %2508 }
 0x7a8   :  { %v1689_v43 = vmul.f32 %v2507_v8, %v1688_v27  ;;  %v1695_v23 = vmul.f32 %v2509_v29, %v1683_v19  ;;  %vm1701_vm15 = vweird.f32 %v2509_v29 }
 0x7a9   :  { %vm1702_vm2 = vmor %vm1700_vm14, %vm1701_vm15 }
 0x7aa   :  { %v1693_v47 = vsel %vm1692_vm10, %v2507_v8, %v1689_v43  ;;  %v1696_v56 = vmul.f32 %v2509_v29, %v1695_v23 }
 0x7ab   :  { %v1704_v42 = vmul.f32 %v1693_v47, %v3454_v39 }
 0x7ac   :  { %v1697_v37 = vmul.f32 0.5, %v1696_v56 }
 0x7ad   :  { %v1707_v39 = vrot.slane %v1704_v42, 3 }
 0x815   :  { %v1553_v57 = vpop.f32.mrf.mxu2 }
 0x816   :  { %v3481_v59 = vadd.f32 %v2437_v35, %v1553_v57 }
 0x818   :  { %v1559_v40 = vmul.f32 %v3481_v59, %v3481_v59 }
 0x81a   :  { %v1561_v2 = vsel %vm269_vm3, %v1559_v40, 0.0 }
 0x81b   :  { %1562 = vadd.xlane.f32.xlu0 %v1561_v2 }
 0x81d   :  { %v1556_v60 = vpop.f32.mrf.mxu2 }
 0x81e   :  { %v3486_v46 = vadd.f32 %v2437_v35, %v1556_v60  ;;  %v1698_v60 = vsub.f32 1.5, %v1697_v37 }
 0x820   :  { %v1560_v41 = vmul.f32 %v3486_v46, %v3486_v46  ;;  %v1699_v4 = vmul.f32 %v2509_v29, %v1698_v60 }
 0x822   :  { %v1565_v28 = vsel %vm1564_vm7, %v1560_v41, 0.0  ;;  %v1703_v58 = vsel %vm1702_vm2, %v2509_v29, %v1699_v4  ;;  %v3681_v4 = vld [vmem:[%s3860_s2 + $0x6e8] sm:$0xff] }
 0x823   :  { %1566 = vadd.xlane.f32.xlu2 %v1565_v28  ;;  %v1705_v0 = vmul.f32 %v1703_v58, %v3468_v49  ;;  %v3600_v49 = vld [vmem:[%s3860_s2 + $0x6a0] sm:$0xff]  ;;  %v3693_v58 = vld [vmem:[%s3860_s2 + $0x6d8] sm:$0xff] }
 0x824   :  { %1891 = vmatpush.msra.mxu0 %v3600_v49 }
 0x825   :  { %v1710_v44 = vrot.slane %v1705_v0, 6  ;;  %v3705_v0 = vld [vmem:[%s3860_s2 + $0x6c8] sm:$0xff] }
 0x88e   :  { %v1563_v50 = vpop.xlane.xlu0 %1562 }
 0x88f   :  { %v1568_v22 = vmax.f32 %v1563_v50, 1e-24 }
 0x891   :  { %2510 = vrsqrt.f32 %v1568_v22  ;;  %vm1576_vm12 = vweird.f32 %v1568_v22 }
 0x896   :  { %v1567_v32 = vpop.xlane.xlu2 %1566 }
 0x897   :  { %v2511_v34 = vpop.eup %2510  ;;  %v1569_v52 = vmax.f32 %v1567_v32, 1e-24 }
 0x898   :  { %v1571_v55 = vmul.f32 %v2511_v34, %v1568_v22  ;;  %vm1577_vm11 = vweird.f32 %v2511_v34 }
 0x899   :  { %2512 = vrsqrt.f32 %v1569_v52  ;;  %vm1578_vm13 = vmor %vm1576_vm12, %vm1577_vm11  ;;  %vm1586_vm6 = vweird.f32 %v1569_v52 }
 0x89a   :  { %v1572_v11 = vmul.f32 %v2511_v34, %v1571_v55 }
 0x89c   :  { %v1573_v51 = vmul.f32 0.5, %v1572_v11 }
 0x89e   :  { %v1574_v6 = vsub.f32 1.5, %v1573_v51 }
 0x89f   :  { %v2513_v10 = vpop.eup %2512 }
 0x8a0   :  { %v1575_v24 = vmul.f32 %v2511_v34, %v1574_v6  ;;  %v1581_v35 = vmul.f32 %v2513_v10, %v1569_v52  ;;  %vm1587_vm5 = vweird.f32 %v2513_v10 }
 0x8a1   :  { %vm1588_vm7 = vmor %vm1586_vm6, %vm1587_vm5 }
 0x8a2   :  { %v1579_v57 = vsel %vm1578_vm13, %v2511_v34, %v1575_v24  ;;  %v1582_v40 = vmul.f32 %v2513_v10, %v1581_v35 }
 0x8a3   :  { %v1590_v2 = vmul.f32 %v1579_v57, %v3481_v59 }
 0x8a4   :  { %v1583_v41 = vmul.f32 0.5, %v1582_v40 }
 0x8a5   :  { %v1712_v28 = vsel %vm255_vm1, %v1590_v2, %v1707_v39  ;;  %v1713_v59 = vsel %vm255_vm1, %v1707_v39, %v1590_v2 }
 0x8a6   :  { %v1584_v38 = vsub.f32 1.5, %v1583_v41  ;;  %2393 = vmatmul.msk.f32.vlgmr.msrb.gmra.mxu1 %vm269_vm3, %v1712_v28  ;;  %2397 = vmatmul.msk.f32.vlgmr.msrb.gmra.mxu2 %vm269_vm3, %v1712_v28 }
 0x8a7   :  { %2401 = vmatmul.msk.f32.vlgmr.msra.gmra.mxu3 %vm269_vm3, %v1712_v28 }
 0x8a8   :  { %v1585_v62 = vmul.f32 %v2513_v10, %v1584_v38  ;;  %v3675_v38 = vld [vmem:[%s3860_s2 + $0x6f0] sm:$0xff] }
 0x8a9   :  { %1979 = vmatpush.msra.mxu1 %v3675_v38 }
 0x8aa   :  { %v1589_v63 = vsel %vm1588_vm7, %v2513_v10, %v1585_v62  ;;  %v3687_v62 = vld [vmem:[%s3860_s2 + $0x6e0] sm:$0xff] }
 0x8ab   :  { %v1591_v1 = vmul.f32 %v1589_v63, %v3486_v46  ;;  %v3605_v46 = vld [vmem:[%s3860_s2 + $0x698] sm:$0xff]  ;;  %1980 = vmatpush.msra.mxu1 %v3681_v4 }
 0x8ac   :  { %1892 = vmatpush.msra.mxu0 %v3605_v46 }
 0x8ad   :  { %v1715_v21 = vsel %vm1714_vm8, %v1591_v1, %v1710_v44  ;;  %1981 = vmatpush.msra.mxu1 %v3687_v62  ;;  %v3711_v1 = vld [vmem:[%s3860_s2 + $0x6c0] sm:$0xff] }
 0x8ae   :  { %2394 = vmatmul.msk.f32.gmra.mxu1 %vm269_vm3, %v1713_v59  ;;  %2398 = vmatmul.msk.f32.gmra.mxu2 %vm269_vm3, %v1713_v59 }
 0x8af   :  { %2402 = vmatmul.msk.f32.gmra.mxu3 %vm269_vm3, %v1713_v59  ;;  %1893 = vmatpush.msra.mxu0 %v3611_v45  ;;  %v3699_v59 = vld [vmem:[%s3860_s2 + $0x6d0] sm:$0xff] }
 0x8b0   :  { %1982 = vmatpush.msra.mxu1 %v3693_v58 }
 0x8b1   :  { %1894 = vmatpush.msra.mxu0 %v3618_v36 }
 0x8b2   :  { %1983 = vmatpush.msra.mxu1 %v3699_v59 }
 0x8b3   :  { %1895 = vmatpush.msra.mxu0 %v3624_v61 }
 0x8b4   :  { %1984 = vmatpush.msra.mxu1 %v3705_v0 }
 0x8b5   :  { %1896 = vmatpush.msra.mxu0 %v3630_v48 }
 0x8b6   :  { %2395 = vmatmul.msk.f32.gmra.mxu1 %vm269_vm3, %v1715_v21  ;;  %2399 = vmatmul.msk.f32.gmra.mxu2 %vm269_vm3, %v1715_v21 }
 0x8b7   :  { %2403 = vmatmul.msk.f32.gmra.mxu3 %vm269_vm3, %v1715_v21  ;;  %1930 = vmatpush.msrb.mxu0 %v3571_v53 }
 0x8b8   :  { %1985 = vmatpush.msra.mxu1 %v3711_v1 }
 0x8b9   :  { %1931 = vmatpush.msrb.mxu0 %v3576_v30 }
 0x8bb   :  { %1932 = vmatpush.msrb.mxu0 %v3600_v49 }
 0x8bd   :  { %1933 = vmatpush.msrb.mxu0 %v3605_v46 }
 0x8be   :  { %2396 = vmatmul.msk.f32.gmra.mxu1 %vm269_vm3, %v1710_v44  ;;  %2400 = vmatmul.msk.f32.gmra.mxu2 %vm269_vm3, %v1710_v44 }
 0x8bf   :  { %2404 = vmatmul.msk.f32.gmra.mxu3 %vm269_vm3, %v1710_v44  ;;  %1934 = vmatpush.msrb.mxu0 %v3611_v45  ;;  %v3716_v44 = vld [vmem:[%s3860_s2 + $0x6b8] sm:$0xff] }
 0x8c0   :  { %1986 = vmatpush.msra.mxu1 %v3716_v44 }
 0x8c1   :  { %1935 = vmatpush.msrb.mxu0 %v3618_v36 }
 0x8c2   :  { %2147 = vmatpush.msrb.mxu1 %v3571_v53 }
 0x8c3   :  { %1936 = vmatpush.msrb.mxu0 %v3624_v61 }
 0x8c4   :  { %2148 = vmatpush.msrb.mxu1 %v3576_v30 }
 0x8c5   :  { %1937 = vmatpush.msrb.mxu0 %v3630_v48 }
 0x8c6   :  { %2149 = vmatpush.msrb.mxu1 %v3600_v49 }
 0x8c8   :  { %2150 = vmatpush.msrb.mxu1 %v3605_v46 }
 0x8ca   :  { %2151 = vmatpush.msrb.mxu1 %v3611_v45 }
 0x8cc   :  { %2152 = vmatpush.msrb.mxu1 %v3618_v36 }
 0x8ce   :  { %2153 = vmatpush.msrb.mxu1 %v3624_v61 }
 0x8d0   :  { %2154 = vmatpush.msrb.mxu1 %v3630_v48 }
 0x923   :  { %v1754_v5 = vpop.f32.mrf.mxu1 }
 0x924   :  { %v1755_v8 = vadd.f32 %v2438_v3, %v1754_v5 }
 0x929   :  { %v1793_v7 = vpop.f32.mrf.mxu2 }
 0x92a   :  { %v1794_v9 = vadd.f32 %v2439_v31, %v1793_v7 }
 0x92b   :  { %v1757_v25 = vpop.f32.mrf.mxu1 }
 0x92c   :  { %v1873_v54 = vmul.f32 %v1794_v9, %v1755_v8  ;;  %v1758_v12 = vadd.f32 %v2438_v3, %v1757_v25  ;;  %v2082_v11 = vrot.slane %v1794_v9, 3 }
 0x92e   :  { %2405 = vmatmul.msk.f32.vlgmr.msra.gmra.mxu0 %vm269_vm3, %v1873_v54  ;;  %v2088_v35 = vmul.f32 %v2082_v11, %v1758_v12 }
 0x92f   :  { %2111 = vmatpush.msra.mxu0 %v3571_v53 }
 0x930   :  { %v2094_v40 = vrot.slane %v2088_v35, 5 }
 0x931   :  { %v1796_v33 = vpop.f32.mrf.mxu2  ;;  %2112 = vmatpush.msra.mxu0 %v3576_v30 }
 0x932   :  { %v1797_v13 = vadd.f32 %v2439_v31, %v1796_v33 }
 0x933   :  { %2113 = vmatpush.msra.mxu0 %v3600_v49  ;;  %v1760_v15 = vpop.f32.mrf.mxu1 }
 0x934   :  { %v1874_v14 = vmul.f32 %v1797_v13, %v1758_v12  ;;  %v1761_v17 = vadd.f32 %v2438_v3, %v1760_v15  ;;  %v1907_v19 = vrot.slane %v1797_v13, 5  ;;  %v2083_v52 = vrot.slane %v1797_v13, 3 }
 0x935   :  { %2114 = vmatpush.msra.mxu0 %v3605_v46 }
 0x936   :  { %2406 = vmatmul.msk.f32.gmra.mxu0 %vm269_vm3, %v1874_v14  ;;  %v2130_v22 = vrot.slane %v1874_v14, 5  ;;  %v2084_v51 = vsel %vm255_vm1, %v2082_v11, %v2083_v52 }
 0x937   :  { %2115 = vmatpush.msra.mxu0 %v3611_v45  ;;  %v2089_v37 = vmul.f32 %v2084_v51, %v1761_v17 }
 0x939   :  { %v1799_v16 = vpop.f32.mrf.mxu2  ;;  %2116 = vmatpush.msra.mxu0 %v3618_v36  ;;  %v2095_v57 = vrot.slane %v2089_v37, 5 }
 0x93a   :  { %v1800_v18 = vadd.f32 %v2439_v31, %v1799_v16 }
 0x93b   :  { %2117 = vmatpush.msra.mxu0 %v3624_v61  ;;  %v1763_v32 = vpop.f32.mrf.mxu1  ;;  %v2096_v2 = vsel %vm882_vm4, %v2094_v40, %v2095_v57 }
 0x93c   :  { %v1908_v20 = vrot.slane %v1800_v18, 5  ;;  %v2126_v50 = vmul.f32 %v1800_v18, %v1761_v17  ;;  %v1764_v23 = vadd.f32 %v2438_v3, %v1763_v32  ;;  %v3737_v18 = vld [vmem:[%s3860_s2 + $0x668] sm:$0xff] }
 0x93d   :  { %2118 = vmatpush.msra.mxu0 %v3630_v48  ;;  %v1832_v48 = vpop.f32.mrf.mxu3  ;;  %2037 = vmatpush.msra.mxu2 %v3737_v18  ;;  %v2440_v32 = vld [vmem:[%s3860_s2 + $0x628] ss:$0 sm:$0xff] }
 0x93e   :  { %v1909_v26 = vsel %vm882_vm4, %v1907_v19, %v1908_v20  ;;  %v2131_v27 = vrot.slane %v2126_v50, 5  ;;  %v2090_v39 = vmul.f32 %v2083_v52, %v1764_v23  ;;  %v3742_v19 = vld [vmem:[%s3860_s2 + $0x660] sm:$0xff]  ;;  %v3755_v50 = vld [vmem:[%s3860_s2 + $0x650] sm:$0xff]  ;;  %v1833_v51 = vadd.f32 %v2440_v32, %v1832_v48 }
 0x93f   :  { %v1914_v29 = vmul.f32 %v1909_v26, %v1755_v8  ;;  %2038 = vmatpush.msra.mxu2 %v3742_v19  ;;  %v3761_v26 = vld [vmem:[%s3860_s2 + $0x648] sm:$0xff]  ;;  %v2441_v48 = vld [vmem:[%s3860_s2 + $0x670] ss:$0 sm:$0xff] }
 0x940   :  { %v3659_v34 = vsel %vm882_vm4, %v2130_v22, %v2131_v27  ;;  %v2097_v60 = vrot.slane %v2090_v39, 5 }
 0x941   :  { %v1802_v43 = vpop.f32.mrf.mxu2  ;;  %2407 = vmatmul.msk.f32.vlgmr.msrb.gmra.mxu0 %vm269_vm3, %v1914_v29  ;;  %v3772_v29 = vld [vmem:[%s3860_s2 + $0x638] sm:$0xff] }
 0x942   :  { %v1803_v55 = vadd.f32 %v2439_v31, %v1802_v43  ;;  %v2098_v41 = vsel %vm882_vm4, %v2095_v57, %v2097_v60 }
 0x944   :  { %v1910_v47 = vrot.slane %v1803_v55, 5  ;;  %v2127_v56 = vmul.f32 %v1803_v55, %v1764_v23 }
 0x945   :  { %v1835_v17 = vpop.f32.mrf.mxu3 }
 0x946   :  { %v2133_v6 = vrot.slane %v2127_v56, 5  ;;  %v1911_v10 = vsel %vm882_vm4, %v1908_v20, %v1910_v47  ;;  %v3749_v20 = vld [vmem:[%s3860_s2 + $0x658] sm:$0xff]  ;;  %v3788_v43 = vadd.f32 %v2440_v32, %v1835_v17 }
 0x947   :  { %v1915_v42 = vmul.f32 %v1911_v10, %v1758_v12  ;;  %2039 = vmatpush.msra.mxu2 %v3749_v20 }
 0x948   :  { %v3665_v24 = vsel %vm882_vm4, %v2131_v27, %v2133_v6  ;;  %v3767_v27 = vld [vmem:[%s3860_s2 + $0x640] sm:$0xff]  ;;  %v1863_v47 = vrot.slane %v3788_v43, 5 }
 0x949   :  { %2408 = vmatmul.msk.f32.gmra.mxu0 %vm269_vm3, %v1915_v42  ;;  %2040 = vmatpush.msra.mxu2 %v3755_v50 }
 0x94b   :  { %2041 = vmatpush.msra.mxu2 %v3761_v26 }
 0x94d   :  { %v1838_v22 = vpop.f32.mrf.mxu3  ;;  %2042 = vmatpush.msra.mxu2 %v3767_v27 }
 0x94e   :  { %v3785_v52 = vadd.f32 %v2440_v32, %v1838_v22 }
 0x94f   :  { %2043 = vmatpush.msra.mxu2 %v3772_v29 }
 0x950   :  { %v1864_v55 = vrot.slane %v3785_v52, 5 }
 0x951   :  { %2416 = vmatmul.msk.f32.vlgmr.msra.gmra.mxu0 %vm269_vm3, %v2096_v2 }
 0x952   :  { %v1865_v56 = vsel %vm882_vm4, %v1863_v47, %v1864_v55 }
 0x953   :  { %v3801_v42 = vsub.f32 %v1833_v51, %v1865_v56 }
 0x955   :  { %v1841_v23 = vpop.f32.mrf.mxu3 }
 0x956   :  { %v3793_v11 = vadd.f32 %v2440_v32, %v1841_v23  ;;  %v1872_v23 = vld [vmem:[%s3860_s2 + $0x6f8] sm:$0x1] }
 0x958   :  { %v1866_v6 = vrot.slane %v3793_v11, 5 }
 0x959   :  { %2417 = vmatmul.msk.f32.gmra.mxu0 %vm269_vm3, %v2098_v41 }
 0x9ab   :  { %v1898_v28 = vpop.f32.mrf.mxu0 }
 0x9b3   :  { %v1901_v63 = vpop.f32.mrf.mxu0 }
 0x9be   :  { %v1939_v21 = vpop.f32.mrf.mxu0 }
 0x9bf   :  { %v1945_v5 = vmax.f32 %v1898_v28, %v1939_v21 }
 0x9c1   :  { %v1947_v3 = vsub.f32 %v1898_v28, %v1945_v5  ;;  %v1953_v31 = vsub.f32 %v1939_v21, %v1945_v5 }
 0x9c3   :  { %v1949_v7 = vmul.f32 1.442695, %v1947_v3  ;;  %v1955_v8 = vmul.f32 1.442695, %v1953_v31 }
 0x9c5   :  { %2514 = vpow2.f32 %v1949_v7 }
 0x9c6   :  { %2516 = vpow2.f32 %v1955_v8  ;;  %v1942_v9 = vpop.f32.mrf.mxu0 }
 0x9c7   :  { %v1946_v53 = vmax.f32 %v1901_v63, %v1942_v9 }
 0x9c9   :  { %v1948_v30 = vsub.f32 %v1901_v63, %v1946_v53  ;;  %v1954_v25 = vsub.f32 %v1942_v9, %v1946_v53 }
 0x9cb   :  { %v2515_v49 = vpop.eup %2514  ;;  %v1951_v54 = vmul.f32 1.442695, %v1948_v30  ;;  %v1957_v33 = vmul.f32 1.442695, %v1954_v25 }
 0x9cc   :  { %v2517_v46 = vpop.eup %2516 }
 0x9cd   :  { %v1959_v12 = vadd.f32 %v2517_v46, %v2515_v49  ;;  %2518 = vpow2.f32 %v1951_v54 }
 0x9ce   :  { %2520 = vpow2.f32 %v1957_v33  ;;  %v2120_v28 = vpop.f32.mrf.mxu0 }
 0x9cf   :  { %2522 = vrcp.f32 %v1959_v12 }
 0x9d3   :  { %v2519_v45 = vpop.eup %2518 }
 0x9d4   :  { %v2521_v13 = vpop.eup %2520 }
 0x9d5   :  { %v2523_v14 = vpop.eup %2522  ;;  %v1960_v15 = vadd.f32 %v2521_v13, %v2519_v45 }
 0x9d6   :  { %v1963_v36 = vmul.f32 %v2523_v14, %v2515_v49  ;;  %v2123_v31 = vpop.f32.mrf.mxu0 }
 0x9d7   :  { %2524 = vrcp.f32 %v1960_v15 }
 0x9d8   :  { %2409 = vmatmul.msk.f32.vlgmr.msra.gmra.mxu1 %vm269_vm3, %v1963_v36 }
 0x9dd   :  { %v2525_v61 = vpop.eup %2524 }
 0x9de   :  { %v1964_v16 = vmul.f32 %v2525_v61, %v2519_v45 }
 0x9e0   :  { %2410 = vmatmul.msk.f32.gmra.mxu1 %vm269_vm3, %v1964_v16 }
 0x9e8   :  { %2418 = vmatmul.msk.f32.vlgmr.msrb.gmra.mxu1 %vm269_vm3, %v3659_v34  ;;  %v3782_v34 = vld [vmem:[%s3860_s2 + $0x630] sm:$0xff] }
 0x9e9   :  { %2044 = vmatpush.msra.mxu2 %v3782_v34 }
 0x9eb   :  { %2196 = vmatpush.msrb.mxu2 %v3675_v38 }
 0x9ed   :  { %2197 = vmatpush.msrb.mxu2 %v3681_v4 }
 0x9ef   :  { %2198 = vmatpush.msrb.mxu2 %v3687_v62 }
 0x9f0   :  { %2419 = vmatmul.msk.f32.gmra.mxu1 %vm269_vm3, %v3665_v24  ;;  %v1867_v24 = vsel %vm882_vm4, %v1864_v55, %v1866_v6 }
 0x9f1   :  { %2199 = vmatpush.msrb.mxu2 %v3693_v58  ;;  %v3808_v35 = vsub.f32 %v3788_v43, %v1867_v24 }
 0x9f3   :  { %2200 = vmatpush.msrb.mxu2 %v3699_v59 }
 0x9f5   :  { %2201 = vmatpush.msrb.mxu2 %v3705_v0 }
 0x9f7   :  { %2202 = vmatpush.msrb.mxu2 %v3711_v1 }
 0x9f9   :  { %2203 = vmatpush.msrb.mxu2 %v3716_v44 }
 0xa55   :  { %v1988_v10 = vpop.f32.mrf.mxu1 }
 0xa56   :  { %v1994_v37 = vmul.f32 %v1988_v10, %v3801_v42 }
 0xa58   :  { %v1998_v57 = vrot.slane %v1994_v37, 3 }
 0xa5a   :  { %v2004_v60 = vadd.f32 %v1998_v57, %v3788_v43 }
 0xa5c   :  { %v2020_v4 = vrot.slane %v2004_v60, 5 }
 0xa5d   :  { %v1991_v40 = vpop.f32.mrf.mxu1 }
 0xa5e   :  { %v1995_v39 = vmul.f32 %v1991_v40, %v3808_v35 }
 0xa60   :  { %v1999_v2 = vrot.slane %v1995_v39, 3 }
 0xa62   :  { %v2000_v41 = vsel %vm255_vm1, %v1998_v57, %v1999_v2  ;;  %v2006_v63 = vadd.f32 %v1999_v2, %v3793_v11 }
 0xa63   :  { %v2005_v38 = vadd.f32 %v2000_v41, %v3785_v52 }
 0xa64   :  { %v2023_v3 = vrot.slane %v2006_v63, 5 }
 0xa65   :  { %v2021_v62 = vrot.slane %v2005_v38, 5  ;;  %v2156_v58 = vpop.f32.mrf.mxu1 }
 0xa66   :  { %v2162_v59 = vmax.f32 %v2120_v28, %v2156_v58 }
 0xa67   :  { %v2022_v0 = vsel %vm882_vm4, %v2020_v4, %v2021_v62  ;;  %v2024_v9 = vsel %vm882_vm4, %v2021_v62, %v2023_v3 }
 0xa68   :  { %v2164_v1 = vsub.f32 %v2120_v28, %v2162_v59  ;;  %v2170_v44 = vsub.f32 %v2156_v58, %v2162_v59  ;;  %2411 = vmatmul.msk.f32.vlgmr.msra.gmra.mxu2 %vm269_vm3, %v2022_v0 }
 0xa6a   :  { %v2166_v21 = vmul.f32 1.442695, %v2164_v1  ;;  %v2172_v5 = vmul.f32 1.442695, %v2170_v44 }
 0xa6c   :  { %2526 = vpow2.f32 %v2166_v21 }
 0xa6d   :  { %2528 = vpow2.f32 %v2172_v5  ;;  %v2159_v7 = vpop.f32.mrf.mxu1 }
 0xa6e   :  { %v2163_v8 = vmax.f32 %v2123_v31, %v2159_v7 }
 0xa70   :  { %v2165_v53 = vsub.f32 %v2123_v31, %v2163_v8  ;;  %v2171_v30 = vsub.f32 %v2159_v7, %v2163_v8  ;;  %2412 = vmatmul.msk.f32.gmra.mxu2 %vm269_vm3, %v2024_v9 }
 0xa72   :  { %v2527_v25 = vpop.eup %2526  ;;  %v2168_v49 = vmul.f32 1.442695, %v2165_v53  ;;  %v2174_v54 = vmul.f32 1.442695, %v2171_v30 }
 0xa73   :  { %v2529_v33 = vpop.eup %2528 }
 0xa74   :  { %v2176_v46 = vadd.f32 %v2529_v33, %v2527_v25  ;;  %2530 = vpow2.f32 %v2168_v49 }
 0xa75   :  { %2532 = vpow2.f32 %v2174_v54 }
 0xa76   :  { %2534 = vrcp.f32 %v2176_v46 }
 0xa7a   :  { %v2531_v12 = vpop.eup %2530 }
 0xa7b   :  { %v2533_v45 = vpop.eup %2532 }
 0xa7c   :  { %v2535_v13 = vpop.eup %2534  ;;  %v2177_v14 = vadd.f32 %v2533_v45, %v2531_v12 }
 0xa7d   :  { %v2180_v15 = vmul.f32 %v2535_v13, %v2527_v25 }
 0xa7e   :  { %2536 = vrcp.f32 %v2177_v14 }
 0xa7f   :  { %2420 = vmatmul.msk.f32.vlgmr.msrb.gmra.mxu2 %vm269_vm3, %v2180_v15 }
 0xa84   :  { %v2537_v36 = vpop.eup %2536 }
 0xa85   :  { %v2181_v61 = vmul.f32 %v2537_v36, %v2531_v12 }
 0xa87   :  { %2421 = vmatmul.msk.f32.gmra.mxu2 %vm269_vm3, %v2181_v61 }
 0xaeb   :  { %v2046_v16 = vpop.f32.mrf.mxu2 }
 0xaec   :  { %v2047_v32 = vadd.f32 %v2441_v48, %v2046_v16 }
 0xaf3   :  { %v2049_v17 = vpop.f32.mrf.mxu2 }
 0xaf4   :  { %v2050_v22 = vadd.f32 %v2441_v48, %v2049_v17 }
 0xaf6   :  { %2413 = vmatpush.xpose.msk.msrb.mxu3 %vm269_vm3, %v2050_v22 }
 0xafa   :  { %2414 = vmatpush.xpose.msk.msrb.mxu3 %vm269_vm3, %v2047_v32 }
 0xafd   :  { %2415 = vmatmul.msk.f32.vlgmr.msrb.gmra.mxu3 %vm269_vm3, %v1872_v23 }
 0xafe   :  { %2244 = vmatpush.msra.mxu3 %v3737_v18 }
 0xb00   :  { %2245 = vmatpush.msra.mxu3 %v3742_v19 }
 0xb02   :  { %2246 = vmatpush.msra.mxu3 %v3749_v20  ;;  %v2205_v55 = vpop.f32.mrf.mxu2 }
 0xb03   :  { %v2211_v47 = vmul.f32 %v2205_v55, %v3801_v42 }
 0xb04   :  { %2247 = vmatpush.msra.mxu3 %v3755_v50 }
 0xb05   :  { %v2215_v18 = vrot.slane %v2211_v47, 3 }
 0xb06   :  { %2248 = vmatpush.msra.mxu3 %v3761_v26 }
 0xb07   :  { %v2221_v20 = vadd.f32 %v2215_v18, %v3788_v43  ;;  %v2289_v43 = vld [vmem:[%s3860_s2 + $0x700] sm:$0x1] }
 0xb08   :  { %2249 = vmatpush.msra.mxu3 %v3767_v27  ;;  %2427 = vpush %v2289_v43 }
 0xb09   :  { %v2227_v26 = vrot.slane %v2221_v20, 5 }
 0xb0a   :  { %2250 = vmatpush.msra.mxu3 %v3772_v29  ;;  %v2208_v56 = vpop.f32.mrf.mxu2 }
 0xb0b   :  { %v2212_v19 = vmul.f32 %v2208_v56, %v3808_v35 }
 0xb0c   :  { %2251 = vmatpush.msra.mxu3 %v3782_v34 }
 0xb0d   :  { %v2216_v51 = vrot.slane %v2212_v19, 3 }
 0xb0f   :  { %v2217_v50 = vsel %vm255_vm1, %v2215_v18, %v2216_v51  ;;  %v2223_v27 = vadd.f32 %v2216_v51, %v3793_v11  ;;  %vm2295_vm1 = vcmask 99328  }
 0xb10   :  { %v2222_v6 = vadd.f32 %v2217_v50, %v3785_v52 }
 0xb11   :  { %v2230_v29 = vrot.slane %v2223_v27, 5 }
 0xb12   :  { %v2228_v10 = vrot.slane %v2222_v6, 5 }
 0xb14   :  { %v2229_v42 = vsel %vm882_vm4, %v2227_v26, %v2228_v10  ;;  %v2231_v34 = vsel %vm882_vm4, %v2228_v10, %v2230_v29 }
 0xb15   :  { %2422 = vmatmul.msk.f32.vlgmr.msra.gmra.mxu3 %vm269_vm3, %v2229_v42 }
 0xb1d   :  { %2423 = vmatmul.msk.f32.gmra.mxu3 %vm269_vm3, %v2231_v34 }
 0xb39   :  { %s2428_s4 = spop %2427 }
 0xb3a   :  { %v2292_v39 = vstv %s2428_s4 }
 0xb80   :  { %v2078_v37 = vpop.f32.mrf.mxu3 }
 0xb98   :  { %v2253_v52 = vpop.f32.mrf.mxu3 }
 0xb99   :  { %v2254_v11 = vadd.f32 %v2441_v48, %v2253_v52 }
 0xba0   :  { %v2256_v24 = vpop.f32.mrf.mxu3 }
 0xba1   :  { %v2257_v35 = vadd.f32 %v2441_v48, %v2256_v24 }
 0xba3   :  { %2424 = vmatpush.xpose.msk.msrb.mxu0 %vm269_vm3, %v2257_v35 }
 0xba7   :  { %2425 = vmatpush.xpose.msk.msrb.mxu0 %vm269_vm3, %v2254_v11 }
 0xbaa   :  { %2426 = vmatmul.msk.f32.vlgmr.msrb.gmra.mxu0 %vm269_vm3, %v1872_v23 }
 0xc27   :  { %v2282_v57 = vpop.f32.mrf.mxu0 }
 0xc28   :  { %v2286_v40 = vrot.slane %v2282_v57, 7 }
 0xc2a   :  { %v2288_v2 = vsel %vm253_vm0, %v2078_v37, %v2286_v40 }
 0xc2b   :  { %v2294_v60 = vadd.f32 %v2292_v39, %v2288_v2 }
 0xc2d   :  { %2296 = vst.msk [vmem:[#allocation2] sm:$0x3] %vm2295_vm1, %v2294_v60 }
 0xc2e   :  { %2307 = dma.vmem_to_hbm [thread:$0]  %s2303_s6, 32, %s2305_s7, [#allocation3]  }
 0xc2f   :  { %2562 = dma.done.wait [#allocation3], 32  }
 0xc30   :  { %2563 = vsyncadd [#allocation3], 4294967264 }
 0xc31   :  { %2312 = vsyncpa [#allocation3], 1 }

</bundles_post_ra>
